<compile_context>
chip_gen: v7x
topology: tpu7x:2x2x1
jax: 0.10.0
libtpu: 0.0.40
codegen_flags: <defaults>
</compile_context>

<pallas_src>
import functools

import numpy as np
import jax
import jax.numpy as jnp
from jax.experimental import pallas as pl
from jax.experimental.pallas import tpu as pltpu


def _cdiv(a, b):
    return -(-a // b)


def _round_up(a, b):
    return ((a + b - 1) // b) * b


def _matT(a, b):
    # a: (N, A), b: (N, B)  ->  a^T @ b : (A, B), contracting over rows (MXU).
    return jax.lax.dot_general(
        a, b,
        dimension_numbers=(((0,), (0,)), ((), ())),
        preferred_element_type=jnp.float32,
    )


# -----------------------------------------------------------------------------
# pass 1: per-bucket sums / counts / sum-of-squared-norms.
# buckets: 0..L-1 = label buckets for time (split-1);  L = "test" bucket.
# grid = (2 cores, tiles_per_core);  each core accumulates into its own slice.
# -----------------------------------------------------------------------------
def _stats_kernel(idx_ref, x_ref, sum_ref, aux_ref, *, num_label, block_n,
                  tiles_per_core, n_rows):
    @pl.when(pl.program_id(1) == 0)
    def _():
        sum_ref[...] = jnp.zeros_like(sum_ref)
        aux_ref[...] = jnp.zeros_like(aux_ref)

    x = x_ref[...]                               # (TN, F), native dtype
    bucket = idx_ref[...][:, 0:1]                # (TN, 1) int32 stats bucket
    tn = x.shape[0]
    nb = num_label + 1

    # Row-validity mask: covers the partial last tile and (for odd tile counts)
    # the duplicated clamped tile on the second core.
    gtile = pl.program_id(0) * tiles_per_core + pl.program_id(1)
    row0 = gtile * block_n
    rows = jax.lax.broadcasted_iota(jnp.int32, (tn, 1), 0) + row0
    valid = rows < n_rows                        # (TN, 1) bool

    iota_b = jax.lax.broadcasted_iota(jnp.int32, (tn, nb), 1)
    oh = jnp.logical_and(bucket == iota_b, valid)      # (TN, nb) bool

    # Zero garbage rows so NaN/Inf bits in the partial block can't poison the
    # MXU accumulation (0 * NaN = NaN).
    xm = jnp.where(valid, x, jnp.zeros_like(x))

    # per-bucket feature sums on the MXU; f32 accumulation.
    sum_ref[...] += _matT(oh.astype(xm.dtype), xm)

    # per-bucket [count, sum ||x||^2] — one tiny 2-lane f32 matmul.
    xf = xm.astype(jnp.float32)
    rowsq = jnp.sum(xf * xf, axis=1, keepdims=True)            # (TN, 1)
    lane2 = jax.lax.broadcasted_iota(jnp.int32, (tn, 2), 1)
    aux_in = jnp.where(lane2 == 0, jnp.float32(1.0), rowsq)    # (TN, 2)
    aux_ref[...] += _matT(oh.astype(jnp.float32), aux_in)


# -----------------------------------------------------------------------------
# pass 2: fused epilogue (alpha + blend means, recomputed per tile from the
# tiny stats) + per-row blend.  Embarrassingly parallel over row tiles.
# -----------------------------------------------------------------------------
def _blend_kernel(idx_ref, x_ref, sum_ref, aux_ref, out_ref, *, num_label):
    L = num_label

    # ---- tiny epilogue: reduce the two per-core partials, derive alpha/means.
    s = sum_ref[...]                              # (2, L+1, F) f32
    a = aux_ref[...]                              # (2, L+1, 2) f32
    sums = s[0] + s[1]                            # (L+1, F)
    aux = a[0] + a[1]                             # (L+1, 2)
    feat = sums.shape[1]

    cnt = aux[:, 0:1]                             # (L+1, 1)
    ssq = aux[:, 1:2]                             # (L+1, 1)

    sum_f = sums[:L, :]                           # (L, F) time split-1 buckets
    cnt_f = cnt[:L, :]                            # (L, 1)
    ssq_f = ssq[:L, :]                            # (L, 1)
    test_sum = sums[L:L + 1, :]                   # (1, F)
    test_cnt = cnt[L:L + 1, :]                    # (1, 1)
    test_ssq = ssq[L:L + 1, :]                    # (1, 1)

    train_mean = sum_f / jnp.maximum(1.0, cnt_f)                    # (L, F)
    cnt_t = jnp.sum(cnt_f, axis=0, keepdims=True)                   # (1, 1)
    time_mean = jnp.sum(sum_f, axis=0, keepdims=True) / jnp.maximum(1.0, cnt_t)
    ssq_t = jnp.sum(ssq_f, axis=0, keepdims=True)                   # (1, 1)

    # rsq = sum_u ||x_u - m_{l_u}||^2 = sum||x||^2 - sum_l cnt_l ||m_l||^2
    m_sq = jnp.sum(train_mean * train_mean, axis=1, keepdims=True)  # (L, 1)
    rsq = ssq_t - jnp.sum(cnt_f * m_sq, axis=0, keepdims=True)
    # msq = sum_l cnt_l ||m_l - time_mean||^2
    diff = train_mean - time_mean
    msq = jnp.sum(cnt_f * jnp.sum(diff * diff, axis=1, keepdims=True),
                  axis=0, keepdims=True)
    # test_var = (sum||x||^2 - cnt ||test_mean||^2) / max(1, cnt - 1)
    test_mean = test_sum / jnp.maximum(1.0, test_cnt)
    test_var = test_ssq - test_cnt * jnp.sum(test_mean * test_mean,
                                             axis=1, keepdims=True)
    test_var = test_var / jnp.maximum(1.0, test_cnt - 1.0)

    denom = jnp.maximum(1.0, cnt_t - 1.0)
    alpha_sq = (test_var - msq / denom) / jnp.maximum(1e-6, rsq / denom)
    alpha = jnp.where(alpha_sq > 0.0,
                      jnp.sqrt(jnp.maximum(alpha_sq, 0.0)), 0.0)    # (1, 1)

    # ---- per-row blend.
    x = x_ref[...]                                # (TN, F)
    code = idx_ref[...][:, 1:2]                   # (TN, 1): label if train else -1
    tn = x.shape[0]
    is_train = code >= 0                          # (TN, 1)

    iota_l = jax.lax.broadcasted_iota(jnp.int32, (tn, L), 1)
    oh_l = (code == iota_l).astype(jnp.float32)                     # (TN, L)
    row_mean = jnp.dot(oh_l, train_mean,
                       preferred_element_type=jnp.float32)          # (TN, F)

    xf = x.astype(jnp.float32)
    blended = alpha * xf + (1.0 - alpha) * row_mean
    out_ref[...] = jnp.where(is_train, blended, xf).astype(out_ref.dtype)


# -----------------------------------------------------------------------------
# wrapper
# -----------------------------------------------------------------------------
def jj_norm(x, labels, times, *, num_time, num_label, split, block_n=None):
    assert split >= 1, "reference code relies on the stale loop variable t = split - 1"
    del num_time  # only time (split-1) and the test bucket are ever consumed
    N, F = x.shape
    L = num_label
    nb = L + 1

    # ---- per-generation VMEM budget / row-tile sizing --------------------
    try:
        vmem_cap = int(pltpu.get_tpu_info().vmem_capacity_bytes)
    except Exception:
        vmem_cap = 64 * 1024 * 1024                       # v7x-safe fallback
    vmem_limit = min(vmem_cap * 3 // 4, 96 * 1024 * 1024)  # ~96MiB v5e/v6e, ~48MiB v7x

    itemsize = jnp.dtype(x.dtype).itemsize
    if block_n is None:
        # 2x double-buffered in/out native-dtype blocks + ~3 f32 temporaries.
        per_row = F * (4 * itemsize + 12) + 64
        block_n = (vmem_limit // 2) // max(1, per_row)
    block_n = min(int(block_n), 2048, _round_up(N, 16))
    block_n = max(16, (block_n // 16) * 16)

    n_tiles = _cdiv(N, block_n)
    tpc = _cdiv(n_tiles, 2)                      # row tiles per core (pass 1)

    # ---- host-side precompute of the per-row codes (tiny XLA op) ---------
    t32 = times.astype(jnp.int32)
    l32 = labels.astype(jnp.int32)
    stat_bucket = jnp.where(t32 == split - 1, l32,
                            jnp.where(t32 >= split, jnp.int32(L), jnp.int32(-1)))
    blend_code = jnp.where(t32 < split, l32, jnp.int32(-1))
    idx = jnp.stack([stat_bucket, blend_code], axis=1).astype(jnp.int32)  # (N, 2)

    # ---- pass 1: per-bucket statistics, core-parallel over row tiles -----
    nt_minus1 = n_tiles - 1

    def row_map(c, i):
        # contiguous split across cores; clamp keeps the block index in range
        # (masked inside the kernel via the global row index).
        return (jnp.minimum(c * tpc + i, nt_minus1), 0)

    stats_kernel = functools.partial(
        _stats_kernel, num_label=L, block_n=block_n,
        tiles_per_core=tpc, n_rows=N)

    sum_acc, aux_acc = pl.pallas_call(
        stats_kernel,
        out_shape=(jax.ShapeDtypeStruct((2, nb, F), jnp.float32),
                   jax.ShapeDtypeStruct((2, nb, 2), jnp.float32)),
        grid=(2, tpc),
        in_specs=[pl.BlockSpec((block_n, 2), row_map),
                  pl.BlockSpec((block_n, F), row_map)],
        out_specs=(pl.BlockSpec((None, nb, F), lambda c, i: (c, 0, 0)),
                   pl.BlockSpec((None, nb, 2), lambda c, i: (c, 0, 0))),
        compiler_params=pltpu.CompilerParams(
            dimension_semantics=("parallel", "arbitrary"),
            vmem_limit_bytes=vmem_limit),
    )(idx, x)

    # ---- pass 2: fused epilogue + blend, parallel over row tiles ---------
    blend_kernel = functools.partial(_blend_kernel, num_label=L)
    out = pl.pallas_call(
        blend_kernel,
        out_shape=jax.ShapeDtypeStruct((N, F), x.dtype),
        grid=(n_tiles,),
        in_specs=[pl.BlockSpec((block_n, 2), lambda i: (i, 0)),
                  pl.BlockSpec((block_n, F), lambda i: (i, 0)),
                  pl.BlockSpec((2, nb, F), lambda i: (0, 0, 0)),
                  pl.BlockSpec((2, nb, 2), lambda i: (0, 0, 0))],
        out_specs=pl.BlockSpec((block_n, F), lambda i: (i, 0)),
        compiler_params=pltpu.CompilerParams(
            dimension_semantics=("parallel",),
            vmem_limit_bytes=vmem_limit),
    )(idx, x, sum_acc, aux_acc)

    return out


# -----------------------------------------------------------------------------
# NumPy reference (straight transcription of the PyTorch forward, incl. stale-t)
# -----------------------------------------------------------------------------
def _ref_jj_norm(x, labels, times, num_time, num_label, split):
    x = np.asarray(x, dtype=np.float64)
    N, F = x.shape
    out = x.copy()
    train_mean = np.zeros((num_time, num_label, F))
    train_cnt = np.zeros((num_time, num_label))
    train_time_mean = np.zeros((num_time, F))
    train_time_cnt = np.zeros(num_time)
    test_cnt = 0.0
    test_mean = np.zeros(F)
    for u in range(N):
        t = int(times[u])
        if t >= split:
            test_cnt += 1.0
            test_mean += x[u]
        else:
            train_time_cnt[t] += 1.0
            train_cnt[t, labels[u]] += 1.0
            train_mean[t, labels[u]] += x[u]
    for t in range(num_time):
        for l in range(num_label):
            train_time_mean[t] += train_mean[t, l]
            train_mean[t, l] = train_mean[t, l] / max(1.0, train_cnt[t, l])
        train_time_mean[t] /= max(1.0, train_time_cnt[t])
    test_mean /= max(1.0, test_cnt)
    test_var = 0.0
    rsq = np.zeros(num_time)
    msq = np.zeros(num_time)
    for u in range(N):
        if int(times[u]) >= split:
            test_var += np.sum((x[u] - test_mean) ** 2)
        else:
            t = int(times[u])
            msq[t] += np.sum((train_mean[t, labels[u]] - train_time_mean[t]) ** 2)
            rsq[t] += np.sum((x[u] - train_mean[t, labels[u]]) ** 2)
    test_var /= max(1.0, test_cnt - 1.0)
    for t in range(split):
        msq[t] /= max(1.0, train_time_cnt[t] - 1.0)
        rsq[t] /= max(1.0, train_time_cnt[t] - 1.0)
    alpha = np.ones(split)
    for t in range(split):
        a2 = (test_var - msq[t]) / max(1e-6, rsq[t])
        alpha[t] = np.sqrt(a2) if a2 > 0 else 0.0
    t = split - 1  # stale loop variable, exactly as in the PyTorch reference
    for u in range(N):
        if int(times[u]) < split:
            out[u] = alpha[t] * x[u] + (1.0 - alpha[t]) * train_mean[t, labels[u]]
    return out


if __name__ == "__main__":
    num_time, num_label, split = 4, 3, 3
    N, F = 600, 128  # lane-dense F; N not a tile multiple (exercises partial blocks)

    key = jax.random.PRNGKey(0)
    x = jax.random.normal(key, (N, F), dtype=jnp.float32)
    # deterministic label / time assignment covering every bucket
    times = jnp.arange(N, dtype=jnp.int32) % num_time
    labels = (jnp.arange(N, dtype=jnp.int32) * 7) % num_label

    out = jj_norm(x, labels, times,
                  num_time=num_time, num_label=num_label, split=split)
    out = jax.block_until_ready(out)

    ref = _ref_jj_norm(np.asarray(x), np.asarray(labels), np.asarray(times),
                       num_time, num_label, split)
    np.testing.assert_allclose(np.asarray(out), ref, rtol=5e-2, atol=5e-2)

    print("KERNEL_OK")
</pallas_src>

<mosaic_0001>
module attributes {stable_mosaic.version = 11 : i64} {
  func.func @_stats_kernel(%arg0: i32, %arg1: i32, %arg2: memref<608x2xi32, #tpu.memory_space<vmem>>, %arg3: memref<608x128xf32, #tpu.memory_space<vmem>>, %arg4: memref<1x4x128xf32, #tpu.memory_space<vmem>>, %arg5: memref<1x4x2xf32, #tpu.memory_space<vmem>>) attributes {dimension_semantics = [#tpu.dimension_semantics<parallel>, #tpu.dimension_semantics<arbitrary>], iteration_bounds = array<i64: 2, 1>, scalar_prefetch = 0 : i64, scratch_operands = 0 : i64, tpu.core_type = #tpu.core_type<tc>, window_params = [{transform_indices = @transform_0, window_bounds = array<i64: 608, 2>}, {transform_indices = @transform_1, window_bounds = array<i64: 608, 128>}, {transform_indices = @transform_2, window_bounds = array<i64: 1, 4, 128>}, {transform_indices = @transform_3, window_bounds = array<i64: 1, 4, 2>}]} {
    %c0_i32 = arith.constant 0 : i32
    %0 = arith.cmpi eq, %arg1, %c0_i32 : i32
    %1 = arith.extui %0 : i1 to i32
    %c0_i32_0 = arith.constant 0 : i32
    %2 = arith.cmpi ne, %1, %c0_i32_0 : i32
    scf.if %2 {
      %cst_21 = arith.constant 0.000000e+00 : f32
      %51 = vector.broadcast %cst_21 : f32 to vector<4x128xf32>
      %c0_22 = arith.constant 0 : index
      %c0_23 = arith.constant 0 : index
      %c0_24 = arith.constant 0 : index
      %52 = vector.load %arg4[%c0_22, %c0_23, %c0_24] : memref<1x4x128xf32, #tpu.memory_space<vmem>>, vector<1x4x128xf32>
      %53 = vector.shape_cast %52 : vector<1x4x128xf32> to vector<4x128xf32>
      %54 = vector.shape_cast %51 : vector<4x128xf32> to vector<1x4x128xf32>
      tpu.vector_store %arg4[%c0_22, %c0_23, %c0_24], %54 {strides = array<i32>} : memref<1x4x128xf32, #tpu.memory_space<vmem>>, vector<1x4x128xf32>,
      %cst_25 = arith.constant 0.000000e+00 : f32
      %55 = vector.broadcast %cst_25 : f32 to vector<4x2xf32>
      %c0_26 = arith.constant 0 : index
      %c0_27 = arith.constant 0 : index
      %c0_28 = arith.constant 0 : index
      %56 = vector.load %arg5[%c0_26, %c0_27, %c0_28] : memref<1x4x2xf32, #tpu.memory_space<vmem>>, vector<1x4x2xf32>
      %57 = vector.shape_cast %56 : vector<1x4x2xf32> to vector<4x2xf32>
      %58 = vector.shape_cast %55 : vector<4x2xf32> to vector<1x4x2xf32>
      tpu.vector_store %arg5[%c0_26, %c0_27, %c0_28], %58 {strides = array<i32>} : memref<1x4x2xf32, #tpu.memory_space<vmem>>, vector<1x4x2xf32>,
    } else {
    }
    %c0 = arith.constant 0 : index
    %c0_1 = arith.constant 0 : index
    %3 = vector.load %arg3[%c0, %c0_1] : memref<608x128xf32, #tpu.memory_space<vmem>>, vector<608x128xf32>
    %c0_2 = arith.constant 0 : index
    %c0_3 = arith.constant 0 : index
    %4 = vector.load %arg2[%c0_2, %c0_3] : memref<608x2xi32, #tpu.memory_space<vmem>>, vector<608x2xi32>
    %5 = vector.extract_strided_slice %4 {offsets = [0, 0], sizes = [608, 1], strides = [1, 1]} : vector<608x2xi32> to vector<608x1xi32>
    %c1_i32 = arith.constant 1 : i32
    %6 = arith.muli %arg0, %c1_i32 : i32
    %7 = arith.addi %6, %arg1 : i32
    %c608_i32 = arith.constant 608 : i32
    %8 = arith.muli %7, %c608_i32 : i32
    %9 = tpu.iota {dimensions = array<i32: 0>} : vector<608x1xi32>
    %10 = vector.broadcast %8 : i32 to vector<608x1xi32>
    %11 = arith.addi %9, %10 : vector<608x1xi32>
    %c600_i32 = arith.constant 600 : i32
    %12 = vector.broadcast %c600_i32 : i32 to vector<608x1xi32>
    %13 = arith.cmpi slt, %11, %12 : vector<608x1xi32>
    %14 = tpu.iota {dimensions = array<i32: 1>} : vector<608x4xi32>
    %15 = vector.broadcast %5 : vector<608x1xi32> to vector<608x4xi32>
    %16 = arith.cmpi eq, %15, %14 : vector<608x4xi32>
    %17 = vector.broadcast %13 : vector<608x1xi1> to vector<608x4xi1>
    %18 = arith.andi %16, %17 : vector<608x4xi1>
    %cst = arith.constant 0.000000e+00 : f32
    %19 = vector.broadcast %cst : f32 to vector<608x128xf32>
    %20 = vector.shape_cast %13 : vector<608x1xi1> to vector<608x1xi1>
    %21 = vector.broadcast %20 : vector<608x1xi1> to vector<608x128xi1>
    %22 = arith.select %21, %3, %19 : vector<608x128xi1>, vector<608x128xf32>
    %c0_4 = arith.constant 0 : index
    %c0_5 = arith.constant 0 : index
    %c0_6 = arith.constant 0 : index
    %23 = vector.load %arg4[%c0_4, %c0_5, %c0_6] : memref<1x4x128xf32, #tpu.memory_space<vmem>>, vector<1x4x128xf32>
    %24 = vector.shape_cast %23 : vector<1x4x128xf32> to vector<4x128xf32>
    %25 = arith.extui %18 : vector<608x4xi1> to vector<608x4xi32>
    %26 = arith.sitofp %25 : vector<608x4xi32> to vector<608x4xf32>
    %cst_7 = arith.constant dense<0.000000e+00> : vector<4x128xf32>
    %27 = tpu.matmul %26, %22, %cst_7 {dimension_numbers = #tpu.dot_dimension_numbers<[0], [0], [1], [1], [0, 1, 1, 1], [], []>} : vector<608x4xf32>, vector<608x128xf32>, vector<4x128xf32> -> vector<4x128xf32>
    %28 = arith.addf %24, %27 : vector<4x128xf32>
    %c0_8 = arith.constant 0 : index
    %c0_9 = arith.constant 0 : index
    %c0_10 = arith.constant 0 : index
    %29 = vector.load %arg4[%c0_8, %c0_9, %c0_10] : memref<1x4x128xf32, #tpu.memory_space<vmem>>, vector<1x4x128xf32>
    %30 = vector.shape_cast %29 : vector<1x4x128xf32> to vector<4x128xf32>
    %31 = vector.shape_cast %28 : vector<4x128xf32> to vector<1x4x128xf32>
    tpu.vector_store %arg4[%c0_8, %c0_9, %c0_10], %31 {strides = array<i32>} : memref<1x4x128xf32, #tpu.memory_space<vmem>>, vector<1x4x128xf32>,
    %32 = arith.mulf %22, %22 : vector<608x128xf32>
    %cst_11 = arith.constant dense<0.000000e+00> : vector<608xf32>
    %33 = vector.multi_reduction <add>, %32, %cst_11 [1] : vector<608x128xf32> to vector<608xf32>
    %34 = vector.shape_cast %33 : vector<608xf32> to vector<608x1xf32>
    %35 = tpu.iota {dimensions = array<i32: 1>} : vector<608x2xi32>
    %c0_i32_12 = arith.constant 0 : i32
    %36 = vector.broadcast %c0_i32_12 : i32 to vector<608x2xi32>
    %37 = arith.cmpi eq, %35, %36 : vector<608x2xi32>
    %cst_13 = arith.constant 1.000000e+00 : f32
    %38 = vector.broadcast %cst_13 : f32 to vector<608x2xf32>
    %39 = vector.shape_cast %34 : vector<608x1xf32> to vector<608x1xf32>
    %40 = vector.broadcast %39 : vector<608x1xf32> to vector<608x2xf32>
    %41 = arith.select %37, %38, %40 : vector<608x2xi1>, vector<608x2xf32>
    %c0_14 = arith.constant 0 : index
    %c0_15 = arith.constant 0 : index
    %c0_16 = arith.constant 0 : index
    %42 = vector.load %arg5[%c0_14, %c0_15, %c0_16] : memref<1x4x2xf32, #tpu.memory_space<vmem>>, vector<1x4x2xf32>
    %43 = vector.shape_cast %42 : vector<1x4x2xf32> to vector<4x2xf32>
    %44 = arith.extui %18 : vector<608x4xi1> to vector<608x4xi32>
    %45 = arith.sitofp %44 : vector<608x4xi32> to vector<608x4xf32>
    %cst_17 = arith.constant dense<0.000000e+00> : vector<4x2xf32>
    %46 = tpu.matmul %45, %41, %cst_17 {dimension_numbers = #tpu.dot_dimension_numbers<[0], [0], [1], [1], [0, 1, 1, 1], [], []>} : vector<608x4xf32>, vector<608x2xf32>, vector<4x2xf32> -> vector<4x2xf32>
    %47 = arith.addf %43, %46 : vector<4x2xf32>
    %c0_18 = arith.constant 0 : index
    %c0_19 = arith.constant 0 : index
    %c0_20 = arith.constant 0 : index
    %48 = vector.load %arg5[%c0_18, %c0_19, %c0_20] : memref<1x4x2xf32, #tpu.memory_space<vmem>>, vector<1x4x2xf32>
    %49 = vector.shape_cast %48 : vector<1x4x2xf32> to vector<4x2xf32>
    %50 = vector.shape_cast %47 : vector<4x2xf32> to vector<1x4x2xf32>
    tpu.vector_store %arg5[%c0_18, %c0_19, %c0_20], %50 {strides = array<i32>} : memref<1x4x2xf32, #tpu.memory_space<vmem>>, vector<1x4x2xf32>,
    return
  }
  func.func @transform_0(%arg0: i32, %arg1: i32) -> (i32, i32) {
    %c1_i32 = arith.constant 1 : i32
    %0 = arith.muli %arg0, %c1_i32 : i32
    %1 = arith.addi %0, %arg1 : i32
    %c0_i32 = arith.constant 0 : i32
    %2 = arith.minsi %1, %c0_i32 : i32
    %c0_i32_0 = arith.constant 0 : i32
    %c0_i32_1 = arith.constant 0 : i32
    return %2, %c0_i32_0 : i32, i32
  }
  func.func @transform_1(%arg0: i32, %arg1: i32) -> (i32, i32) {
    %c1_i32 = arith.constant 1 : i32
    %0 = arith.muli %arg0, %c1_i32 : i32
    %1 = arith.addi %0, %arg1 : i32
    %c0_i32 = arith.constant 0 : i32
    %2 = arith.minsi %1, %c0_i32 : i32
    %c0_i32_0 = arith.constant 0 : i32
    %c0_i32_1 = arith.constant 0 : i32
    return %2, %c0_i32_0 : i32, i32
  }
  func.func @transform_2(%arg0: i32, %arg1: i32) -> (i32, i32, i32) {
    %c0_i32 = arith.constant 0 : i32
    %c0_i32_0 = arith.constant 0 : i32
    %c0_i32_1 = arith.constant 0 : i32
    return %arg0, %c0_i32, %c0_i32_0 : i32, i32, i32
  }
  func.func @transform_3(%arg0: i32, %arg1: i32) -> (i32, i32, i32) {
    %c0_i32 = arith.constant 0 : i32
    %c0_i32_0 = arith.constant 0 : i32
    %c0_i32_1 = arith.constant 0 : i32
    return %arg0, %c0_i32, %c0_i32_0 : i32, i32, i32
  }
}

</mosaic_0001>

<bundles_post_ra>
// kernel: tpu_custom_call.1
= control target key start
LH: loop header
LB: loop body
LE: loop exit
PB: predicated region body
PF: predicated region fallthrough
CT: control target
= control target key end

     0   :  { %9 = vsyncpa [#allocation3], 0  ;;  %s5514_s0 = inlined_call_operand.vmem [shape: s32[600,2], index: 0, kind: input, shape index: {}]   ;;  %s5515_s1 = inlined_call_operand.vmem [shape: f32[600,128], index: 1, kind: input, shape index: {}]   ;;  %s5516_s2 = inlined_call_operand.hbm [shape: f32[2,4,128], index: 2, kind: output, shape index: {0}]   ;;  %s5517_s3 = inlined_call_operand.vmem [shape: f32[2,4,2], index: 3, kind: output, shape index: {1}]  }
   0x1   :  { %11 = vsyncpa [#allocation3 + $0x1], 0  ;;  %s3295_s12 = smov 0   ;;  %s3297_s13 = smov 0  }
   0x2   :  { %s3299_s14 = smov 0   ;;  %s3301_s15 = smov 0  }
   0x3   :  { %s3303_s16 = smov 0   ;;  %s3305_s17 = smov 0  }
   0x4 LB: > { %s2451_s18 = sadd.s32 4294967295, %s3268_s17   ;;  %s2452_s19 = sadd.s32 4294967294, %s3268_s17   ;;  %s3268_s17 = sphi %s3305_s17, %s17_s17   ;;  %s3264_s16 = sphi %s3303_s16, %s6026_s16   ;;  %s3260_s15 = sphi %s3301_s15, %s6025_s15   ;;  %s3256_s14 = sphi %s3299_s14, %s6024_s14   ;;  %s3252_s13 = sphi %s3297_s13, %s6023_s13   ;;  %s3248_s12 = sphi %s3295_s12, %s6022_s12  }
   0x5   : > { %s29_s20 = sadd.s32 1, %s3264_s16  ;;  %s100_s21 = sadd.s32 1, %s3256_s14 }
   0x6   : > { %p31_p0 = scmp.ge.s32.totalorder %s29_s20, 2  ;;  %p110_p1 = scmp.ne.s32.totalorder %s3256_s14, %s3252_s13 }
   0x7   : > { %p111_p2 = scmp.eq.s32.totalorder %s2451_s18, 1  ;;  %p116_p3 = scmp.ne.s32.totalorder %s3252_s13, %s3248_s12 }
   0x8   : > { %s6028_s20 = smov (%p31_p0, %s29_s20), 0  ;;  %p117_p5 = scmp.eq.s32.totalorder %s2452_s19, 1 }
   0x9   : > { %p3335_p4 = por %p111_p2, %p110_p1  ;;  %s97_s23 = ssub.s32 %s3264_s16, %s6028_s20 }
   0xa   : > { %p2455_p6 = scmp.ge.s32.totalorder %s3268_s17, 1  ;;  %p98_p7 = scmp.eq.s32.totalorder %s97_s23, 0 }
   0xb   : > { %p3342_p8 = por %p117_p5, %p116_p3  ;;  %p199_p9 = scmp.lt.s32.totalorder %s3268_s17, 3 }
   0xc   : > { %s3348_s25 = scalar_select %p98_p7, %s3256_s14, %s100_s21  }
   0xd   : > { %p200_p10 = pnand %p2455_p6, %p199_p9 }
   0xf   : > { %203 = sbr.rel (%p200_p10) target bundleno = 886 (0x376), region = 28 }
  0x16   : > { %p243_p11 = scmp.lt.s32.totalorder %s3260_s15, 0  ;;  %v3270_v0 = vmov 0   ;;  %s438_s8 = smul.u32 608, %s3260_s15 }
  0x17   : > { %3100 = vset.pattern.permute.xlu1 %v3270_v0  ;;  %3099 = vset.pattern.permute.xlu0 %v3270_v0  ;;  %s233_s9 = sand.u32 1, %s3252_s13   ;;  %p274_p13 = scmp.lt.s32.totalorder %s3260_s15, 1 }
  0x18   : > { %s244_s26 = scalar_select %p243_p11, %s3260_s15, 0 }
  0x19   : > { %s2456_s10 = sshll.u32 %s233_s9, 2  ;;  %s2328_s5 = scalar_lea.sflag [#allocation3], %s233_s9 }
  0x1a   : > { %s245_s27 = smul.u32 76, %s244_s26  ;;  %s5387_s11 = scalar_lea.vmem [#allocation2], %s2456_s10 }
  0x1b   : > { %s275_s18 = scalar_select %p274_p13, %s3260_s15, 1 }
  0x1c   : > { %p248_p12 = scmp.lt.s32.totalorder %s245_s27, 74 }
  0x1d   : > { %s2459_s19 = sshll.u32 %s275_s18, 2 }
  0x1e   : > { %s6030_s27 = smov (!%p248_p12, %s245_s27), 74  ;;  %s5449_s26 = scalar_lea.vmem %s5517_s3, %s2459_s19 }
  0x1f   : > { %s2457_s28 = sshll.u32 %s6030_s27, 3  ;;  %s2615_s27 = sshll.u32 %s3260_s15, 6 }
  0x20   : > { %s3360_s4 = scalar_lea.vmem %s5514_s0, %s2457_s28  ;;  %s3475_s7 = scalar_lea.vmem %s5515_s1, %s2457_s28 }
  0x21   : > { %v363_v1 = vld [vmem:[%s3360_s4 + $0x10] sm:$0xff]  ;;  %v361_v2 = vld [vmem:[%s3360_s4] sm:$0xff]  ;;  %v364_v3 = vld [vmem:[%s3360_s4 + $0x18] sm:$0xff]  ;;  %s2345_s28 = sshll.u32 %s5387_s11, 4  ;;  %s3274_s15 = smov [#allocation2]   ;;  %s5463_s28 = int_to_ptr.vmem [resolvable:$true] %s2345_s28 }
  0x22   : > { %678 = vperm.xlu1 %3100, %v363_v1   ;;  %672 = vperm.xlu0 %3099, %v361_v2   ;;  %v362_v4 = vld [vmem:[%s3360_s4 + $0x8] sm:$0xff]  ;;  %v365_v6 = vld [vmem:[%s3360_s4 + $0x20] sm:$0xff]  ;;  %v368_v7 = vld [vmem:[%s3360_s4 + $0x38] sm:$0xff]  ;;  %s3190_s6 = scalar_lea.vmem %s5463_s28, 64 }
  0x23   : > { %v366_v5 = vld [vmem:[%s3360_s4 + $0x28] sm:$0xff]  ;;  %v367_v8 = vld [vmem:[%s3360_s4 + $0x30] sm:$0xff]  ;;  %v369_v10 = vld [vmem:[%s3360_s4 + $0x40] sm:$0xff]  ;;  %p3191_p0 = scmp.ne.s32.totalorder %s5463_s28, %s3190_s6 }
  0x24   : > { %v370_v9 = vld [vmem:[%s3360_s4 + $0x48] sm:$0xff]  ;;  %v372_v11 = vld [vmem:[%s3360_s4 + $0x58] sm:$0xff]  ;;  %v371_v12 = vld [vmem:[%s3360_s4 + $0x50] sm:$0xff] }
  0x25   : > { %v374_v13 = vld [vmem:[%s3360_s4 + $0x68] sm:$0xff]  ;;  %v373_v14 = vld [vmem:[%s3360_s4 + $0x60] sm:$0xff]  ;;  %v376_v15 = vld [vmem:[%s3360_s4 + $0x78] sm:$0xff]  ;;  %p3192_p1 = pnand %p3191_p0, %p3335_p4 }
  0x26   : > { %681 = vperm.xlu1 %3100, %v364_v3   ;;  %675 = vperm.xlu0 %3099, %v362_v4   ;;  %v375_v16 = vld [vmem:[%s3360_s4 + $0x70] sm:$0xff]  ;;  %v378_v17 = vld [vmem:[%s3360_s4 + $0x88] sm:$0xff]  ;;  %v377_v18 = vld [vmem:[%s3360_s4 + $0x80] sm:$0xff] }
  0x27   : > { %v380_v19 = vld [vmem:[%s3360_s4 + $0x98] sm:$0xff]  ;;  %v379_v20 = vld [vmem:[%s3360_s4 + $0x90] sm:$0xff]  ;;  %v382_v21 = vld [vmem:[%s3360_s4 + $0xa8] sm:$0xff]  ;;  %p3193_p2 = pneg %p3192_p1 }
  0x28   : > { %v381_v22 = vld [vmem:[%s3360_s4 + $0xa0] sm:$0xff]  ;;  %v384_v23 = vld [vmem:[%s3360_s4 + $0xb8] sm:$0xff]  ;;  %v383_v24 = vld [vmem:[%s3360_s4 + $0xb0] sm:$0xff] }
  0x29   : > { %v386_v25 = vld [vmem:[%s3360_s4 + $0xc8] sm:$0xff]  ;;  %v385_v26 = vld [vmem:[%s3360_s4 + $0xc0] sm:$0xff]  ;;  %v388_v27 = vld [vmem:[%s3360_s4 + $0xd8] sm:$0xff] }
  0x2a   : > { %687 = vperm.xlu1 %3100, %v366_v5   ;;  %684 = vperm.xlu0 %3099, %v365_v6   ;;  %v387_v28 = vld [vmem:[%s3360_s4 + $0xd0] sm:$0xff]  ;;  %v390_v29 = vld [vmem:[%s3360_s4 + $0xe8] sm:$0xff]  ;;  %v389_v30 = vld [vmem:[%s3360_s4 + $0xe0] sm:$0xff] }
  0x2b   : > { %v392_v31 = vld [vmem:[%s3360_s4 + $0xf8] sm:$0xff]  ;;  %v391_v32 = vld [vmem:[%s3360_s4 + $0xf0] sm:$0xff]  ;;  %v394_v33 = vld [vmem:[%s3360_s4 + $0x108] sm:$0xff] }
  0x2c   : > { %v393_v34 = vld [vmem:[%s3360_s4 + $0x100] sm:$0xff]  ;;  %v396_v35 = vld [vmem:[%s3360_s4 + $0x118] sm:$0xff]  ;;  %v395_v36 = vld [vmem:[%s3360_s4 + $0x110] sm:$0xff] }
  0x2d   : > { %v398_v37 = vld [vmem:[%s3360_s4 + $0x128] sm:$0xff]  ;;  %v397_v38 = vld [vmem:[%s3360_s4 + $0x120] sm:$0xff]  ;;  %v400_v39 = vld [vmem:[%s3360_s4 + $0x138] sm:$0xff] }
  0x2e   : > { %693 = vperm.xlu1 %3100, %v368_v7   ;;  %690 = vperm.xlu0 %3099, %v367_v8   ;;  %v399_v40 = vld [vmem:[%s3360_s4 + $0x130] sm:$0xff]  ;;  %v402_v41 = vld [vmem:[%s3360_s4 + $0x148] sm:$0xff]  ;;  %v401_v42 = vld [vmem:[%s3360_s4 + $0x140] sm:$0xff] }
  0x2f   : > { %v404_v43 = vld [vmem:[%s3360_s4 + $0x158] sm:$0xff]  ;;  %v403_v44 = vld [vmem:[%s3360_s4 + $0x150] sm:$0xff]  ;;  %v406_v45 = vld [vmem:[%s3360_s4 + $0x168] sm:$0xff] }
  0x30   : > { %v405_v46 = vld [vmem:[%s3360_s4 + $0x160] sm:$0xff]  ;;  %v408_v47 = vld [vmem:[%s3360_s4 + $0x178] sm:$0xff]  ;;  %v407_v48 = vld [vmem:[%s3360_s4 + $0x170] sm:$0xff] }
  0x31   : > { %v410_v49 = vld [vmem:[%s3360_s4 + $0x188] sm:$0xff]  ;;  %v409_v50 = vld [vmem:[%s3360_s4 + $0x180] sm:$0xff]  ;;  %v412_v51 = vld [vmem:[%s3360_s4 + $0x198] sm:$0xff] }
  0x32   : > { %699 = vperm.xlu1 %3100, %v370_v9   ;;  %696 = vperm.xlu0 %3099, %v369_v10   ;;  %v411_v52 = vld [vmem:[%s3360_s4 + $0x190] sm:$0xff]  ;;  %v414_v53 = vld [vmem:[%s3360_s4 + $0x1a8] sm:$0xff]  ;;  %v413_v54 = vld [vmem:[%s3360_s4 + $0x1a0] sm:$0xff] }
  0x33   : > { %v416_v55 = vld [vmem:[%s3360_s4 + $0x1b8] sm:$0xff]  ;;  %v415_v56 = vld [vmem:[%s3360_s4 + $0x1b0] sm:$0xff]  ;;  %v418_v57 = vld [vmem:[%s3360_s4 + $0x1c8] sm:$0xff] }
  0x34   : > { %v417_v58 = vld [vmem:[%s3360_s4 + $0x1c0] sm:$0xff]  ;;  %v420_v59 = vld [vmem:[%s3360_s4 + $0x1d8] sm:$0xff]  ;;  %v419_v60 = vld [vmem:[%s3360_s4 + $0x1d0] sm:$0xff] }
  0x35   : > { %v422_v61 = vld [vmem:[%s3360_s4 + $0x1e8] sm:$0xff]  ;;  %v421_v62 = vld [vmem:[%s3360_s4 + $0x1e0] sm:$0xff]  ;;  %v424_v63 = vld [vmem:[%s3360_s4 + $0x1f8] sm:$0xff] }
  0x36   : > { %705 = vperm.xlu1 %3100, %v372_v11   ;;  %702 = vperm.xlu0 %3099, %v371_v12   ;;  %v423_v0 = vld [vmem:[%s3360_s4 + $0x1f0] sm:$0xff]  ;;  %v426_v1 = vld [vmem:[%s3360_s4 + $0x208] sm:$0xff]  ;;  %v425_v2 = vld [vmem:[%s3360_s4 + $0x200] sm:$0xff] }
  0x37   : > { %v428_v5 = vld [vmem:[%s3360_s4 + $0x218] sm:$0xff]  ;;  %v427_v6 = vld [vmem:[%s3360_s4 + $0x210] sm:$0xff]  ;;  %v430_v9 = vld [vmem:[%s3360_s4 + $0x228] sm:$0xff] }
  0x38   : > { %v429_v10 = vld [vmem:[%s3360_s4 + $0x220] sm:$0xff] }
  0x3a   : > { %711 = vperm.xlu1 %3100, %v374_v13   ;;  %708 = vperm.xlu0 %3099, %v373_v14   ;;  %v432_v13 = vld [vmem:[%s3360_s4 + $0x238] sm:$0xff]  ;;  %v431_v14 = vld [vmem:[%s3360_s4 + $0x230] sm:$0xff] }
  0x3e   : > { %717 = vperm.xlu1 %3100, %v376_v15   ;;  %714 = vperm.xlu0 %3099, %v375_v16  }
  0x42   : > { %723 = vperm.xlu1 %3100, %v378_v17   ;;  %720 = vperm.xlu0 %3099, %v377_v18   ;;  %v434_v17 = vld [vmem:[%s3360_s4 + $0x248] sm:$0xff]  ;;  %v433_v18 = vld [vmem:[%s3360_s4 + $0x240] sm:$0xff] }
  0x46   : > { %729 = vperm.xlu1 %3100, %v380_v19   ;;  %726 = vperm.xlu0 %3099, %v379_v20  }
  0x4a   : > { %735 = vperm.xlu1 %3100, %v382_v21   ;;  %732 = vperm.xlu0 %3099, %v381_v22   ;;  %v436_v21 = vld [vmem:[%s3360_s4 + $0x258] sm:$0xff]  ;;  %v435_v22 = vld [vmem:[%s3360_s4 + $0x250] sm:$0xff]  ;;  %s5461_s4 = scalar_lea.hbm %s5516_s2, %s2615_s27 }
  0x4e   : > { %741 = vperm.xlu1 %3100, %v384_v23   ;;  %738 = vperm.xlu0 %3099, %v383_v24  }
  0x52   : > { %747 = vperm.xlu1 %3100, %v386_v25   ;;  %744 = vperm.xlu0 %3099, %v385_v26  }
  0x56   : > { %753 = vperm.xlu1 %3100, %v388_v27   ;;  %750 = vperm.xlu0 %3099, %v387_v28  }
  0x5a   : > { %759 = vperm.xlu1 %3100, %v390_v29   ;;  %756 = vperm.xlu0 %3099, %v389_v30   ;;  %v3478_v29 = vld [vmem:[%s3475_s7 + $0x220] sm:$0xff]  ;;  %v3481_v30 = vld [vmem:[%s3475_s7 + $0x228] sm:$0xff] }
  0x5b   : > { %5671 = vst [vmem:[#allocation21_spill] sm:$0xff] %v3478_v29  ;;  %5672 = vst [vmem:[#allocation22_spill] sm:$0xff] %v3481_v30 }
  0x5e   : > { %765 = vperm.xlu1 %3100, %v392_v31   ;;  %762 = vperm.xlu0 %3099, %v391_v32  }
  0x62   : > { %771 = vperm.xlu1 %3100, %v394_v33   ;;  %768 = vperm.xlu0 %3099, %v393_v34   ;;  %v5518_v34 = vlaneseq }
  0x66   : > { %777 = vperm.xlu1 %3100, %v396_v35   ;;  %774 = vperm.xlu0 %3099, %v395_v36  }
  0x6a   : > { %783 = vperm.xlu1 %3100, %v398_v37   ;;  %780 = vperm.xlu0 %3099, %v397_v38   ;;  %v3494_v37 = vshrl.u32 %v5518_v34, 7 }
  0x6e   : > { %789 = vperm.xlu1 %3100, %v400_v39   ;;  %786 = vperm.xlu0 %3099, %v399_v40   ;;  %v457_v40 = vadd.s32 136, %v3494_v37 }
  0x72   : > { %795 = vperm.xlu1 %3100, %v402_v41   ;;  %792 = vperm.xlu0 %3099, %v401_v42   ;;  %v3502_v41 = vstv %s438_s8 }
  0x76   : > { %801 = vperm.xlu1 %3100, %v404_v43   ;;  %798 = vperm.xlu0 %3099, %v403_v44   ;;  %v3509_v44 = vadd.s32 %v3502_v41, %v457_v40 }
  0x78   : > { %5681 = vst [vmem:[#allocation31_spill] sm:$0xff] %v3509_v44  ;;  %vm5537_vm0 = vcmp.lt.s32.totalorder %v3509_v44, 600 }
  0x7a   : > { %807 = vperm.xlu1 %3100, %v406_v45   ;;  %804 = vperm.xlu0 %3099, %v405_v46   ;;  %v458_v45 = vadd.s32 144, %v3494_v37  ;;  %v302_v46 = vld [vmem:[%s3475_s7 + $0x88] sm:$0xff] }
  0x7e   : > { %813 = vperm.xlu1 %3100, %v408_v47   ;;  %810 = vperm.xlu0 %3099, %v407_v48  }
  0x82   : > { %819 = vperm.xlu1 %3100, %v410_v49   ;;  %816 = vperm.xlu0 %3099, %v409_v50   ;;  %v442_v49 = vadd.s32 16, %v3494_v37  ;;  %v3520_v50 = vadd.s32 %v3502_v41, %v458_v45 }
  0x84   : > { %5684 = vst [vmem:[#allocation34_spill] sm:$0xff] %v3520_v50  ;;  %vm5536_vm1 = vcmp.lt.s32.totalorder %v3520_v50, 600  ;;  %v486_v50 = vadd.s32 368, %v3494_v37 }
  0x86   : > { %825 = vperm.xlu1 %3100, %v412_v51   ;;  %822 = vperm.xlu0 %3099, %v411_v52   ;;  %v1220_v51 = vsel %vm5537_vm0, %v302_v46, 0.0  ;;  %v303_v52 = vld [vmem:[%s3475_s7 + $0x90] sm:$0xff]  ;;  %v446_v46 = vadd.s32 48, %v3494_v37 }
  0x8a   : > { %831 = vperm.xlu1 %3100, %v414_v53   ;;  %828 = vperm.xlu0 %3099, %v413_v54  }
  0x8e   : > { %837 = vperm.xlu1 %3100, %v416_v55   ;;  %834 = vperm.xlu0 %3099, %v415_v56   ;;  %v3530_v55 = vadd.s32 %v3502_v41, %v442_v49  ;;  %v460_v56 = vadd.s32 160, %v3494_v37 }
  0x90   : > { %5687 = vst [vmem:[#allocation37_spill] sm:$0xff] %v3530_v55  ;;  %vm5532_vm2 = vcmp.lt.s32.totalorder %v3530_v55, 600 }
  0x92   : > { %843 = vperm.xlu1 %3100, %v418_v57   ;;  %840 = vperm.xlu0 %3099, %v417_v58   ;;  %v1825_v57 = vmul.f32 %v1220_v51, %v1220_v51  ;;  %v3535_v58 = vld [vmem:[%s3475_s7 + $0x230] sm:$0xff] }
  0x93   : > { %5688 = vst [vmem:[#allocation38_spill] sm:$0xff] %v3535_v58 }
  0x96   : > { %849 = vperm.xlu1 %3100, %v420_v59   ;;  %846 = vperm.xlu0 %3099, %v419_v60   ;;  %v3538_v59 = vld [vmem:[%s3475_s7 + $0x238] sm:$0xff]  ;;  %v1221_v60 = vsel %vm5536_vm1, %v303_v52, 0.0 }
  0x97   : > { %5689 = vst [vmem:[#allocation39_spill] sm:$0xff] %v3538_v59 }
  0x9a   : > { %855 = vperm.xlu1 %3100, %v422_v61   ;;  %852 = vperm.xlu0 %3099, %v421_v62   ;;  %v287_v62 = vld [vmem:[%s3475_s7 + $0x10] sm:$0xff] }
  0x9e   : > { %861 = vperm.xlu1 %3100, %v424_v63   ;;  %858 = vperm.xlu0 %3099, %v423_v0  }
  0xa1   : > { %v3428_v3 = vpop.permute.xlu1 %678  ;;  %v3430_v4 = vpop.permute.xlu0 %672 }
  0xa2   : > { %5655 = vst [vmem:[#allocation5_spill] sm:$0xff] %v3428_v3  ;;  %5656 = vst [vmem:[#allocation6_spill] sm:$0xff] %v3430_v4  ;;  %867 = vperm.xlu1 %3100, %v426_v1   ;;  %864 = vperm.xlu0 %3099, %v425_v2   ;;  %v444_v1 = vadd.s32 32, %v3494_v37  ;;  %v3552_v2 = vadd.s32 %v3502_v41, %v460_v56  ;;  %v307_v56 = vld [vmem:[%s3475_s7 + $0xb0] sm:$0xff] }
  0xa4   : > { %5692 = vst [vmem:[#allocation42_spill] sm:$0xff] %v3552_v2  ;;  %vm5528_vm3 = vcmp.lt.s32.totalorder %v3552_v2, 600 }
  0xa5   : > { %v3434_v7 = vpop.permute.xlu1 %681  ;;  %v3436_v8 = vpop.permute.xlu0 %675 }
  0xa6   : > { %5657 = vst [vmem:[#allocation7_spill] sm:$0xff] %v3434_v7  ;;  %5658 = vst [vmem:[#allocation8_spill] sm:$0xff] %v3436_v8  ;;  %873 = vperm.xlu1 %3100, %v428_v5   ;;  %870 = vperm.xlu0 %3099, %v427_v6   ;;  %v1826_v5 = vmul.f32 %v1221_v60, %v1221_v60  ;;  %v1205_v6 = vsel %vm5532_vm2, %v287_v62, 0.0  ;;  %v3586_v62 = vadd.s32 %v3502_v41, %v446_v46 }
  0xa8   : > { %5697 = vst [vmem:[#allocation47_spill] sm:$0xff] %v3586_v62  ;;  %vm5522_vm6 = vcmp.lt.s32.totalorder %v3586_v62, 600 }
  0xa9   : > { %v3440_v11 = vpop.permute.xlu1 %687  ;;  %v3442_v12 = vpop.permute.xlu0 %684 }
  0xaa   : > { %5659 = vst [vmem:[#allocation9_spill] sm:$0xff] %v3440_v11  ;;  %5660 = vst [vmem:[#allocation10_spill] sm:$0xff] %v3442_v12  ;;  %879 = vperm.xlu1 %3100, %v430_v9   ;;  %876 = vperm.xlu0 %3099, %v429_v10   ;;  %v305_v9 = vld [vmem:[%s3475_s7 + $0xa0] sm:$0xff] }
  0xad   : > { %v3446_v15 = vpop.permute.xlu1 %693  ;;  %v3448_v16 = vpop.permute.xlu0 %690 }
  0xae   : > { %5661 = vst [vmem:[#allocation11_spill] sm:$0xff] %v3446_v15  ;;  %5662 = vst [vmem:[#allocation12_spill] sm:$0xff] %v3448_v16  ;;  %885 = vperm.xlu1 %3100, %v432_v13   ;;  %882 = vperm.xlu0 %3099, %v431_v14   ;;  %v3562_v14 = vadd.s32 %v3502_v41, %v444_v1  ;;  %v464_v1 = vadd.s32 192, %v3494_v37  ;;  %v468_v15 = vadd.s32 224, %v3494_v37 }
  0xb0   : > { %5695 = vst [vmem:[#allocation45_spill] sm:$0xff] %v3562_v14  ;;  %vm5527_vm4 = vcmp.lt.s32.totalorder %v3562_v14, 600 }
  0xb1   : > { %v3452_v19 = vpop.permute.xlu1 %699  ;;  %v3454_v20 = vpop.permute.xlu0 %696 }
  0xb2   : > { %5663 = vst [vmem:[#allocation13_spill] sm:$0xff] %v3452_v19  ;;  %5664 = vst [vmem:[#allocation14_spill] sm:$0xff] %v3454_v20  ;;  %891 = vperm.xlu1 %3100, %v434_v17   ;;  %888 = vperm.xlu0 %3099, %v433_v18   ;;  %v462_v17 = vadd.s32 176, %v3494_v37  ;;  %v1810_v18 = vmul.f32 %v1205_v6, %v1205_v6  ;;  %v5701_v19 = vlaneseq }
  0xb4   : > { %v3576_v49 = vadd.s32 %v3502_v41, %v462_v17 }
  0xb5   : > { %v3458_v23 = vpop.permute.xlu1 %705  ;;  %v3460_v24 = vpop.permute.xlu0 %702 }
  0xb6   : > { %5665 = vst [vmem:[#allocation15_spill] sm:$0xff] %v3458_v23  ;;  %5666 = vst [vmem:[#allocation16_spill] sm:$0xff] %v3460_v24  ;;  %897 = vperm.xlu1 %3100, %v436_v21   ;;  %894 = vperm.xlu0 %3099, %v435_v22   ;;  %v1223_v21 = vsel %vm5528_vm3, %v305_v9, 0.0  ;;  %v289_v22 = vld [vmem:[%s3475_s7 + $0x20] sm:$0xff]  ;;  %vm5523_vm5 = vcmp.lt.s32.totalorder %v3576_v49, 600  ;;  %v291_v9 = vld [vmem:[%s3475_s7 + $0x30] sm:$0xff] }
  0xb7   : > { %5696 = vst [vmem:[#allocation46_spill] sm:$0xff] %v3576_v49  ;;  %v1828_v51 = vmul.f32 %v1223_v21, %v1223_v21  ;;  %v1207_v52 = vsel %vm5527_vm4, %v289_v22, 0.0  ;;  %v1225_v6 = vsel %vm5523_vm5, %v307_v56, 0.0  ;;  %v448_v21 = vadd.s32 64, %v3494_v37 }
  0xb8   : > { %v3600_v22 = vadd.s32 %v3502_v41, %v464_v1  ;;  %v1830_v46 = vmul.f32 %v1225_v6, %v1225_v6  ;;  %v488_v56 = vadd.s32 384, %v3494_v37  ;;  %v293_v6 = vld [vmem:[%s3475_s7 + $0x40] sm:$0xff]  ;;  %v450_v23 = vadd.s32 80, %v3494_v37 }
  0xb9   : > { %v3462_v25 = vpop.permute.xlu1 %711  ;;  %v3464_v26 = vpop.permute.xlu0 %708  ;;  %v3611_v34 = vadd.s32 %v3502_v41, %v448_v21  ;;  %v466_v21 = vadd.s32 208, %v3494_v37  ;;  %v484_v49 = vadd.s32 352, %v3494_v37 }
  0xba   : > { %5667 = vst [vmem:[#allocation17_spill] sm:$0xff] %v3462_v25  ;;  %5668 = vst [vmem:[#allocation18_spill] sm:$0xff] %v3464_v26  ;;  %vm5521_vm7 = vcmp.lt.s32.totalorder %v3600_v22, 600  ;;  %v472_v25 = vadd.s32 256, %v3494_v37 }
  0xbb   : > { %5698 = vst [vmem:[#allocation48_spill] sm:$0xff] %v3600_v22  ;;  %5699 = vst [vmem:[#allocation49_spill] sm:$0xff] %v3611_v34  ;;  %vm5520_vm8 = vcmp.lt.s32.totalorder %v3611_v34, 600  ;;  %v454_v34 = vadd.s32 112, %v3494_v37 }
  0xbd   : > { %v3466_v27 = vpop.permute.xlu1 %717  ;;  %v3468_v28 = vpop.permute.xlu0 %714 }
  0xbe   : > { %5669 = vst [vmem:[#allocation19_spill] sm:$0xff] %v3466_v27  ;;  %5670 = vst [vmem:[#allocation20_spill] sm:$0xff] %v3468_v28 }
  0xc1   : > { %v3485_v32 = vpop.permute.xlu1 %723  ;;  %v3487_v33 = vpop.permute.xlu0 %720 }
  0xc2   : > { %5673 = vst [vmem:[#allocation23_spill] sm:$0xff] %v3485_v32  ;;  %5674 = vst [vmem:[#allocation24_spill] sm:$0xff] %v3487_v33 }
  0xc5   : > { %v3489_v35 = vpop.permute.xlu1 %729  ;;  %v3491_v36 = vpop.permute.xlu0 %726 }
  0xc6   : > { %5675 = vst [vmem:[#allocation25_spill] sm:$0xff] %v3489_v35  ;;  %5676 = vst [vmem:[#allocation26_spill] sm:$0xff] %v3491_v36  ;;  %v5710_v35 = vmov 0.0   ;;  %v452_v36 = vadd.s32 96, %v3494_v37 }
  0xc7   : > { %282 = vst [vmem:[%s5387_s11] sm:$0xf] %v5710_v35 }
  0xc9   : > { %v3497_v38 = vpop.permute.xlu1 %735  ;;  %v3499_v39 = vpop.permute.xlu0 %732 }
  0xca   : > { %5677 = vst [vmem:[#allocation27_spill] sm:$0xff] %v3497_v38  ;;  %5678 = vst [vmem:[#allocation28_spill] sm:$0xff] %v3499_v39  ;;  %v5524_v38 = vmov 0.0  }
  0xcd   : > { %v3504_v42 = vpop.permute.xlu1 %741  ;;  %v3506_v43 = vpop.permute.xlu0 %738 }
  0xce   : > { %5679 = vst [vmem:[#allocation29_spill] sm:$0xff] %v3504_v42  ;;  %5680 = vst [vmem:[#allocation30_spill] sm:$0xff] %v3506_v43 }
  0xd1   : > { %v3513_v47 = vpop.permute.xlu1 %747  ;;  %v3515_v48 = vpop.permute.xlu0 %744 }
  0xd2   : > { %5682 = vst [vmem:[#allocation32_spill] sm:$0xff] %v3513_v47  ;;  %5683 = vst [vmem:[#allocation33_spill] sm:$0xff] %v3515_v48  ;;  %v3664_v47 = vand.u32 127, %v5701_v19  ;;  %v474_v19 = vadd.s32 272, %v3494_v37 }
  0xd5   : > { %v3525_v53 = vpop.permute.xlu1 %753  ;;  %v3527_v54 = vpop.permute.xlu0 %750 }
  0xd6   : > { %5685 = vst [vmem:[#allocation35_spill] sm:$0xff] %v3525_v53  ;;  %5686 = vst [vmem:[#allocation36_spill] sm:$0xff] %v3527_v54  ;;  %v3661_v54 = vld [vmem:[%s3475_s7 + $0x100] sm:$0xff] }
  0xd9   : > { %v3545_v63 = vpop.permute.xlu1 %759  ;;  %v3547_v0 = vpop.permute.xlu0 %756 }
  0xda   : > { %5690 = vst [vmem:[#allocation40_spill] sm:$0xff] %v3545_v63  ;;  %5691 = vst [vmem:[#allocation41_spill] sm:$0xff] %v3547_v0  ;;  %1918 = vadd.xlane.f32.xlu1 %v1825_v57  ;;  %v311_v63 = vld [vmem:[%s3475_s7 + $0xd0] sm:$0xff] }
  0xdd   : > { %v3557_v10 = vpop.permute.xlu1 %765  ;;  %v3559_v13 = vpop.permute.xlu0 %762 }
  0xde   : > { %5693 = vst [vmem:[#allocation43_spill] sm:$0xff] %v3557_v10  ;;  %5694 = vst [vmem:[#allocation44_spill] sm:$0xff] %v3559_v13  ;;  %1920 = vadd.xlane.f32.xlu1 %v1826_v5  ;;  %v1812_v5 = vmul.f32 %v1207_v52, %v1207_v52  ;;  %v309_v52 = vld [vmem:[%s3475_s7 + $0xc0] sm:$0xff]  ;;  %v3637_v13 = vadd.s32 %v3502_v41, %v466_v21  ;;  %v3652_v21 = vadd.s32 %v3502_v41, %v472_v25 }
  0xe0   : > { %5700 = vst [vmem:[#allocation50_spill] sm:$0xff] %v3637_v13  ;;  %vm5519_vm10 = vcmp.lt.s32.totalorder %v3637_v13, 600  ;;  %vm5601_vm11 = vcmp.lt.s32.totalorder %v3652_v21, 600  ;;  %v3792_v13 = vadd.s32 %v3502_v41, %v452_v36  ;;  %v494_v36 = vadd.s32 432, %v3494_v37 }
  0xe1   : > { %v3569_v40 = vpop.permute.xlu1 %771  ;;  %v3571_v45 = vpop.permute.xlu0 %768  ;;  %v1229_v53 = vsel %vm5519_vm10, %v311_v63, 0.0  ;;  %v1235_v48 = vsel %vm5601_vm11, %v3661_v54, 0.0 }
  0xe2   : > { %1888 = vadd.xlane.f32.xlu1 %v1810_v18  ;;  %v1834_v63 = vmul.f32 %v1229_v53, %v1229_v53  ;;  %vm931_vm12 = vcmp.eq.s32.totalorder %v3571_v45, %v3664_v47  ;;  %v491_v53 = vadd.s32 408, %v3494_v37  ;;  %v1840_v43 = vmul.f32 %v1235_v48, %v1235_v48  ;;  %5715 = vst [vmem:[#allocation53_spill] sm:$0xff] %v3792_v13 }
  0xe3   : > { %vm3695_vm15 = vmand %vm931_vm12, %vm5601_vm11  ;;  %v476_v45 = vadd.s32 288, %v3494_v37 }
  0xe4   : > { %v2492_v12 = vsel %vm3695_vm15, 1.0, %v5524_v38 }
  0xe5   : > { %v3581_v57 = vpop.permute.xlu1 %777  ;;  %v3583_v60 = vpop.permute.xlu0 %774 }
  0xe6   : > { %1924 = vadd.xlane.f32.xlu1 %v1828_v51  ;;  %v1209_v51 = vsel %vm5522_vm6, %v291_v9, 0.0  ;;  %v3618_v9 = vadd.s32 %v3502_v41, %v488_v56  ;;  %vm932_vm6 = vcmp.eq.s32.totalorder %v3569_v40, %v3664_v47  ;;  %vm934_vm2 = vcmp.eq.s32.totalorder %v3581_v57, %v3664_v47  ;;  %v3804_v57 = vld [vmem:[%s3475_s7 + $0x110] sm:$0xff] }
  0xe7   : > { %v1814_v1 = vmul.f32 %v1209_v51, %v1209_v51  ;;  %v3629_v51 = vld [vmem:[%s3475_s7 + $0x180] sm:$0xff] }
  0xe8   : > { %vm641_vm9 = vcmp.lt.s32.totalorder %v3618_v9, 600 }
  0xe9   : > { %v3593_v17 = vpop.permute.xlu1 %783  ;;  %v3595_v18 = vpop.permute.xlu0 %780 }
  0xea   : > { %1892 = vadd.xlane.f32.xlu1 %v1812_v5  ;;  %v1227_v5 = vsel %vm5521_vm7, %v309_v52, 0.0 }
  0xeb   : > { %v1832_v28 = vmul.f32 %v1227_v5, %v1227_v5  ;;  %v1251_v5 = vsel %vm641_vm9, %v3629_v51, 0.0 }
  0xed   : > { %v3606_v61 = vpop.permute.xlu1 %789  ;;  %v3608_v31 = vpop.permute.xlu0 %786 }
  0xee   : > { %1928 = vadd.xlane.f32.xlu1 %v1830_v46  ;;  %v1211_v46 = vsel %vm5520_vm8, %v293_v6, 0.0  ;;  %v489_v6 = vadd.s32 392, %v3494_v37 }
  0xf0   : > { %v3658_v24 = vadd.s32 %v3502_v41, %v489_v6 }
  0xf1   : > { %v3620_v27 = vpop.permute.xlu1 %795  ;;  %v3622_v10 = vpop.permute.xlu0 %792 }
  0xf2   : > { %1896 = vadd.xlane.f32.xlu1 %v1814_v1  ;;  %v1816_v1 = vmul.f32 %v1211_v46, %v1211_v46  ;;  %v473_v46 = vadd.s32 264, %v3494_v37  ;;  %vm5602_vm13 = vcmp.lt.s32.totalorder %v3658_v24, 600 }
  0xf4   : > { %v3676_v6 = vadd.s32 %v3502_v41, %v473_v46 }
  0xf5   : > { %v3632_v52 = vpop.permute.xlu1 %801  ;;  %v3634_v56 = vpop.permute.xlu0 %798 }
  0xf6   : > { %1932 = vadd.xlane.f32.xlu1 %v1832_v28  ;;  %v1856_v28 = vmul.f32 %v1251_v5, %v1251_v5  ;;  %v3672_v5 = vadd.s32 %v3502_v41, %v450_v23  ;;  %v475_v23 = vadd.s32 280, %v3494_v37  ;;  %vm5600_vm7 = vcmp.lt.s32.totalorder %v3676_v6, 600 }
  0xf8   : > { %5702 = vst [vmem:[#allocation51_spill] sm:$0xff] %v3672_v5  ;;  %vm5526_vm14 = vcmp.lt.s32.totalorder %v3672_v5, 600  ;;  %v3719_v48 = vadd.s32 %v3502_v41, %v475_v23  ;;  %v492_v23 = vadd.s32 416, %v3494_v37 }
  0xf9   : > { %v3645_v26 = vpop.permute.xlu1 %807  ;;  %v3647_v0 = vpop.permute.xlu0 %804 }
  0xfa   : > { %1900 = vadd.xlane.f32.xlu1 %v1816_v1  ;;  %v490_v1 = vadd.s32 400, %v3494_v37 }
  0xfc   : > { %v3690_v16 = vadd.s32 %v3502_v41, %v490_v1  ;;  %v3705_v1 = vadd.s32 %v3502_v41, %v474_v19  ;;  %v3727_v19 = vld [vmem:[%s3475_s7 + $0x190] sm:$0xff] }
  0xfd   : > { %v3666_v20 = vpop.permute.xlu1 %813  ;;  %v3668_v25 = vpop.permute.xlu0 %810 }
  0xfe   : > { %1980 = vadd.xlane.f32.xlu1 %v1856_v28  ;;  %v295_v28 = vld [vmem:[%s3475_s7 + $0x50] sm:$0xff]  ;;  %vm5541_vm15 = vcmp.lt.s32.totalorder %v3705_v1, 600 }
 0x101   : > { %v820_v46 = vpop.permute.xlu1 %819  ;;  %v817_v42 = vpop.permute.xlu0 %816 }
 0x102   : > { %vm948_vm10 = vcmp.eq.s32.totalorder %v820_v46, %v3664_v47  ;;  %vm947_vm8 = vcmp.eq.s32.totalorder %v817_v42, %v3664_v47  ;;  %1936 = vadd.xlane.f32.xlu1 %v1834_v63  ;;  %v1213_v46 = vsel %vm5526_vm14, %v295_v28, 0.0  ;;  %v3716_v42 = vadd.s32 %v3502_v41, %v468_v15 }
 0x103   : > { %vm3709_vm12 = vmand %vm948_vm10, %vm5602_vm13  ;;  %v3724_v63 = vadd.s32 %v3502_v41, %v491_v53  ;;  %vm5599_vm10 = vcmp.lt.s32.totalorder %v3690_v16, 600  ;;  %v1818_v7 = vmul.f32 %v1213_v46, %v1213_v46  ;;  %vm933_vm14 = vcmp.eq.s32.totalorder %v3583_v60, %v3664_v47  ;;  %v313_v60 = vld [vmem:[%s3475_s7 + $0xe0] sm:$0xff] }
 0x104   : > { %5707 = vst [vmem:[#allocation52_spill] sm:$0xff] %v3716_v42  ;;  %vm1175_vm5 = vmand %vm947_vm8, %vm641_vm9  ;;  %v2509_v40 = vsel %vm3709_vm12, 1.0, %v5710_v35  ;;  %v1253_v3 = vsel %vm5599_vm10, %v3727_v19, 0.0  ;;  %v3771_v46 = vadd.s32 %v3502_v41, %v492_v23 }
 0x105   : > { %v2508_v28 = vsel %vm1175_vm5, 1.0, %v5524_v38  ;;  %v823_v15 = vpop.permute.xlu0 %822  ;;  %vm3740_vm8 = vmand %vm932_vm6, %vm5600_vm7  ;;  %v826_v39 = vpop.permute.xlu1 %825  ;;  %vm5535_vm6 = vcmp.lt.s32.totalorder %v3716_v42, 600  ;;  %vm5556_vm12 = vcmp.lt.s32.totalorder %v3724_v63, 600  ;;  %v1858_v5 = vmul.f32 %v1253_v3, %v1253_v3 }
 0x106   : > { %vm949_vm5 = vcmp.eq.s32.totalorder %v823_v15, %v3664_v47  ;;  %1948 = vadd.xlane.f32.xlu1 %v1840_v43  ;;  %v3101_v38 = vpack.i.bf16 %v2492_v12, %v2508_v28  ;;  %v493_v43 = vadd.s32 424, %v3494_v37  ;;  %v2493_v11 = vsel %vm3740_vm8, 1.0, %v5710_v35 }
 0x107   : > { %vm3759_vm4 = vmand %vm949_vm5, %vm5599_vm10  ;;  %vm950_vm3 = vcmp.eq.s32.totalorder %v826_v39, %v3664_v47  ;;  %v3781_v15 = vadd.s32 %v3502_v41, %v476_v45  ;;  %v3103_v53 = vpack.i.bf16 %v2493_v11, %v2509_v40  ;;  %vm5538_vm8 = vcmp.lt.s32.totalorder %v3719_v48, 600 }
 0x108   : > { %3102 = vxpose.xlu0.b32.start [1/16] (narrow) %v3101_v38, 8  ;;  %vm3775_vm5 = vmand %vm933_vm14, %vm5541_vm15  ;;  %v477_v38 = vadd.s32 296, %v3494_v37  ;;  %v2510_v39 = vsel %vm3759_vm4, 1.0, %v5710_v35  ;;  %v1231_v23 = vsel %vm5535_vm6, %v313_v60, 0.0  ;;  %v3801_v3 = vadd.s32 %v3502_v41, %v493_v43 }
 0x109   : > { %v829_v8 = vpop.permute.xlu0 %828  ;;  %vm3796_vm14 = vmand %vm950_vm3, %vm5556_vm12  ;;  %v2494_v45 = vsel %vm3775_vm5, 1.0, %v5710_v35  ;;  %vm5552_vm4 = vcmp.lt.s32.totalorder %v3771_v46, 600  ;;  %vm5562_vm1 = vcmp.lt.s32.totalorder %v3781_v15, 600  ;;  %v832_v60 = vpop.permute.xlu1 %831  ;;  %v1836_v11 = vmul.f32 %v1231_v23, %v1231_v23 }
 0x10a   : > { %1904 = vadd.xlane.f32.xlu1 %v1818_v7  ;;  %vm951_vm6 = vcmp.eq.s32.totalorder %v829_v8, %v3664_v47  ;;  %vm3814_vm3 = vmand %vm934_vm2, %vm5538_vm8  ;;  %v3819_v12 = vadd.s32 %v3502_v41, %v477_v38  ;;  %v3105_v43 = vpack.i.bf16 %v2494_v45, %v2510_v39  ;;  %vm935_vm5 = vcmp.eq.s32.totalorder %v3595_v18, %v3664_v47  ;;  %v3843_v7 = vld [vmem:[%s3475_s7 + $0x60] sm:$0xff] }
 0x10b   : > { %v478_v28 = vadd.s32 304, %v3494_v37  ;;  %v1237_v38 = vsel %vm5541_vm15, %v3804_v57, 0.0  ;;  %vm5544_vm2 = vcmp.lt.s32.totalorder %v3792_v13, 600  ;;  %v470_v39 = vadd.s32 240, %v3494_v37  ;;  %vm3837_vm0 = vmand %vm951_vm6, %vm5552_vm4  ;;  %5722 = vst [vmem:[#allocation54_spill] sm:$0xff] %v3843_v7 }
 0x10c   : > { %3104 = vxpose.xlu0.b32.cont [2/16] (narrow) %v3103_v53, 8  ;;  %v2511_v53 = vsel %vm3796_vm14, 1.0, %v5710_v35  ;;  %v495_v23 = vadd.s32 440, %v3494_v37  ;;  %v2495_v45 = vsel %vm3814_vm3, 1.0, %v5710_v35  ;;  %vm5547_vm14 = vcmp.lt.s32.totalorder %v3801_v3, 600  ;;  %vm1163_vm15 = vmand %vm935_vm5, %vm5562_vm1 }
 0x10d   : > { %vm952_vm8 = vcmp.eq.s32.totalorder %v832_v60, %v3664_v47  ;;  %v3851_v42 = vadd.s32 %v3502_v41, %v494_v36  ;;  %vm5551_vm6 = vcmp.lt.s32.totalorder %v3819_v12, 600  ;;  %v479_v8 = vadd.s32 312, %v3494_v37 }
 0x10e   : > { %1984 = vadd.xlane.f32.xlu1 %v1858_v5  ;;  %v3107_v40 = vpack.i.bf16 %v2495_v45, %v2511_v53  ;;  %v1842_v32 = vmul.f32 %v1237_v38, %v1237_v38  ;;  %vm936_vm3 = vcmp.eq.s32.totalorder %v3593_v17, %v3664_v47  ;;  %v3863_v36 = vadd.s32 %v3502_v41, %v478_v28  ;;  %vm3876_vm5 = vmand %vm952_vm8, %vm5547_vm14  ;;  %v3884_v28 = vld [vmem:[%s3475_s7 + $0x1a0] sm:$0xff] }
 0x10f   : > { %v2512_v60 = vsel %vm3837_vm0, 1.0, %v5710_v35  ;;  %v1215_v18 = vsel %vm5544_vm2, %v3843_v7, 0.0  ;;  %v3872_v4 = vadd.s32 %v3502_v41, %v470_v39  ;;  %v3881_v17 = vadd.s32 %v3502_v41, %v495_v23  ;;  %vm3892_vm8 = vmand %vm936_vm3, %vm5551_vm6 }
 0x110   : > { %3106 = vxpose.xlu0.b32.cont [3/16] (narrow) %v3105_v43, 8  ;;  %v835_v43 = vpop.permute.xlu0 %834  ;;  %v2496_v53 = vsel %vm1163_vm15, 1.0, %v5710_v35  ;;  %vm5592_vm0 = vcmp.lt.s32.totalorder %v3851_v42, 600  ;;  %v496_v38 = vadd.s32 448, %v3494_v37  ;;  %v3897_v5 = vadd.s32 %v3502_v41, %v479_v8 }
 0x111   : > { %5723 = vst [vmem:[#allocation55_spill] sm:$0xff] %v3872_v4  ;;  %vm953_vm2 = vcmp.eq.s32.totalorder %v835_v43, %v3664_v47  ;;  %v480_v23 = vadd.s32 320, %v3494_v37  ;;  %v3109_v45 = vpack.i.bf16 %v2496_v53, %v2512_v60  ;;  %v1820_v13 = vmul.f32 %v1215_v18, %v1215_v18  ;;  %v3921_v60 = vld [vmem:[%s3475_s7 + $0xf0] sm:$0xff] }
 0x112   : > { %1940 = vadd.xlane.f32.xlu1 %v1836_v11  ;;  %vm5583_vm15 = vcmp.lt.s32.totalorder %v3863_v36, 600  ;;  %vm937_vm14 = vcmp.eq.s32.totalorder %v3608_v31, %v3664_v47  ;;  %v2513_v7 = vsel %vm3876_vm5, 1.0, %v5710_v35  ;;  %v1255_v8 = vsel %vm5552_vm4, %v3884_v28, 0.0  ;;  %vm3915_vm6 = vmand %vm953_vm2, %vm5592_vm0  ;;  %5730 = vst [vmem:[#allocation56_spill] sm:$0xff] %v3921_v60 }
 0x113   : > { %vm5557_vm3 = vcmp.lt.s32.totalorder %v3872_v4, 600  ;;  %v497_v31 = vadd.s32 456, %v3494_v37  ;;  %v2497_v18 = vsel %vm3892_vm8, 1.0, %v5710_v35  ;;  %vm5558_vm5 = vcmp.lt.s32.totalorder %v3881_v17, 600  ;;  %vm3933_vm2 = vmand %vm937_vm14, %vm5583_vm15 }
 0x114   : > { %3108 = vxpose.xlu0.b32.cont [4/16] (narrow) %v3107_v40, 8  ;;  %v838_v40 = vpop.permute.xlu1 %837  ;;  %v3929_v11 = vadd.s32 %v3502_v41, %v496_v38  ;;  %v481_v53 = vadd.s32 328, %v3494_v37  ;;  %v3111_v39 = vpack.i.bf16 %v2497_v18, %v2513_v7  ;;  %v841_v22 = vpop.permute.xlu0 %840  ;;  %v1860_v33 = vmul.f32 %v1255_v8, %v1255_v8 }
 0x115   : > { %vm954_vm4 = vcmp.eq.s32.totalorder %v838_v40, %v3664_v47  ;;  %vm5561_vm8 = vcmp.lt.s32.totalorder %v3897_v5, 600  ;;  %vm938_vm12 = vcmp.eq.s32.totalorder %v3606_v61, %v3664_v47  ;;  %v2514_v38 = vsel %vm3915_vm6, 1.0, %v5710_v35  ;;  %v3963_v61 = vld [vmem:[%s3475_s7 + $0x120] sm:$0xff] }
 0x116   : > { %1952 = vadd.xlane.f32.xlu1 %v1842_v32  ;;  %5731 = vst [vmem:[#allocation57_spill] sm:$0xff] %v3929_v11  ;;  %v1233_v40 = vsel %vm5557_vm3, %v3921_v60, 0.0  ;;  %vm3955_vm14 = vmand %vm954_vm4, %vm5558_vm5  ;;  %v3960_v7 = vadd.s32 %v3502_v41, %v497_v31  ;;  %v2498_v8 = vsel %vm3933_vm2, 1.0, %v5710_v35  ;;  %vm5563_vm6 = vcmp.lt.s32.totalorder %v3929_v11, 600 }
 0x117   : > { %vm955_vm3 = vcmp.eq.s32.totalorder %v841_v22, %v3664_v47  ;;  %vm3973_vm4 = vmand %vm938_vm12, %vm5561_vm8  ;;  %v3978_v31 = vadd.s32 %v3502_v41, %v481_v53  ;;  %v3113_v18 = vpack.i.bf16 %v2498_v8, %v2514_v38  ;;  %vm939_vm2 = vcmp.eq.s32.totalorder %v3622_v10, %v3664_v47  ;;  %v3999_v38 = vld [vmem:[%s3475_s7 + $0x70] sm:$0xff] }
 0x118   : > { %3110 = vxpose.xlu0.b32.cont [5/16] (narrow) %v3109_v45, 8  ;;  %v3939_v45 = vadd.s32 %v3502_v41, %v480_v23  ;;  %v3951_v23 = vadd.s32 %v3502_v41, %v454_v34  ;;  %5738 = vst [vmem:[#allocation60_spill] sm:$0xff] %v3960_v7  ;;  %v498_v34 = vadd.s32 464, %v3494_v37  ;;  %v844_v43 = vpop.permute.xlu1 %843  ;;  %v482_v22 = vadd.s32 336, %v3494_v37  ;;  %vm3993_vm8 = vmand %vm955_vm3, %vm5563_vm6  ;;  %v847_v60 = vpop.permute.xlu0 %846 }
 0x119   : > { %5741 = vst [vmem:[#allocation61_spill] sm:$0xff] %v3978_v31  ;;  %v2515_v4 = vsel %vm3955_vm14, 1.0, %v5710_v35  ;;  %v1239_v53 = vsel %vm5562_vm1, %v3963_v61, 0.0  ;;  %v499_v10 = vadd.s32 472, %v3494_v37  ;;  %5744 = vst [vmem:[#allocation62_spill] sm:$0xff] %v3999_v38  ;;  %vm5582_vm14 = vcmp.lt.s32.totalorder %v3960_v7, 600 }
 0x11a   : > { %5734 = vst [vmem:[#allocation58_spill] sm:$0xff] %v3939_v45  ;;  %1908 = vadd.xlane.f32.xlu1 %v1820_v13  ;;  %5735 = vst [vmem:[#allocation59_spill] sm:$0xff] %v3951_v23  ;;  %vm5573_vm5 = vcmp.lt.s32.totalorder %v3939_v45, 600  ;;  %vm5569_vm12 = vcmp.lt.s32.totalorder %v3951_v23, 600  ;;  %vm956_vm1 = vcmp.eq.s32.totalorder %v844_v43, %v3664_v47  ;;  %v4007_v13 = vadd.s32 %v3502_v41, %v498_v34 }
 0x11b   : > { %vm5576_vm3 = vcmp.lt.s32.totalorder %v3978_v31, 600  ;;  %vm1167_vm6 = vmand %vm939_vm2, %vm5573_vm5  ;;  %v483_v8 = vadd.s32 344, %v3494_v37  ;;  %v1844_v32 = vmul.f32 %v1239_v53, %v1239_v53  ;;  %v4016_v43 = vadd.s32 %v3502_v41, %v482_v22 }
 0x11c   : > { %3112 = vxpose.xlu0.b32.cont [6/16] (narrow) %v3111_v39, 8  ;;  %v1838_v39 = vmul.f32 %v1233_v40, %v1233_v40  ;;  %v2499_v40 = vsel %vm3973_vm4, 1.0, %v5710_v35  ;;  %5745 = vst [vmem:[#allocation63_spill] sm:$0xff] %v4007_v13  ;;  %vm940_vm4 = vcmp.eq.s32.totalorder %v3620_v27, %v3664_v47  ;;  %v2516_v34 = vsel %vm3993_vm8, 1.0, %v5710_v35  ;;  %vm4027_vm2 = vmand %vm956_vm1, %vm5582_vm14  ;;  %v853_v2 = vpop.permute.xlu0 %852 }
 0x11d   : > { %v1217_v62 = vsel %vm5569_vm12, %v3999_v38, 0.0  ;;  %v4032_v27 = vadd.s32 %v3502_v41, %v499_v10  ;;  %v2500_v22 = vsel %vm1167_vm6, 1.0, %v5710_v35  ;;  %vm5581_vm8 = vcmp.lt.s32.totalorder %v4007_v13, 600  ;;  %vm4043_vm1 = vmand %vm940_vm4, %vm5576_vm3 }
 0x11e   : > { %1988 = vadd.xlane.f32.xlu1 %v1860_v33  ;;  %vm957_vm12 = vcmp.eq.s32.totalorder %v847_v60, %v3664_v47  ;;  %v500_v53 = vadd.s32 480, %v3494_v37  ;;  %v4048_v10 = vadd.s32 %v3502_v41, %v483_v8  ;;  %v504_v23 = vadd.s32 512, %v3494_v37 }
 0x11f   : > { %5748 = vst [vmem:[#allocation64_spill] sm:$0xff] %v4032_v27  ;;  %v1822_v38 = vmul.f32 %v1217_v62, %v1217_v62  ;;  %vm5598_vm6 = vcmp.lt.s32.totalorder %v4016_v43, 600  ;;  %vm941_vm5 = vcmp.eq.s32.totalorder %v3634_v56, %v3664_v47  ;;  %v2517_v14 = vsel %vm4027_vm2, 1.0, %v5710_v35  ;;  %vm4068_vm4 = vmand %vm957_vm12, %vm5581_vm8 }
 0x120   : > { %3114 = vxpose.xlu0.b32.cont [7/16] (narrow) %v3113_v18, 8  ;;  %v3115_v18 = vpack.i.bf16 %v2499_v40, %v2515_v4  ;;  %5751 = vst [vmem:[#allocation65_spill] sm:$0xff] %v4048_v10  ;;  %v3117_v40 = vpack.i.bf16 %v2500_v22, %v2516_v34  ;;  %v485_v34 = vadd.s32 360, %v3494_v37  ;;  %v4062_v22 = vadd.s32 %v3502_v41, %v484_v49  ;;  %vm4086_vm12 = vmand %vm941_vm5, %vm5598_vm6 }
 0x121   : > { %v501_v56 = vadd.s32 488, %v3494_v37  ;;  %v2501_v4 = vsel %vm4043_vm1, 1.0, %v5710_v35  ;;  %vm5584_vm2 = vcmp.lt.s32.totalorder %v4032_v27, 600  ;;  %v4082_v49 = vadd.s32 %v3502_v41, %v500_v53 }
 0x122   : > { %1944 = vadd.xlane.f32.xlu1 %v1838_v39  ;;  %v4035_v39 = vld [vmem:[%s3475_s7 + $0x1b0] sm:$0xff]  ;;  %v4091_v55 = vadd.s32 %v3502_v41, %v504_v23  ;;  %vm5591_vm1 = vcmp.lt.s32.totalorder %v4048_v10, 600  ;;  %vm942_vm8 = vcmp.eq.s32.totalorder %v3632_v52, %v3664_v47  ;;  %v2518_v53 = vsel %vm4068_vm4, 1.0, %v5710_v35 }
 0x123   : > { %v1257_v8 = vsel %vm5592_vm0, %v4035_v39, 0.0  ;;  %vm637_vm5 = vcmp.lt.s32.totalorder %v4062_v22, 600  ;;  %v4113_v52 = vadd.s32 %v3502_v41, %v501_v56  ;;  %vm653_vm4 = vcmp.lt.s32.totalorder %v4082_v49, 600  ;;  %v304_v49 = vld [vmem:[%s3475_s7 + $0x98] sm:$0xff] }
 0x124   : > { %3116 = vxpose.xlu0.b32.cont [8/16] (narrow) %v3115_v18, 8  ;;  %v850_v18 = vpop.permute.xlu1 %849  ;;  %5756 = vst [vmem:[#allocation66_spill] sm:$0xff] %v4091_v55  ;;  %v1862_v33 = vmul.f32 %v1257_v8, %v1257_v8  ;;  %v2502_v8 = vsel %vm4086_vm12, 1.0, %v5710_v35  ;;  %v508_v60 = vadd.s32 544, %v3494_v37  ;;  %vm943_vm12 = vcmp.eq.s32.totalorder %v3647_v0, %v3664_v47 }
 0x125   : > { %vm958_vm3 = vcmp.eq.s32.totalorder %v850_v18, %v3664_v47  ;;  %v3121_v56 = vpack.i.bf16 %v2502_v8, %v2518_v53  ;;  %v487_v53 = vadd.s32 376, %v3494_v37  ;;  %v503_v23 = vadd.s32 504, %v3494_v37  ;;  %v859_v8 = vpop.permute.xlu0 %858 }
 0x126   : > { %1956 = vadd.xlane.f32.xlu1 %v1844_v32  ;;  %v4074_v32 = vld [vmem:[%s3475_s7 + $0x130] sm:$0xff]  ;;  %vm4108_vm14 = vmand %vm958_vm3, %vm5584_vm2  ;;  %vm5597_vm2 = vcmp.lt.s32.totalorder %v4091_v55, 600  ;;  %v4164_v55 = vadd.s32 %v3502_v41, %v508_v60  ;;  %v4169_v27 = vadd.s32 %v3502_v41, %v486_v50  ;;  %vm945_vm10 = vcmp.eq.s32.totalorder %v3668_v25, %v3664_v47 }
 0x127   : > { %v1241_v18 = vsel %vm5583_vm15, %v4074_v32, 0.0  ;;  %vm959_vm15 = vcmp.eq.s32.totalorder %v853_v2, %v3664_v47  ;;  %vm4124_vm3 = vmand %vm942_vm8, %vm5591_vm1  ;;  %v2519_v44 = vsel %vm4108_vm14, 1.0, %v5710_v35  ;;  %vm654_vm1 = vcmp.lt.s32.totalorder %v4113_v52, 600 }
 0x128   : > { %3118 = vxpose.xlu0.b32.cont [9/16] (narrow) %v3117_v40, 8  ;;  %v3119_v40 = vpack.i.bf16 %v2501_v4, %v2517_v14  ;;  %v4103_v14 = vadd.s32 %v3502_v41, %v485_v34  ;;  %v502_v34 = vadd.s32 496, %v3494_v37  ;;  %v856_v4 = vpop.permute.xlu1 %855  ;;  %vm4145_vm0 = vmand %vm959_vm15, %vm653_vm4  ;;  %5763 = vst [vmem:[#allocation67_spill] sm:$0xff] %v4164_v55  ;;  %v4186_v50 = vadd.s32 %v3502_v41, %v503_v23 }
 0x129   : > { %vm960_vm14 = vcmp.eq.s32.totalorder %v856_v4, %v3664_v47  ;;  %vm1171_vm15 = vmand %vm943_vm12, %vm637_vm5 }
 0x12a   : > { %1912 = vadd.xlane.f32.xlu1 %v1822_v38  ;;  %v349_v38 = vld [vmem:[%s3475_s7 + $0x200] sm:$0xff]  ;;  %vm638_vm8 = vcmp.lt.s32.totalorder %v4103_v14, 600  ;;  %vm1188_vm12 = vmand %vm960_vm14, %vm654_vm1  ;;  %5765 = vst [vmem:[#allocation69_spill] sm:$0xff] %v4186_v50  ;;  %vm5603_vm14 = vcmp.lt.s32.totalorder %v4164_v55, 600  ;;  %vm5638_vm7 = vcmp.lt.s32.totalorder %v4186_v50, 600  ;;  %v4442_v55 = vld [vmem:[%s3475_s7 + $0x1d8] sm:$0xff] }
 0x12b   : > { %v1267_v10 = vsel %vm5597_vm2, %v349_v38, 0.0  ;;  %v4158_v38 = vadd.s32 %v3502_v41, %v502_v34  ;;  %v2520_v34 = vsel %vm4145_vm0, 1.0, %v5710_v35  ;;  %vm961_vm2 = vcmp.eq.s32.totalorder %v859_v8, %v3664_v47  ;;  %5806 = vst [vmem:[#allocation91_spill] sm:$0xff] %v4442_v55  ;;  %v288_v14 = vld [vmem:[%s3475_s7 + $0x18] sm:$0xff] }
 0x12c   : > { %3120 = vxpose.xlu0.b32.cont [10/16] (narrow) %v3119_v40, 8  ;;  %v1846_v40 = vmul.f32 %v1241_v18, %v1241_v18  ;;  %v2503_v18 = vsel %vm4124_vm3, 1.0, %v5710_v35  ;;  %v1872_v62 = vmul.f32 %v1267_v10, %v1267_v10  ;;  %vm944_vm3 = vcmp.eq.s32.totalorder %v3645_v26, %v3664_v47  ;;  %v862_v60 = vpop.permute.xlu1 %861 }
 0x12d   : > { %v3123_v2 = vpack.i.bf16 %v2503_v18, %v2519_v44  ;;  %v4178_v18 = vadd.s32 %v3502_v41, %v487_v53  ;;  %v2504_v26 = vsel %vm1171_vm15, 1.0, %v5710_v35  ;;  %vm655_vm0 = vcmp.lt.s32.totalorder %v4158_v38, 600 }
 0x12e   : > { %1992 = vadd.xlane.f32.xlu1 %v1862_v33  ;;  %v4150_v33 = vld [vmem:[%s3475_s7 + $0x150] sm:$0xff]  ;;  %v3125_v10 = vpack.i.bf16 %v2504_v26, %v2520_v34  ;;  %vm639_vm15 = vcmp.lt.s32.totalorder %v4169_v27, 600  ;;  %v2521_v53 = vsel %vm1188_vm12, 1.0, %v5710_v35  ;;  %v1271_v0 = vsel %vm5603_vm14, %v3478_v29, 0.0 }
 0x12f   : > { %v1245_v44 = vsel %vm5598_vm6, %v4150_v33, 0.0  ;;  %5764 = vst [vmem:[#allocation68_spill] sm:$0xff] %v4178_v18  ;;  %vm1172_vm6 = vmand %vm944_vm3, %vm638_vm8  ;;  %vm962_vm11 = vcmp.eq.s32.totalorder %v862_v60, %v3664_v47  ;;  %vm5637_vm14 = vcmp.lt.s32.totalorder %v4178_v18, 600  ;;  %v4231_v60 = vld [vmem:[%s3475_s7 + $0x1e8] sm:$0xff]  ;;  %v4272_v29 = vld [vmem:[%s3475_s7 + $0x1f0] sm:$0xff]  ;;  %v445_v38 = vadd.s32 40, %v3494_v37 }
 0x130   : > { %3122 = vxpose.xlu0.b32.cont [11/16] (narrow) %v3121_v56, 8  ;;  %v509_v56 = vadd.s32 552, %v3494_v37  ;;  %v1850_v4 = vmul.f32 %v1245_v44, %v1245_v44  ;;  %vm1189_vm3 = vmand %vm961_vm2, %vm655_vm0  ;;  %v2505_v23 = vsel %vm1172_vm6, 1.0, %v5710_v35  ;;  %vm946_vm2 = vcmp.eq.s32.totalorder %v3666_v20, %v3664_v47 }
 0x131   : > { %vm1173_vm13 = vmand %vm945_vm10, %vm639_vm15  ;;  %v3127_v25 = vpack.i.bf16 %v2505_v23, %v2521_v53  ;;  %v2522_v8 = vsel %vm1189_vm3, 1.0, %v5710_v35  ;;  %v1264_v23 = vsel %vm654_vm1, %v4231_v60, 0.0  ;;  %vm5773_vm3 = vcmp.lt.s32.totalorder %v3658_v24, 600 }
 0x132   : > { %1960 = vadd.xlane.f32.xlu1 %v1846_v40  ;;  %v4193_v40 = vadd.s32 %v3502_v41, %v509_v56  ;;  %vm1190_vm10 = vmand %vm962_vm11, %vm5638_vm7  ;;  %v2506_v34 = vsel %vm1173_vm13, 1.0, %v5710_v35 }
 0x133   : > { %vm1174_vm6 = vmand %vm946_vm2, %vm5637_vm14  ;;  %v3129_v44 = vpack.i.bf16 %v2506_v34, %v2522_v8  ;;  %v2523_v26 = vsel %vm1190_vm10, 1.0, %v5710_v35  ;;  %v510_v8 = vadd.s32 560, %v3494_v37  ;;  %vm5775_vm10 = vcmp.lt.s32.totalorder %v3652_v21, 600  ;;  %v4322_v21 = vld [vmem:[%s3475_s7 + $0x1a8] sm:$0xff] }
 0x134   : > { %3124 = vxpose.xlu0.b32.cont [12/16] (narrow) %v3123_v2, 8  ;;  %5766 = vst [vmem:[#allocation70_spill] sm:$0xff] %v4193_v40  ;;  %vm5624_vm12 = vcmp.lt.s32.totalorder %v4193_v40, 600  ;;  %v1876_v2 = vmul.f32 %v1271_v0, %v1271_v0  ;;  %vm2887_vm2 = vmpackc.low %vm5773_vm3, %vm641_vm9  ;;  %vm5778_vm9 = vcmp.lt.s32.totalorder %v3690_v16, 600  ;;  %vm5779_vm3 = vcmp.lt.s32.totalorder %v3724_v63, 600 }
 0x135   : > { %v1272_v56 = vsel %vm5624_vm12, %v3481_v30, 0.0 }
 0x136   : > { %2012 = vadd.xlane.f32.xlu1 %v1872_v62  ;;  %v4221_v62 = vld [vmem:[%s3475_s7 + $0x1e0] sm:$0xff]  ;;  %v1877_v20 = vmul.f32 %v1272_v56, %v1272_v56  ;;  %v1869_v56 = vmul.f32 %v1264_v23, %v1264_v23 }
 0x138   : > { %3126 = vxpose.xlu0.b32.cont [13/16] (narrow) %v3125_v10, 8  ;;  %v1263_v10 = vsel %vm653_vm4, %v4221_v62, 0.0 }
 0x139   : > { %v1868_v0 = vmul.f32 %v1263_v10, %v1263_v10 }
 0x13a   : > { %1968 = vadd.xlane.f32.xlu1 %v1850_v4  ;;  %v2507_v4 = vsel %vm1174_vm6, 1.0, %v5710_v35  ;;  %vm5776_vm6 = vcmp.lt.s32.totalorder %v3676_v6, 600 }
 0x13b   : > { %v3131_v53 = vpack.i.bf16 %v2507_v4, %v2523_v26  ;;  %v4251_v26 = vadd.s32 %v3502_v41, %v510_v8 }
 0x13c   : > { %3128 = vxpose.xlu0.b32.cont [14/16] (narrow) %v3127_v25, 8  ;;  %v4238_v25 = vld [vmem:[%s3475_s7 + $0x160] sm:$0xff] }
 0x13d   : > { %v1247_v34 = vsel %vm637_vm5, %v4238_v25, 0.0  ;;  %5768 = vst [vmem:[#allocation72_spill] sm:$0xff] %v4251_v26  ;;  %vm5615_vm11 = vcmp.lt.s32.totalorder %v4251_v26, 600  ;;  %v4281_v26 = vld [vmem:[%s3475_s7 + $0x170] sm:$0xff] }
 0x13e   : > { %2020 = vadd.xlane.f32.xlu1 %v1876_v2  ;;  %v4240_v2 = vpop.permute.xlu1 %867  ;;  %v1852_v10 = vmul.f32 %v1247_v34, %v1247_v34  ;;  %v1273_v8 = vsel %vm5615_vm11, %v3535_v58, 0.0  ;;  %v1265_v58 = vsel %vm655_vm0, %v4272_v29, 0.0  ;;  %v1249_v9 = vsel %vm639_vm15, %v4281_v26, 0.0 }
 0x13f   : > { %5767 = vst [vmem:[#allocation71_spill] sm:$0xff] %v4240_v2  ;;  %v1878_v34 = vmul.f32 %v1273_v8, %v1273_v8  ;;  %v4287_v8 = vld [vmem:[%s3475_s7 + $0x108] sm:$0xff]  ;;  %v1870_v40 = vmul.f32 %v1265_v58, %v1265_v58  ;;  %v5855_v2 = vld [vmem:[#allocation50_spill] sm:$0xff] }
 0x140   : > { %3130 = vxpose.xlu0.b32.cont [15/16] (narrow) %v3129_v44, 8  ;;  %v4247_v44 = vld [vmem:[%s3475_s7 + $0x168] sm:$0xff] }
 0x142   : > { %2022 = vadd.xlane.f32.xlu1 %v1877_v20  ;;  %v511_v20 = vadd.s32 568, %v3494_v37  ;;  %v4253_v4 = vpop.permute.xlu1 %873 }
 0x143   : > { %5769 = vst [vmem:[#allocation73_spill] sm:$0xff] %v4253_v4  ;;  %v5845_v4 = vld [vmem:[#allocation24_spill] sm:$0xff] }
 0x144   : > { %3132 = vxpose.xlu0.b32.end [16/16] (narrow) %v3131_v53, 8  ;;  %v1248_v53 = vsel %vm638_vm8, %v4247_v44, 0.0 }
 0x145   : > { %v1853_v23 = vmul.f32 %v1248_v53, %v1248_v53 }
 0x146   : > { %2004 = vadd.xlane.f32.xlu1 %v1868_v0  ;;  %v4259_v0 = vadd.s32 %v3502_v41, %v511_v20 }
 0x148   : > { %5770 = vst [vmem:[#allocation74_spill] sm:$0xff] %v4259_v0  ;;  %vm5614_vm13 = vcmp.lt.s32.totalorder %v4259_v0, 600 }
 0x149   : > { %v1274_v20 = vsel %vm5614_vm13, %v3538_v59, 0.0  ;;  %v4290_v59 = vld [vmem:[%s3475_s7 + $0x198] sm:$0xff]  ;;  %vm2890_vm13 = vmpackc.low %vm5776_vm6, %vm5775_vm10 }
 0x14a   : > { %2006 = vadd.xlane.f32.xlu1 %v1869_v56  ;;  %v4265_v56 = vpop.permute.xlu1 %879  ;;  %v1879_v53 = vmul.f32 %v1274_v20, %v1274_v20  ;;  %v2889_v20 = vpack.c.bf16 %v4287_v8, %v3661_v54  ;;  %v4314_v54 = vld [vmem:[%s3475_s7 + $0x118] sm:$0xff]  ;;  %vm2893_vm10 = vmpackc.low %vm5779_vm3, %vm5778_vm9  ;;  %vm5783_vm9 = vcmp.lt.s32.totalorder %v3771_v46, 600  ;;  %vm5784_vm3 = vcmp.lt.s32.totalorder %v3801_v3, 600 }
 0x14b   : > { %5771 = vst [vmem:[#allocation75_spill] sm:$0xff] %v4265_v56  ;;  %v2892_v56 = vpack.c.bf16 %v4290_v59, %v3727_v19  ;;  %v2895_v58 = vpack.c.bf16 %v4314_v54, %v3804_v57  ;;  %v2898_v57 = vpack.c.bf16 %v4322_v21, %v3884_v28  ;;  %v456_v28 = vadd.s32 128, %v3494_v37 }
 0x14e   : > { %1972 = vadd.xlane.f32.xlu1 %v1852_v10  ;;  %v512_v10 = vadd.s32 576, %v3494_v37  ;;  %v4275_v30 = vpop.permute.xlu1 %885 }
 0x14f   : > { %5772 = vst [vmem:[#allocation76_spill] sm:$0xff] %v4275_v30  ;;  %v514_v30 = vadd.s32 592, %v3494_v37 }
 0x150   : > { %v4301_v0 = vadd.s32 %v3502_v41, %v512_v10 }
 0x151   : > { %v4330_v10 = vadd.s32 %v3502_v41, %v514_v30 }
 0x152   : > { %1974 = vadd.xlane.f32.xlu1 %v1853_v23  ;;  %v4284_v23 = vld [vmem:[%s3475_s7 + $0x188] sm:$0xff]  ;;  %5774 = vst [vmem:[#allocation77_spill] sm:$0xff] %v4301_v0  ;;  %v4319_v19 = vpop.permute.xlu1 %891  ;;  %vm5616_vm6 = vcmp.lt.s32.totalorder %v4301_v0, 600  ;;  %v4439_v0 = vld [vmem:[%s3475_s7 + $0x1d0] sm:$0xff] }
 0x153   : > { %5777 = vst [vmem:[#allocation78_spill] sm:$0xff] %v4319_v19  ;;  %5780 = vst [vmem:[#allocation79_spill] sm:$0xff] %v4330_v10 }
 0x154   : > { %5805 = vst [vmem:[#allocation90_spill] sm:$0xff] %v4439_v0 }
 0x156   : > { %2024 = vadd.xlane.f32.xlu1 %v1878_v34  ;;  %v2886_v34 = vpack.c.bf16 %v4284_v23, %v3629_v51  ;;  %v357_v51 = vld [vmem:[%s3475_s7 + $0x240] sm:$0xff] }
 0x157   : > { %v1275_v16 = vsel %vm5616_vm6, %v357_v51, 0.0 }
 0x158   : > { %2888 = vmatprep.subr.msk.bf16.mxu1 %vm2887_vm2, %v2886_v34  ;;  %vm5782_vm2 = vcmp.lt.s32.totalorder %v3719_v48, 600  ;;  %v4341_v34 = vld [vmem:[%s3475_s7 + $0x128] sm:$0xff] }
 0x159   : > { %2891 = vmatpush3.bf16.msk.msra.mxu1 %vm2890_vm13, %v2889_v20  ;;  %vm5781_vm13 = vcmp.lt.s32.totalorder %v3705_v1, 600  ;;  %v359_v20 = vld [vmem:[%s3475_s7 + $0x250] sm:$0xff]  ;;  %v2901_v30 = vpack.c.bf16 %v4341_v34, %v3963_v61  ;;  %v1880_v1 = vmul.f32 %v1275_v16, %v1275_v16  ;;  %v4361_v61 = vpop.permute.xlu1 %897  ;;  %v4392_v16 = vld [vmem:[%s3475_s7 + $0x80] sm:$0xff] }
 0x15a   : > { %2026 = vadd.xlane.f32.xlu1 %v1879_v53  ;;  %v1854_v53 = vmul.f32 %v1249_v9, %v1249_v9  ;;  %2894 = vmatprep.subr.msk.bf16.mxu1 %vm2893_vm10, %v2892_v56  ;;  %vm2896_vm11 = vmpackc.low %vm5782_vm2, %vm5781_vm13  ;;  %vm5617_vm13 = vcmp.lt.s32.totalorder %v4330_v10, 600  ;;  %vm5786_vm2 = vcmp.lt.s32.totalorder %v3819_v12, 600  ;;  %5787 = vst [vmem:[#allocation80_spill] sm:$0xff] %v4361_v61  ;;  %v4366_v9 = vld [vmem:[%s3475_s7 + $0x138] sm:$0xff] }
 0x15b   : > { %vm2899_vm10 = vmpackc.low %vm5784_vm3, %vm5783_vm9  ;;  %v1277_v46 = vsel %vm5617_vm13, %v359_v20, 0.0  ;;  %v2907_v51 = vpack.c.bf16 %v4366_v9, %v4074_v32  ;;  %vm5790_vm9 = vcmp.lt.s32.totalorder %v3851_v42, 600  ;;  %vm5791_vm3 = vcmp.lt.s32.totalorder %v3881_v17, 600  ;;  %v4397_v20 = vld [vmem:[%s3475_s7 + $0x140] sm:$0xff] }
 0x15c   : > { %5796 = vst [vmem:[#allocation85_spill] sm:$0xff] %v4397_v20 }
 0x15d   : > { %2897 = vmatpush3.bf16.msk.msra.mxu1 %vm2896_vm11, %v2895_v58  ;;  %vm5785_vm11 = vcmp.lt.s32.totalorder %v3781_v15, 600  ;;  %v4374_v15 = vld [vmem:[%s3475_s7 + $0x1c0] sm:$0xff]  ;;  %v4377_v58 = vld [vmem:[%s3475_s7 + $0x1c8] sm:$0xff] }
 0x15e   : > { %2008 = vadd.xlane.f32.xlu1 %v1870_v40  ;;  %v4348_v40 = vld [vmem:[%s3475_s7 + $0x1b8] sm:$0xff]  ;;  %2900 = vmatprep.subr.msk.bf16.mxu1 %vm2899_vm10, %v2898_v57  ;;  %vm2902_vm6 = vmpackc.low %vm5786_vm2, %vm5785_vm11  ;;  %5788 = vst [vmem:[#allocation81_spill] sm:$0xff] %v4374_v15  ;;  %v1882_v57 = vmul.f32 %v1277_v46, %v1277_v46  ;;  %v2910_v32 = vpack.c.bf16 %v4377_v58, %v4374_v15  ;;  %vm5794_vm11 = vcmp.lt.s32.totalorder %v3897_v5, 600  ;;  %v5880_v15 = vld [vmem:[#allocation5_spill] sm:$0xff] }
 0x15f   : > { %v2904_v56 = vpack.c.bf16 %v4348_v40, %v4035_v39  ;;  %v4371_v39 = vadd.s32 %v3502_v41, %v456_v28  ;;  %5789 = vst [vmem:[#allocation82_spill] sm:$0xff] %v4377_v58  ;;  %vm2905_vm10 = vmpackc.low %vm5791_vm3, %vm5790_vm9  ;;  %v4404_v28 = vadd.s32 %v3502_v41, %v3494_v37  ;;  %vm5798_vm3 = vcmp.lt.s32.totalorder %v3929_v11, 600  ;;  %v4697_v58 = vld [vmem:[%s3475_s7 + $0x68] sm:$0xff]  ;;  %v5879_v11 = vld [vmem:[#allocation62_spill] sm:$0xff] }
 0x161   : > { %2903 = vmatpush3.bf16.msk.msra.mxu1 %vm2902_vm6, %v2901_v30  ;;  %vm5793_vm6 = vcmp.lt.s32.totalorder %v3863_v36, 600  ;;  %v4400_v30 = vld [vmem:[%s3475_s7 + $0x148] sm:$0xff]  ;;  %v441_v36 = vadd.s32 8, %v3494_v37  ;;  %vm609_vm9 = vcmp.lt.s32.totalorder %v4371_v39, 600 }
 0x162   : > { %1976 = vadd.xlane.f32.xlu1 %v1854_v53  ;;  %v4383_v53 = vpop.permute.xlu0 %864  ;;  %2906 = vmatprep.subr.msk.bf16.mxu1 %vm2905_vm10, %v2904_v56  ;;  %vm2908_vm2 = vmpackc.low %vm5794_vm11, %vm5793_vm6  ;;  %5797 = vst [vmem:[#allocation86_spill] sm:$0xff] %v4400_v30  ;;  %vm5799_vm10 = vcmp.lt.s32.totalorder %v3960_v7, 600  ;;  %v4415_v56 = vld [vmem:[%s3475_s7 + $0x158] sm:$0xff]  ;;  %v1219_v46 = vsel %vm609_vm9, %v4392_v16, 0.0  ;;  %vm5801_vm11 = vcmp.lt.s32.totalorder %v3939_v45, 600  ;;  %v3185_v45 = vld [vmem:[%s3475_s7 + $0x50] sm:$0xff] }
 0x163   : > { %5792 = vst [vmem:[#allocation83_spill] sm:$0xff] %v4383_v53  ;;  %vm2911_vm6 = vmpackc.low %vm5799_vm10, %vm5798_vm3  ;;  %vm593_vm3 = vcmp.lt.s32.totalorder %v4404_v28, 600  ;;  %v1824_v19 = vmul.f32 %v1219_v46, %v1219_v46  ;;  %vm5807_vm10 = vcmp.lt.s32.totalorder %v4007_v13, 600  ;;  %v5811_v46 = vld [vmem:[#allocation65_spill] sm:$0xff] }
 0x164   : > { %5800 = vst [vmem:[#allocation87_spill] sm:$0xff] %v4415_v56 }
 0x165   : > { %2909 = vmatpush3.bf16.msk.msra.mxu1 %vm2908_vm2, %v2907_v51  ;;  %vm5802_vm2 = vcmp.lt.s32.totalorder %v3978_v31, 600  ;;  %v4425_v51 = vld [vmem:[%s3475_s7] sm:$0xff] }
 0x166   : > { %2028 = vadd.xlane.f32.xlu1 %v1880_v1  ;;  %v2913_v1 = vpack.c.bf16 %v4400_v30, %v4397_v20  ;;  %2912 = vmatprep.subr.msk.bf16.mxu1 %vm2911_vm6, %v2910_v32  ;;  %vm2914_vm13 = vmpackc.low %vm5802_vm2, %vm5801_vm11  ;;  %v4430_v10 = vpop.permute.xlu0 %870  ;;  %v459_v32 = vadd.s32 152, %v3494_v37  ;;  %vm5812_vm2 = vcmp.lt.s32.totalorder %v5811_v46, 600  ;;  %v4652_v30 = vld [vmem:[%s3475_s7 + $0x58] sm:$0xff] }
 0x167   : > { %v4394_v42 = vpop.xlane.xlu1 %1918  ;;  %5804 = vst [vmem:[#allocation89_spill] sm:$0xff] %v4430_v10  ;;  %v2871_v20 = vpack.c.bf16 %v4652_v30, %v3185_v45  ;;  %v471_v45 = vadd.s32 248, %v3494_v37 }
 0x168   : > { %5795 = vst [vmem:[#allocation84_spill] sm:$0xff] %v4394_v42  ;;  %v2919_v42 = vpack.c.bf16 %v4415_v56, %v4150_v33  ;;  %v2916_v33 = vpack.c.bf16 %v4442_v55, %v4439_v0  ;;  %v4460_v56 = vld [vmem:[%s3475_s7 + $0x1f8] sm:$0xff] }
 0x169   : > { %2915 = vmatpush3.bf16.msk.msra.mxu1 %vm2914_vm13, %v2913_v1  ;;  %v2922_v1 = vpack.c.bf16 %v4231_v60, %v4221_v62  ;;  %vm5810_vm13 = vcmp.lt.s32.totalorder %v4016_v43, 600  ;;  %5813 = vst [vmem:[#allocation92_spill] sm:$0xff] %v4460_v56  ;;  %v443_v62 = vadd.s32 24, %v3494_v37  ;;  %v4470_v60 = vadd.s32 %v3502_v41, %v459_v32  ;;  %v4483_v55 = vld [vmem:[%s3475_s7 + $0x178] sm:$0xff] }
 0x16a   : > { %2032 = vadd.xlane.f32.xlu1 %v1882_v57  ;;  %v4433_v57 = vadd.s32 %v3502_v41, %v441_v36  ;;  %v1203_v36 = vsel %vm593_vm3, %v4425_v51, 0.0  ;;  %vm2920_vm12 = vmpackc.low %vm5812_vm2, %vm5810_vm13  ;;  %v2925_v43 = vpack.c.bf16 %v4247_v44, %v4238_v25  ;;  %5816 = vst [vmem:[#allocation95_spill] sm:$0xff] %v4483_v55  ;;  %v2931_v44 = vpack.c.bf16 %v4483_v55, %v4281_v26  ;;  %v3179_v55 = vld [vmem:[%s3475_s7 + $0x20] sm:$0xff] }
 0x16b   : > { %v4427_v61 = vpop.xlane.xlu1 %1920  ;;  %v1808_v46 = vmul.f32 %v1203_v36, %v1203_v36  ;;  %v4496_v25 = vadd.s32 %v3502_v41, %v443_v62 }
 0x16c   : > { %5803 = vst [vmem:[#allocation88_spill] sm:$0xff] %v4427_v61  ;;  %v5808_v61 = vld [vmem:[#allocation64_spill] sm:$0xff] }
 0x16d   : > { %vm5809_vm6 = vcmp.lt.s32.totalorder %v5808_v61, 600  ;;  %v4463_v61 = vld [vmem:[%s3475_s7 + $0x8] sm:$0xff] }
 0x16e   : > { %vm2917_vm11 = vmpackc.low %vm5809_vm6, %vm5807_vm10  ;;  %vm594_vm10 = vcmp.lt.s32.totalorder %v4433_v57, 600 }
 0x16f   : > { %v4465_v13 = vpop.xlane.xlu1 %1888  ;;  %2918 = vmatprep.subr.msk.bf16.mxu1 %vm2917_vm11, %v2916_v33  ;;  %vm2923_vm6 = vmpackc.low %vm654_vm1, %vm653_vm4  ;;  %v2928_v33 = vpack.c.bf16 %v4460_v56, %v4272_v29  ;;  %v1204_v32 = vsel %vm594_vm10, %v4463_v61, 0.0  ;;  %vm612_vm1 = vcmp.lt.s32.totalorder %v4470_v60, 600  ;;  %v461_v29 = vadd.s32 168, %v3494_v37 }
 0x170   : > { %5814 = vst [vmem:[#allocation93_spill] sm:$0xff] %v4465_v13  ;;  %2921 = vmatpush3.bf16.msk.msra.mxu1 %vm2920_vm12, %v2919_v42  ;;  %v4478_v13 = vpop.permute.xlu0 %876  ;;  %vm2926_vm12 = vmpackc.low %vm638_vm8, %vm637_vm5  ;;  %v1222_v22 = vsel %vm612_vm1, %v304_v49, 0.0  ;;  %vm596_vm8 = vcmp.lt.s32.totalorder %v4496_v25, 600 }
 0x171   : > { %1916 = vadd.xlane.f32.xlu0 %v1824_v19  ;;  %5815 = vst [vmem:[#allocation94_spill] sm:$0xff] %v4478_v13  ;;  %2924 = vmatprep.subr.msk.bf16.mxu1 %vm2923_vm6, %v2922_v1  ;;  %v1809_v19 = vmul.f32 %v1204_v32, %v1204_v32  ;;  %vm2929_vm5 = vmpackc.low %vm5638_vm7, %vm655_vm0  ;;  %v4520_v1 = vadd.s32 %v3502_v41, %v461_v29  ;;  %v1206_v27 = vsel %vm596_vm8, %v288_v14, 0.0  ;;  %v5840_v13 = vld [vmem:[#allocation46_spill] sm:$0xff] }
 0x172   : > { %vm2932_vm4 = vmpackc.low %vm5637_vm14, %vm639_vm15  ;;  %v1827_v36 = vmul.f32 %v1222_v22, %v1222_v22  ;;  %v1811_v32 = vmul.f32 %v1206_v27, %v1206_v27  ;;  %v447_v22 = vadd.s32 56, %v3494_v37  ;;  %v3176_v27 = vld [vmem:[%s3475_s7 + $0x90] sm:$0xff] }
 0x173   : > { %v4493_v52 = vpop.xlane.xlu1 %1924  ;;  %vm5648_vm0 = vcmp.lt.s32.totalorder %v4520_v1, 600  ;;  %v2844_v18 = vpack.c.bf16 %v304_v49, %v3176_v27  ;;  %vm2842_vm2 = vmpackc.low %vm594_vm10, %vm593_vm3 }
 0x174   : > { %5817 = vst [vmem:[#allocation96_spill] sm:$0xff] %v4493_v52  ;;  %2927 = vmatpush3.bf16.msk.msra.mxu1 %vm2926_vm12, %v2925_v43  ;;  %v4515_v42 = vpop.permute.xlu0 %882  ;;  %v463_v43 = vadd.s32 184, %v3494_v37  ;;  %v4562_v27 = vadd.s32 %v3502_v41, %v447_v22 }
 0x175   : > { %1884 = vadd.xlane.f32.xlu0 %v1808_v46  ;;  %2930 = vmatprep.subr.msk.bf16.mxu1 %vm2929_vm5, %v2928_v33  ;;  %5819 = vst [vmem:[#allocation98_spill] sm:$0xff] %v4515_v42  ;;  %v306_v46 = vld [vmem:[%s3475_s7 + $0xa8] sm:$0xff]  ;;  %v4529_v33 = vadd.s32 %v3502_v41, %v445_v38  ;;  %v5833_v42 = vld [vmem:[#allocation42_spill] sm:$0xff] }
 0x176   : > { %v3175_v38 = vld [vmem:[%s3475_s7 + $0x88] sm:$0xff] }
 0x177   : > { %v4513_v26 = vpop.xlane.xlu1 %1892  ;;  %v2838_v52 = vpack.c.bf16 %v3175_v38, %v4392_v16  ;;  %vm5647_vm13 = vcmp.lt.s32.totalorder %v4529_v33, 600  ;;  %v3177_v16 = vld [vmem:[%s3475_s7 + $0x10] sm:$0xff]  ;;  %v308_v38 = vld [vmem:[%s3475_s7 + $0xb8] sm:$0xff] }
 0x178   : > { %5818 = vst [vmem:[#allocation97_spill] sm:$0xff] %v4513_v26  ;;  %2933 = vmatpush3.bf16.msk.msra.mxu1 %vm2932_vm4, %v2931_v44  ;;  %v4532_v29 = vpop.permute.xlu0 %888  ;;  %v2841_v44 = vpack.c.bf16 %v4463_v61, %v4425_v51  ;;  %v5823_v61 = vld [vmem:[#allocation31_spill] sm:$0xff] }
 0x179   : > { %1886 = vadd.xlane.f32.xlu0 %v1809_v19  ;;  %5821 = vst [vmem:[#allocation100_spill] sm:$0xff] %v4532_v29  ;;  %v1224_v19 = vsel %vm5648_vm0, %v306_v46, 0.0  ;;  %vm5824_vm15 = vcmp.lt.s32.totalorder %v5823_v61, 600 }
 0x17a   : > { %vm2839_vm11 = vmpackc.low %vm5824_vm15, %vm609_vm9  ;;  %v1829_v51 = vmul.f32 %v1224_v19, %v1224_v19  ;;  %v5826_v19 = vld [vmem:[#allocation34_spill] sm:$0xff] }
 0x17b   : > { %v4525_v62 = vpop.xlane.xlu1 %1928  ;;  %2840 = vmatprep.subr.msk.bf16.mxu0 %vm2839_vm11, %v2838_v52  ;;  %vm5827_vm6 = vcmp.lt.s32.totalorder %v5826_v19, 600  ;;  %v465_v52 = vadd.s32 200, %v3494_v37  ;;  %vm5645_vm11 = vcmp.lt.s32.totalorder %v4562_v27, 600 }
 0x17c   : > { %5820 = vst [vmem:[#allocation99_spill] sm:$0xff] %v4525_v62  ;;  %v290_v62 = vld [vmem:[%s3475_s7 + $0x28] sm:$0xff]  ;;  %2843 = vmatpush3.bf16.msk.msra.mxu0 %vm2842_vm2, %v2841_v44  ;;  %vm2845_vm12 = vmpackc.low %vm612_vm1, %vm5827_vm6  ;;  %v3178_v44 = vld [vmem:[%s3475_s7 + $0xa0] sm:$0xff]  ;;  %vm5834_vm2 = vcmp.lt.s32.totalorder %v5833_v42, 600 }
 0x17d   : > { %1922 = vadd.xlane.f32.xlu0 %v1827_v36  ;;  %v4545_v36 = vadd.s32 %v3502_v41, %v463_v43  ;;  %v2847_v43 = vpack.c.bf16 %v288_v14, %v3177_v16  ;;  %v1208_v49 = vsel %vm5647_vm13, %v290_v62, 0.0  ;;  %v4572_v14 = vpop.permute.xlu0 %894  ;;  %2846 = vmatprep.subr.msk.bf16.mxu0 %vm2845_vm12, %v2844_v18  ;;  %v2850_v16 = vpack.c.bf16 %v306_v46, %v3178_v44  ;;  %vm2851_vm6 = vmpackc.low %vm5648_vm0, %vm5834_vm2 }
 0x17e   : > { %5828 = vst [vmem:[#allocation34_spill] sm:$0xff] %v4572_v14  ;;  %v1813_v22 = vmul.f32 %v1208_v49, %v1208_v49  ;;  %v2853_v50 = vpack.c.bf16 %v290_v62, %v3179_v55  ;;  %v292_v14 = vld [vmem:[%s3475_s7 + $0x38] sm:$0xff]  ;;  %v449_v46 = vadd.s32 72, %v3494_v37  ;;  %v3180_v49 = vld [vmem:[%s3475_s7 + $0xb0] sm:$0xff] }
 0x17f   : > { %v4540_v26 = vpop.xlane.xlu1 %1896  ;;  %vm5646_vm5 = vcmp.lt.s32.totalorder %v4545_v36, 600  ;;  %v2856_v44 = vpack.c.bf16 %v308_v38, %v3180_v49  ;;  %v310_v49 = vld [vmem:[%s3475_s7 + $0xc8] sm:$0xff] }
 0x180   : > { %5822 = vst [vmem:[#allocation101_spill] sm:$0xff] %v4540_v26  ;;  %v5829_v26 = vld [vmem:[#allocation37_spill] sm:$0xff]  ;;  %v4613_v62 = vadd.s32 %v3502_v41, %v449_v46  ;;  %v5842_v46 = vld [vmem:[#allocation47_spill] sm:$0xff] }
 0x181   : > { %1890 = vadd.xlane.f32.xlu0 %v1811_v32  ;;  %vm5830_vm4 = vcmp.lt.s32.totalorder %v5829_v26, 600 }
 0x182   : > { %vm2848_vm15 = vmpackc.low %vm596_vm8, %vm5830_vm4 }
 0x183   : > { %v4564_v32 = vpop.xlane.xlu1 %1932  ;;  %2849 = vmatpush3.bf16.msk.msra.mxu0 %vm2848_vm15, %v2847_v43  ;;  %v5835_v43 = vld [vmem:[#allocation45_spill] sm:$0xff]  ;;  %vm5841_vm15 = vcmp.lt.s32.totalorder %v5840_v13, 600 }
 0x184   : > { %5825 = vst [vmem:[#allocation31_spill] sm:$0xff] %v4564_v32  ;;  %v1226_v32 = vsel %vm5646_vm5, %v308_v38, 0.0  ;;  %2852 = vmatprep.subr.msk.bf16.mxu0 %vm2851_vm6, %v2850_v16  ;;  %vm5836_vm12 = vcmp.lt.s32.totalorder %v5835_v43, 600  ;;  %v1210_v38 = vsel %vm5645_vm11, %v292_v14, 0.0  ;;  %vm2857_vm2 = vmpackc.low %vm5646_vm5, %vm5841_vm15  ;;  %vm5641_vm15 = vcmp.lt.s32.totalorder %v4613_v62, 600 }
 0x185   : > { %1926 = vadd.xlane.f32.xlu0 %v1829_v51  ;;  %v4588_v51 = vadd.s32 %v3502_v41, %v465_v52  ;;  %v1831_v56 = vmul.f32 %v1226_v32, %v1226_v32  ;;  %vm2854_vm4 = vmpackc.low %vm5647_vm13, %vm5836_vm12  ;;  %v3181_v32 = vld [vmem:[%s3475_s7 + $0x30] sm:$0xff]  ;;  %vm5843_vm12 = vcmp.lt.s32.totalorder %v5842_v46, 600 }
 0x186   : > { %v2859_v52 = vpack.c.bf16 %v292_v14, %v3181_v32  ;;  %v1815_v14 = vmul.f32 %v1210_v38, %v1210_v38  ;;  %v3182_v32 = vld [vmem:[%s3475_s7 + $0xc0] sm:$0xff]  ;;  %v469_v38 = vadd.s32 232, %v3494_v37 }
 0x187   : > { %v4584_v18 = vpop.xlane.xlu1 %1900  ;;  %2855 = vmatpush3.bf16.msk.msra.mxu0 %vm2854_vm4, %v2853_v50  ;;  %vm5644_vm6 = vcmp.lt.s32.totalorder %v4588_v51, 600  ;;  %v294_v50 = vld [vmem:[%s3475_s7 + $0x48] sm:$0xff]  ;;  %vm2860_vm4 = vmpackc.low %vm5645_vm11, %vm5843_vm12 }
 0x188   : > { %5831 = vst [vmem:[#allocation37_spill] sm:$0xff] %v4584_v18  ;;  %v4591_v29 = vpop.trf.xlu0  ;;  %v451_v18 = vadd.s32 88, %v3494_v37  ;;  %2858 = vmatprep.subr.msk.bf16.mxu0 %vm2857_vm2, %v2856_v44  ;;  %vm915_vm2 = vcmp.eq.s32.totalorder %v5845_v4, %v3664_v47  ;;  %v1212_v10 = vsel %vm5641_vm15, %v294_v50, 0.0  ;;  %v455_v4 = vadd.s32 120, %v3494_v37 }
 0x189   : > { %5832 = vst [vmem:[#allocation102_spill] sm:$0xff] %v4591_v29  ;;  %1894 = vadd.xlane.f32.xlu0 %v1813_v22  ;;  %v467_v22 = vadd.s32 216, %v3494_v37  ;;  %v5838_v16 = vunpack.i.l.bf16 %v4591_v29  ;;  %v5839_v0 = vunpack.i.h.bf16 %v4591_v29 }
 0x18a   : > { %v4640_v44 = vadd.s32 %v3502_v41, %v451_v18  ;;  %v5848_v18 = vld [vmem:[#allocation49_spill] sm:$0xff] }
 0x18b   : > { %v4608_v55 = vpop.xlane.xlu1 %1980  ;;  %1730 = vmatprep.mubr.f32.mxu1 %v5838_v16  ;;  %v2862_v16 = vpack.c.bf16 %v310_v49, %v3182_v32  ;;  %2861 = vmatpush3.bf16.msk.msra.mxu0 %vm2860_vm4, %v2859_v52  ;;  %v5846_v52 = vld [vmem:[#allocation48_spill] sm:$0xff]  ;;  %vm5849_vm14 = vcmp.lt.s32.totalorder %v5848_v18, 600 }
 0x18c   : > { %5837 = vst [vmem:[#allocation42_spill] sm:$0xff] %v4608_v55  ;;  %1731 = vmatmul.mubr.f32.vlgmr.msra.gmra.mrb[0].mxu1 %v5839_v0  ;;  %v3183_v0 = vld [vmem:[%s3475_s7 + $0x40] sm:$0xff]  ;;  %v1228_v55 = vsel %vm5644_vm6, %v310_v49, 0.0  ;;  %v312_v49 = vld [vmem:[%s3475_s7 + $0xd8] sm:$0xff]  ;;  %vm5847_vm12 = vcmp.lt.s32.totalorder %v5846_v52, 600  ;;  %vm2866_vm7 = vmpackc.low %vm5641_vm15, %vm5849_vm14 }
 0x18d   : > { %1930 = vadd.xlane.f32.xlu0 %v1831_v56  ;;  %v2865_v29 = vpack.c.bf16 %v294_v50, %v3183_v0  ;;  %v4633_v56 = vadd.s32 %v3502_v41, %v467_v22  ;;  %v453_v0 = vadd.s32 104, %v3494_v37  ;;  %vm2863_vm4 = vmpackc.low %vm5644_vm6, %vm5847_vm12  ;;  %v3184_v22 = vld [vmem:[%s3475_s7 + $0xd0] sm:$0xff]  ;;  %v4675_v50 = vadd.s32 %v3502_v41, %v469_v38 }
 0x18e   : > { %v2868_v31 = vpack.c.bf16 %v312_v49, %v3184_v22  ;;  %2864 = vmatprep.subr.msk.bf16.mxu0 %vm2863_vm4, %v2862_v16  ;;  %vm4669_vm4 = vmand %vm915_vm2, %vm609_vm9  ;;  %v5854_v16 = vld [vmem:[#allocation23_spill] sm:$0xff]  ;;  %v4688_v22 = vld [vmem:[%s3475_s7 + $0xe8] sm:$0xff]  ;;  %vm5856_vm2 = vcmp.lt.s32.totalorder %v5855_v2, 600  ;;  %v1817_v38 = vmul.f32 %v1212_v10, %v1212_v10 }
 0x18f   : > { %v4636_v32 = vpop.xlane.xlu1 %1936  ;;  %2867 = vmatpush3.bf16.msk.msra.mxu0 %vm2866_vm7, %v2865_v29  ;;  %vm5651_vm14 = vcmp.lt.s32.totalorder %v4633_v56, 600  ;;  %vm604_vm7 = vcmp.lt.s32.totalorder %v4640_v44, 600  ;;  %v4682_v39 = vadd.s32 %v3502_v41, %v453_v0  ;;  %vm916_vm9 = vcmp.eq.s32.totalorder %v5854_v16, %v3664_v47  ;;  %v5857_v0 = vld [vmem:[#allocation51_spill] sm:$0xff]  ;;  %v5869_v16 = vld [vmem:[#allocation52_spill] sm:$0xff] }
 0x190   : > { %5844 = vst [vmem:[#allocation45_spill] sm:$0xff] %v4636_v32  ;;  %v1833_v32 = vmul.f32 %v1228_v55, %v1228_v55  ;;  %vm2869_vm15 = vmpackc.low %vm5651_vm14, %vm5856_vm2  ;;  %vm5858_vm6 = vcmp.lt.s32.totalorder %v5857_v0, 600  ;;  %vm5861_vm2 = vcmp.lt.s32.totalorder %v3658_v24, 600  ;;  %v4730_v24 = vadd.s32 %v3502_v41, %v471_v45  ;;  %v5928_v44 = vld [vmem:[#allocation40_spill] sm:$0xff] }
 0x191   : > { %1898 = vadd.xlane.f32.xlu0 %v1815_v14  ;;  %v5850_v14 = vld [vmem:[#allocation6_spill] sm:$0xff]  ;;  %2870 = vmatprep.subr.msk.bf16.mxu0 %vm2869_vm15, %v2868_v31  ;;  %vm2872_vm11 = vmpackc.low %vm604_vm7, %vm5858_vm6  ;;  %v1252_v10 = vsel %vm5861_vm2, %v4284_v23, 0.0  ;;  %vm5864_vm15 = vcmp.lt.s32.totalorder %v5823_v61, 600  ;;  %v2476_v61 = vsel %vm4669_vm4, 1.0, %v5710_v35  ;;  %vm5870_vm2 = vcmp.lt.s32.totalorder %v5869_v16, 600 }
 0x192   : > { %vm899_vm12 = vcmp.eq.s32.totalorder %v5850_v14, %v3664_v47  ;;  %v5862_v31 = vld [vmem:[#allocation54_spill] sm:$0xff]  ;;  %v1857_v45 = vmul.f32 %v1252_v10, %v1252_v10 }
 0x193   : > { %v4678_v29 = vpop.xlane.xlu1 %1948  ;;  %vm4708_vm5 = vmand %vm899_vm12, %vm593_vm3  ;;  %2873 = vmatpush3.bf16.msk.msra.mxu0 %vm2872_vm11, %v2871_v20  ;;  %vm622_vm12 = vcmp.lt.s32.totalorder %v4675_v50, 600  ;;  %vm606_vm11 = vcmp.lt.s32.totalorder %v4682_v39, 600  ;;  %v4736_v20 = vadd.s32 %v3502_v41, %v455_v4  ;;  %v5868_v14 = vld [vmem:[#allocation26_spill] sm:$0xff]  ;;  %v5936_v39 = vld [vmem:[#allocation43_spill] sm:$0xff] }
 0x194   : > { %5853 = vst [vmem:[#allocation46_spill] sm:$0xff] %v4678_v29  ;;  %v3186_v29 = vld [vmem:[%s3475_s7 + $0xe0] sm:$0xff]  ;;  %vm4724_vm3 = vmand %vm916_vm9, %vm5864_vm15  ;;  %vm917_vm9 = vcmp.eq.s32.totalorder %v5868_v14, %v3664_v47  ;;  %v2460_v55 = vsel %vm4708_vm5, 1.0, %v5710_v35  ;;  %v4771_v14 = vld [vmem:[%s3475_s7 + $0x78] sm:$0xff] }
 0x195   : > { %1934 = vadd.xlane.f32.xlu0 %v1833_v32  ;;  %v2874_v7 = vpack.c.bf16 %v4688_v22, %v3186_v29  ;;  %v2877_v32 = vpack.c.bf16 %v4697_v58, %v5862_v31  ;;  %v5863_v29 = vld [vmem:[#allocation8_spill] sm:$0xff]  ;;  %vm2875_vm15 = vmpackc.low %vm622_vm12, %vm5870_vm2  ;;  %v4748_v31 = vld [vmem:[%s3475_s7 + $0xf8] sm:$0xff]  ;;  %v3138_v53 = vpack.i.bf16 %v2460_v55, %v2476_v61  ;;  %vm608_vm2 = vcmp.lt.s32.totalorder %v4736_v20, 600 }
 0x196   : > { %vm900_vm6 = vcmp.eq.s32.totalorder %v5863_v29, %v3664_v47  ;;  %v5883_v55 = vld [vmem:[#allocation59_spill] sm:$0xff] }
 0x197   : > { %v4732_v23 = vpop.xlane.xlu1 %1904  ;;  %2876 = vmatprep.subr.msk.bf16.mxu0 %vm2875_vm15, %v2874_v7  ;;  %vm4762_vm4 = vmand %vm900_vm6, %vm594_vm10  ;;  %v1230_v7 = vsel %vm5651_vm14, %v312_v49, 0.0  ;;  %vm5652_vm10 = vcmp.lt.s32.totalorder %v4730_v24, 600  ;;  %v2883_v49 = vpack.c.bf16 %v4771_v14, %v5879_v11  ;;  %vm901_vm6 = vcmp.eq.s32.totalorder %v5880_v15, %v3664_v47  ;;  %v5885_v15 = vld [vmem:[#allocation25_spill] sm:$0xff] }
 0x198   : > { %5867 = vst [vmem:[#allocation47_spill] sm:$0xff] %v4732_v23  ;;  %v5871_v23 = vld [vmem:[#allocation53_spill] sm:$0xff]  ;;  %v1835_v61 = vmul.f32 %v1230_v7, %v1230_v7  ;;  %vm5884_vm15 = vcmp.lt.s32.totalorder %v5883_v55, 600  ;;  %v2461_v11 = vsel %vm4762_vm4, 1.0, %v5710_v35  ;;  %vm5886_vm14 = vcmp.lt.s32.totalorder %v3676_v6, 600 }
 0x199   : > { %1902 = vadd.xlane.f32.xlu0 %v1817_v38  ;;  %vm5872_vm13 = vcmp.lt.s32.totalorder %v5871_v23, 600  ;;  %v5875_v38 = vld [vmem:[#allocation56_spill] sm:$0xff]  ;;  %v1236_v28 = vsel %vm5886_vm14, %v4287_v8, 0.0 }
 0x19a   : > { %vm2878_vm0 = vmpackc.low %vm606_vm11, %vm5872_vm13  ;;  %v2880_v10 = vpack.c.bf16 %v4748_v31, %v5875_v38  ;;  %vm5876_vm13 = vcmp.lt.s32.totalorder %v5826_v19, 600  ;;  %v2477_v19 = vsel %vm4724_vm3, 1.0, %v5710_v35  ;;  %vm918_vm3 = vcmp.eq.s32.totalorder %v5885_v15, %v3664_v47  ;;  %v5888_v38 = vld [vmem:[#allocation7_spill] sm:$0xff] }
 0x19b   : > { %2879 = vmatpush3.bf16.msk.msra.mxu0 %vm2878_vm0, %v2877_v32  ;;  %vm4775_vm5 = vmand %vm917_vm9, %vm5876_vm13  ;;  %v4780_v29 = vpop.xlane.xlu1 %1984  ;;  %v5881_v32 = vld [vmem:[#allocation55_spill] sm:$0xff]  ;;  %v1841_v6 = vmul.f32 %v1236_v28, %v1236_v28 }
 0x19c   : > { %vm5882_vm0 = vcmp.lt.s32.totalorder %v5881_v32, 600  ;;  %vm2884_vm13 = vmpackc.low %vm608_vm2, %vm5884_vm15  ;;  %vm902_vm15 = vcmp.eq.s32.totalorder %v5888_v38, %v3664_v47  ;;  %v2478_v4 = vsel %vm4775_vm5, 1.0, %v5710_v35 }
 0x19d   : > { %vm2881_vm9 = vmpackc.low %vm5652_vm10, %vm5882_vm0  ;;  %1982 = vadd.xlane.f32.xlu0 %v1857_v45  ;;  %3139 = vxpose.xlu1.b32.start [1/16] (narrow) %v3138_v53, 8  ;;  %vm5887_vm0 = vcmp.lt.s32.totalorder %v5829_v26, 600  ;;  %v3140_v45 = vpack.i.bf16 %v2461_v11, %v2477_v19  ;;  %v5889_v26 = vld [vmem:[#allocation28_spill] sm:$0xff]  ;;  %v3272_v53 = vmov 0.0|0.0   ;;  %v5892_v11 = vld [vmem:[#allocation27_spill] sm:$0xff] }
 0x19e   : > { %2882 = vmatprep.subr.msk.bf16.mxu0 %vm2881_vm9, %v2880_v10  ;;  %vm1129_vm10 = vmand %vm901_vm6, %vm5887_vm0  ;;  %vm919_vm14 = vcmp.eq.s32.totalorder %v5889_v26, %v3664_v47  ;;  %v1214_v10 = vsel %vm604_vm7, %v4652_v30, 0.0  ;;  %vm920_vm9 = vcmp.eq.s32.totalorder %v5892_v11, %v3664_v47 }
 0x19f   : > { %v4808_v7 = vpop.xlane.xlu1 %1940  ;;  %2885 = vmatpush3.bf16.msk.msra.mxu0 %vm2884_vm13, %v2883_v49  ;;  %vm1146_vm4 = vmand %vm918_vm3, %vm612_vm1  ;;  %v2462_v8 = vsel %vm1129_vm10, 1.0, %v5710_v35  ;;  %v5890_v49 = vld [vmem:[#allocation10_spill] sm:$0xff]  ;;  %vm5891_vm10 = vcmp.lt.s32.totalorder %v5833_v42, 600  ;;  %v1819_v30 = vmul.f32 %v1214_v10, %v1214_v10  ;;  %vm5894_vm13 = vcmp.lt.s32.totalorder %v5835_v43, 600  ;;  %v5895_v42 = vld [vmem:[#allocation9_spill] sm:$0xff] }
 0x1a0   : > { %2934 = vmatprep.subr.bf16.mxu0 %v3272_v53  ;;  %vm1130_vm5 = vmand %vm902_vm15, %vm596_vm8  ;;  %v3142_v60 = vpack.i.bf16 %v2462_v8, %v2478_v4  ;;  %vm903_vm1 = vcmp.eq.s32.totalorder %v5890_v49, %v3664_v47  ;;  %v2479_v19 = vsel %vm1146_vm4, 1.0, %v5710_v35  ;;  %vm5893_vm8 = vcmp.lt.s32.totalorder %v3724_v63, 600 }
 0x1a1   : > { %1938 = vadd.xlane.f32.xlu0 %v1835_v61  ;;  %3141 = vxpose.xlu1.b32.cont [2/16] (narrow) %v3140_v45, 8  ;;  %vm1147_vm6 = vmand %vm919_vm14, %vm5891_vm10  ;;  %v2463_v61 = vsel %vm1130_vm5, 1.0, %v5710_v35  ;;  %v1254_v25 = vsel %vm5893_vm8, %v4290_v59, 0.0  ;;  %vm904_vm0 = vcmp.eq.s32.totalorder %v5895_v42, %v3664_v47  ;;  %vm5896_vm15 = vcmp.lt.s32.totalorder %v4520_v1, 600  ;;  %v5897_v59 = vld [vmem:[#allocation30_spill] sm:$0xff]  ;;  %v5899_v1 = vld [vmem:[#allocation12_spill] sm:$0xff] }
 0x1a2   : > { %vm1131_vm3 = vmand %vm903_vm1, %vm5894_vm13  ;;  %v3144_v15 = vpack.i.bf16 %v2463_v61, %v2479_v19  ;;  %v2480_v45 = vsel %vm1147_vm6, 1.0, %v5710_v35  ;;  %v1859_v38 = vmul.f32 %v1254_v25, %v1254_v25  ;;  %vm921_vm14 = vcmp.eq.s32.totalorder %v5897_v59, %v3664_v47 }
 0x1a3   : > { %v4826_v57 = vpop.xlane.xlu1 %1952  ;;  %vm1148_vm4 = vmand %vm920_vm9, %vm5896_vm15  ;;  %v2464_v63 = vsel %vm1131_vm3, 1.0, %v5710_v35  ;;  %v1232_v43 = vsel %vm622_vm12, %v4688_v22, 0.0  ;;  %vm5898_vm5 = vcmp.lt.s32.totalorder %v4529_v33, 600  ;;  %vm905_vm10 = vcmp.eq.s32.totalorder %v5899_v1, %v3664_v47  ;;  %v5901_v22 = vld [vmem:[#allocation29_spill] sm:$0xff] }
 0x1a4   : > { %vm1132_vm1 = vmand %vm904_vm0, %vm5898_vm5  ;;  %v3146_v4 = vpack.i.bf16 %v2464_v63, %v2480_v45  ;;  %v2481_v8 = vsel %vm1148_vm4, 1.0, %v5710_v35  ;;  %vm5900_vm6 = vcmp.lt.s32.totalorder %v5840_v13, 600  ;;  %v1837_v26 = vmul.f32 %v1232_v43, %v1232_v43  ;;  %v5904_v13 = vld [vmem:[#allocation11_spill] sm:$0xff] }
 0x1a5   : > { %1950 = vadd.xlane.f32.xlu0 %v1841_v6  ;;  %3143 = vxpose.xlu1.b32.cont [3/16] (narrow) %v3142_v60, 8  ;;  %vm1149_vm9 = vmand %vm921_vm14, %vm5900_vm6  ;;  %v2465_v10 = vsel %vm1132_vm1, 1.0, %v5710_v35  ;;  %vm922_vm8 = vcmp.eq.s32.totalorder %v5901_v22, %v3664_v47  ;;  %vm5902_vm13 = vcmp.lt.s32.totalorder %v3719_v48, 600  ;;  %vm5903_vm3 = vcmp.lt.s32.totalorder %v5842_v46, 600 }
 0x1a6   : > { %v1238_v33 = vsel %vm5902_vm13, %v4314_v54, 0.0  ;;  %vm1133_vm0 = vmand %vm905_vm10, %vm5903_vm3  ;;  %v3148_v60 = vpack.i.bf16 %v2465_v10, %v2481_v8  ;;  %vm906_vm15 = vcmp.eq.s32.totalorder %v5904_v13, %v3664_v47  ;;  %v2482_v19 = vsel %vm1149_vm9, 1.0, %v5710_v35  ;;  %v5906_v54 = vld [vmem:[#allocation33_spill] sm:$0xff] }
 0x1a7   : > { %v4841_v28 = vpop.xlane.xlu1 %1908  ;;  %vm5905_vm4 = vcmp.lt.s32.totalorder %v4545_v36, 600  ;;  %v2466_v48 = vsel %vm1133_vm0, 1.0, %v5710_v35  ;;  %vm923_vm5 = vcmp.eq.s32.totalorder %v5906_v54, %v3664_v47  ;;  %v1216_v46 = vsel %vm606_vm11, %v4697_v58, 0.0  ;;  %v5908_v36 = vld [vmem:[#allocation14_spill] sm:$0xff]  ;;  %v5910_v58 = vld [vmem:[#allocation32_spill] sm:$0xff] }
 0x1a8   : > { %vm1150_vm14 = vmand %vm922_vm8, %vm5905_vm4  ;;  %vm5907_vm1 = vcmp.lt.s32.totalorder %v4562_v27, 600  ;;  %v3150_v61 = vpack.i.bf16 %v2466_v48, %v2482_v19  ;;  %vm907_vm6 = vcmp.eq.s32.totalorder %v5908_v36, %v3664_v47  ;;  %vm5909_vm9 = vcmp.lt.s32.totalorder %v5846_v52, 600  ;;  %v5913_v52 = vld [vmem:[#allocation13_spill] sm:$0xff] }
 0x1a9   : > { %1906 = vadd.xlane.f32.xlu0 %v1819_v30  ;;  %3145 = vxpose.xlu1.b32.cont [4/16] (narrow) %v3144_v15, 8  ;;  %v1843_v30 = vmul.f32 %v1238_v33, %v1238_v33  ;;  %vm1134_vm10 = vmand %vm906_vm15, %vm5907_vm1  ;;  %v2483_v25 = vsel %vm1150_vm14, 1.0, %v5710_v35  ;;  %v1821_v15 = vmul.f32 %v1216_v46, %v1216_v46  ;;  %vm924_vm13 = vcmp.eq.s32.totalorder %v5910_v58, %v3664_v47  ;;  %v5931_v36 = vld [vmem:[#allocation17_spill] sm:$0xff] }
 0x1aa   : > { %vm1151_vm8 = vmand %vm923_vm5, %vm5909_vm9  ;;  %v2467_v42 = vsel %vm1134_vm10, 1.0, %v5710_v35  ;;  %vm5911_vm3 = vcmp.lt.s32.totalorder %v3801_v3, 600  ;;  %vm5912_vm0 = vcmp.lt.s32.totalorder %v5848_v18, 600  ;;  %vm908_vm4 = vcmp.eq.s32.totalorder %v5913_v52, %v3664_v47  ;;  %v4981_v58 = vld [vmem:[%s3475_s7 + $0x208] sm:$0xff] }
 0x1ab   : > { %v4856_v6 = vpop.xlane.xlu1 %1988  ;;  %v1256_v27 = vsel %vm5911_vm3, %v4322_v21, 0.0  ;;  %vm1135_vm15 = vmand %vm907_vm6, %vm5912_vm0  ;;  %v3152_v45 = vpack.i.bf16 %v2467_v42, %v2483_v25  ;;  %v2484_v63 = vsel %vm1151_vm8, 1.0, %v5710_v35  ;;  %vm5914_vm14 = vcmp.lt.s32.totalorder %v4588_v51, 600  ;;  %v5915_v21 = vld [vmem:[#allocation36_spill] sm:$0xff] }
 0x1ac   : > { %vm1152_vm5 = vmand %vm924_vm13, %vm5914_vm14  ;;  %v1861_v59 = vmul.f32 %v1256_v27, %v1256_v27  ;;  %v2468_v3 = vsel %vm1135_vm15, 1.0, %v5710_v35  ;;  %vm925_vm1 = vcmp.eq.s32.totalorder %v5915_v21, %v3664_v47  ;;  %vm5916_vm10 = vcmp.lt.s32.totalorder %v4730_v24, 600  ;;  %v5918_v51 = vld [vmem:[#allocation16_spill] sm:$0xff]  ;;  %v5938_v21 = vld [vmem:[#allocation19_spill] sm:$0xff] }
 0x1ad   : > { %1986 = vadd.xlane.f32.xlu0 %v1859_v38  ;;  %3147 = vxpose.xlu1.b32.cont [5/16] (narrow) %v3146_v4, 8  ;;  %v1234_v18 = vsel %vm5916_vm10, %v4748_v31, 0.0  ;;  %vm5917_vm6 = vcmp.lt.s32.totalorder %v4613_v62, 600  ;;  %v3154_v43 = vpack.i.bf16 %v2468_v3, %v2484_v63  ;;  %vm909_vm8 = vcmp.eq.s32.totalorder %v5918_v51, %v3664_v47  ;;  %v5920_v31 = vld [vmem:[#allocation35_spill] sm:$0xff] }
 0x1ae   : > { %vm1136_vm9 = vmand %vm908_vm4, %vm5917_vm6  ;;  %v2485_v1 = vsel %vm1152_vm5, 1.0, %v5710_v35  ;;  %vm5919_vm13 = vcmp.lt.s32.totalorder %v5855_v2, 600  ;;  %v1839_v8 = vmul.f32 %v1234_v18, %v1234_v18  ;;  %vm926_vm0 = vcmp.eq.s32.totalorder %v5920_v31, %v3664_v47  ;;  %v5923_v2 = vld [vmem:[#allocation15_spill] sm:$0xff] }
 0x1af   : > { %v4871_v49 = vpop.xlane.xlu1 %1944  ;;  %vm1153_vm3 = vmand %vm925_vm1, %vm5919_vm13  ;;  %vm5921_vm15 = vcmp.lt.s32.totalorder %v3819_v12, 600  ;;  %vm5922_vm4 = vcmp.lt.s32.totalorder %v5857_v0, 600  ;;  %vm910_vm5 = vcmp.eq.s32.totalorder %v5923_v2, %v3664_v47  ;;  %vm5924_vm1 = vcmp.lt.s32.totalorder %v4633_v56, 600  ;;  %v5926_v56 = vld [vmem:[#allocation18_spill] sm:$0xff] }
 0x1b0   : > { %v1240_v62 = vsel %vm5921_vm15, %v4341_v34, 0.0  ;;  %vm1137_vm14 = vmand %vm909_vm8, %vm5922_vm4  ;;  %v2486_v33 = vsel %vm1153_vm3, 1.0, %v5710_v35  ;;  %v5925_v34 = vld [vmem:[#allocation41_spill] sm:$0xff]  ;;  %v1218_v0 = vsel %vm608_vm2, %v4771_v14, 0.0  ;;  %vm911_vm8 = vcmp.eq.s32.totalorder %v5926_v56, %v3664_v47 }
 0x1b1   : > { %1942 = vadd.xlane.f32.xlu0 %v1837_v26  ;;  %3149 = vxpose.xlu1.b32.cont [6/16] (narrow) %v3148_v60, 8  ;;  %v2469_v26 = vsel %vm1136_vm9, 1.0, %v5710_v35  ;;  %vm1154_vm10 = vmand %vm926_vm0, %vm5924_vm1  ;;  %v1845_v60 = vmul.f32 %v1240_v62, %v1240_v62  ;;  %v2470_v12 = vsel %vm1137_vm14, 1.0, %v5710_v35  ;;  %vm927_vm6 = vcmp.eq.s32.totalorder %v5925_v34, %v3664_v47  ;;  %v5944_v34 = vld [vmem:[#allocation82_spill] sm:$0xff] }
 0x1b2   : > { %v3156_v10 = vpack.i.bf16 %v2469_v26, %v2485_v1  ;;  %vm1138_vm9 = vmand %vm910_vm5, %vm604_vm7  ;;  %v3158_v13 = vpack.i.bf16 %v2470_v12, %v2486_v33  ;;  %vm5927_vm13 = vcmp.lt.s32.totalorder %v5869_v16, 600  ;;  %v505_v48 = vadd.s32 520, %v3494_v37  ;;  %v5941_v26 = vld [vmem:[#allocation57_spill] sm:$0xff]  ;;  %v5943_v12 = vld [vmem:[#allocation83_spill] sm:$0xff] }
 0x1b3   : > { %v4886_v11 = vpop.xlane.xlu1 %1956  ;;  %vm1155_vm3 = vmand %vm927_vm6, %vm5927_vm13  ;;  %v1823_v54 = vmul.f32 %v1218_v0, %v1218_v0  ;;  %v2471_v14 = vsel %vm1138_vm9, 1.0, %v5710_v35  ;;  %vm928_vm7 = vcmp.eq.s32.totalorder %v5928_v44, %v3664_v47  ;;  %vm5929_vm0 = vcmp.lt.s32.totalorder %v3881_v17, 600  ;;  %v5945_v0 = vld [vmem:[#allocation60_spill] sm:$0xff] }
 0x1b4   : > { %v1258_v46 = vsel %vm5929_vm0, %v4348_v40, 0.0  ;;  %vm5930_vm15 = vcmp.lt.s32.totalorder %v5871_v23, 600  ;;  %vm912_vm14 = vcmp.eq.s32.totalorder %v5931_v36, %v3664_v47  ;;  %v2488_v25 = vsel %vm1155_vm3, 1.0, %v5710_v35  ;;  %vm1156_vm5 = vmand %vm928_vm7, %vm622_vm12  ;;  %v5932_v23 = vld [vmem:[#allocation44_spill] sm:$0xff] }
 0x1b5   : > { %1954 = vadd.xlane.f32.xlu0 %v1843_v30  ;;  %3151 = vxpose.xlu1.b32.cont [7/16] (narrow) %v3150_v61, 8  ;;  %v2487_v30 = vsel %vm1154_vm10, 1.0, %v5710_v35  ;;  %vm1139_vm4 = vmand %vm911_vm8, %vm5930_vm15  ;;  %v1863_v17 = vmul.f32 %v1258_v46, %v1258_v46  ;;  %vm929_vm1 = vcmp.eq.s32.totalorder %v5932_v23, %v3664_v47  ;;  %vm5933_vm10 = vcmp.lt.s32.totalorder %v3897_v5, 600 }
 0x1b6   : > { %v3160_v16 = vpack.i.bf16 %v2471_v14, %v2487_v30  ;;  %v2472_v40 = vsel %vm1139_vm4, 1.0, %v5710_v35  ;;  %v1242_v42 = vsel %vm5933_vm10, %v4366_v9, 0.0  ;;  %vm1140_vm6 = vmand %vm912_vm14, %vm606_vm11  ;;  %v2489_v52 = vsel %vm1156_vm5, 1.0, %v5710_v35 }
 0x1b7   : > { %v4901_v38 = vpop.xlane.xlu1 %1912  ;;  %v3162_v50 = vpack.i.bf16 %v2472_v40, %v2488_v25  ;;  %vm5935_vm9 = vcmp.lt.s32.totalorder %v5881_v32, 600  ;;  %vm2036_vm3 = vcmp.eq.s32.totalorder %v3664_v47, 0  ;;  %v1847_v5 = vmul.f32 %v1242_v42, %v1242_v42  ;;  %v5950_v25 = vld [vmem:[#allocation85_spill] sm:$0xff] }
 0x1b8   : > { %vm1157_vm8 = vmand %vm929_vm1, %vm5935_vm9  ;;  %v2473_v9 = vsel %vm1140_vm6, 1.0, %v5710_v35  ;;  %vm930_vm11 = vcmp.eq.s32.totalorder %v5936_v39, %v3664_v47  ;;  %vm5937_vm7 = vcmp.lt.s32.totalorder %v5883_v55, 600  ;;  %vm914_vm15 = vcmp.eq.s32.totalorder %v5938_v21, %v3664_v47 }
 0x1b9   : > { %1910 = vadd.xlane.f32.xlu0 %v1821_v15  ;;  %3153 = vxpose.xlu1.b32.cont [8/16] (narrow) %v3152_v45, 8  ;;  %v4970_v15 = vadd.s32 %v3502_v41, %v505_v48  ;;  %v5934_v45 = vld [vmem:[#allocation20_spill] sm:$0xff]  ;;  %v2490_v18 = vsel %vm1157_vm8, 1.0, %v5710_v35  ;;  %vm5939_vm4 = vcmp.lt.s32.totalorder %v4730_v24, 600  ;;  %vm5942_vm5 = vcmp.lt.s32.totalorder %v5941_v26, 600  ;;  %vm1142_vm1 = vmand %vm914_vm15, %vm608_vm2  ;;  %v5083_v26 = vld [vmem:[%s3475_s7 + $0x218] sm:$0xff] }
 0x1ba   : > { %vm913_vm12 = vcmp.eq.s32.totalorder %v5934_v45, %v3664_v47  ;;  %vm1158_vm14 = vmand %vm930_vm11, %vm5939_vm4  ;;  %v506_v2 = vadd.s32 528, %v3494_v37  ;;  %vm963_vm10 = vcmp.eq.s32.totalorder %v5943_v12, %v3664_v47  ;;  %vm5946_vm6 = vcmp.lt.s32.totalorder %v5945_v0, 600  ;;  %v5953_v45 = vld [vmem:[#allocation89_spill] sm:$0xff]  ;;  %v5959_v0 = vld [vmem:[#allocation67_spill] sm:$0xff] }
 0x1bb   : > { %v4916_v4 = vpop.xlane.xlu1 %1992  ;;  %vm658_vm13 = vcmp.lt.s32.totalorder %v4970_v15, 600  ;;  %vm1141_vm0 = vmand %vm913_vm12, %vm5937_vm7  ;;  %v2491_v24 = vsel %vm1158_vm14, 1.0, %v5710_v35  ;;  %v507_v14 = vadd.s32 536, %v3494_v37 }
 0x1bc   : > { %v1268_v63 = vsel %vm658_vm13, %v4981_v58, 0.0  ;;  %v2474_v1 = vsel %vm1141_vm0, 1.0, %v5710_v35  ;;  %v5043_v36 = vadd.s32 %v3502_v41, %v506_v2  ;;  %vm965_vm0 = vcmp.eq.s32.totalorder %v5953_v45, %v3664_v47 }
 0x1bd   : > { %1990 = vadd.xlane.f32.xlu0 %v1861_v59  ;;  %3155 = vxpose.xlu1.b32.cont [9/16] (narrow) %v3154_v43, 8  ;;  %v3164_v59 = vpack.i.bf16 %v2473_v9, %v2489_v52  ;;  %v1873_v51 = vmul.f32 %v1268_v63, %v1268_v63  ;;  %v3166_v62 = vpack.i.bf16 %v2474_v1, %v2490_v18  ;;  %v5954_v52 = vld [vmem:[#allocation86_spill] sm:$0xff]  ;;  %v5957_v1 = vld [vmem:[#allocation73_spill] sm:$0xff] }
 0x1be   : > { %vm659_vm7 = vcmp.lt.s32.totalorder %v5043_v36, 600  ;;  %v5065_v63 = vld [vmem:[%s3475_s7 + $0x210] sm:$0xff] }
 0x1bf   : > { %v4931_v22 = vpop.xlane.xlu1 %1960  ;;  %vm1193_vm4 = vmand %vm965_vm0, %vm659_vm7 }
 0x1c1   : > { %1946 = vadd.xlane.f32.xlu0 %v1839_v8  ;;  %3157 = vxpose.xlu1.b32.cont [10/16] (narrow) %v3156_v10, 8  ;;  %v5940_v8 = vld [vmem:[#allocation81_spill] sm:$0xff] }
 0x1c2   : > { %v1259_v31 = vsel %vm5942_vm5, %v5940_v8, 0.0  ;;  %vm966_vm5 = vcmp.eq.s32.totalorder %v5957_v1, %v3664_v47  ;;  %v1269_v8 = vsel %vm659_vm7, %v5065_v63, 0.0  ;;  %v5975_v1 = vld [vmem:[#allocation65_spill] sm:$0xff] }
 0x1c3   : > { %v4946_v19 = vpop.xlane.xlu1 %2012  ;;  %v1864_v33 = vmul.f32 %v1259_v31, %v1259_v31 }
 0x1c5   : > { %1958 = vadd.xlane.f32.xlu0 %v1845_v60  ;;  %3159 = vxpose.xlu1.b32.cont [11/16] (narrow) %v3158_v13, 8  ;;  %v2475_v60 = vsel %vm1142_vm1, 1.0, %v5710_v35  ;;  %v1260_v13 = vsel %vm5946_vm6, %v5944_v34, 0.0  ;;  %vm5960_vm6 = vcmp.lt.s32.totalorder %v5959_v0, 600 }
 0x1c6   : > { %v3168_v56 = vpack.i.bf16 %v2475_v60, %v2491_v24  ;;  %v1865_v44 = vmul.f32 %v1260_v13, %v1260_v13  ;;  %v5958_v24 = vld [vmem:[#allocation94_spill] sm:$0xff] }
 0x1c7   : > { %v4962_v61 = vpop.xlane.xlu1 %1968 }
 0x1c9   : > { %1914 = vadd.xlane.f32.xlu0 %v1823_v54  ;;  %3161 = vxpose.xlu1.b32.cont [12/16] (narrow) %v3160_v16, 8  ;;  %v5947_v54 = vld [vmem:[#allocation66_spill] sm:$0xff]  ;;  %v5949_v16 = vld [vmem:[#allocation71_spill] sm:$0xff] }
 0x1ca   : > { %vm5948_vm2 = vcmp.lt.s32.totalorder %v5947_v54, 600  ;;  %vm964_vm9 = vcmp.eq.s32.totalorder %v5949_v16, %v3664_v47 }
 0x1cb   : > { %v2021_v27 = vpop.xlane.xlu1 %2020  ;;  %vm1191_vm12 = vmand %vm963_vm10, %vm5948_vm2  ;;  %vm967_vm10 = vcmp.eq.s32.totalorder %v5958_v24, %v3664_v47 }
 0x1cc   : > { %v4998_v32 = vsel %vm2036_vm3, 1.0, %v2021_v27  ;;  %v2524_v42 = vsel %vm1191_vm12, 1.0, %v5710_v35  ;;  %vm1192_vm11 = vmand %vm964_vm9, %vm658_vm13 }
 0x1cd   : > { %1994 = vadd.xlane.f32.xlu0 %v1863_v17  ;;  %3163 = vxpose.xlu1.b32.cont [13/16] (narrow) %v3162_v50, 8  ;;  %v5951_v17 = vld [vmem:[#allocation58_spill] sm:$0xff]  ;;  %v5052_v50 = vadd.s32 %v3502_v41, %v507_v14  ;;  %vm1195_vm2 = vmand %vm967_vm10, %vm5960_vm6  ;;  %vm5976_vm10 = vcmp.lt.s32.totalorder %v5975_v1, 600 }
 0x1ce   : > { %vm5952_vm8 = vcmp.lt.s32.totalorder %v5951_v17, 600  ;;  %v5962_v14 = vld [vmem:[#allocation90_spill] sm:$0xff] }
 0x1cf   : > { %v2023_v3 = vpop.xlane.xlu1 %2022  ;;  %v1243_v40 = vsel %vm5952_vm8, %v5950_v25, 0.0  ;;  %vm660_vm14 = vcmp.lt.s32.totalorder %v5052_v50, 600  ;;  %v2528_v25 = vsel %vm1195_vm2, 1.0, %v5710_v35  ;;  %v5965_v17 = vld [vmem:[#allocation70_spill] sm:$0xff] }
 0x1d0   : > { %v5007_v43 = vsel %vm2036_vm3, 1.0, %v2023_v3  ;;  %v1848_v27 = vmul.f32 %v1243_v40, %v1243_v40  ;;  %v2525_v3 = vsel %vm1192_vm11, 1.0, %v5710_v35  ;;  %vm1194_vm1 = vmand %vm966_vm5, %vm660_vm14  ;;  %v1270_v2 = vsel %vm660_vm14, %v5083_v26, 0.0  ;;  %v6005_v50 = vld [vmem:[#allocation22_spill] sm:$0xff] }
 0x1d1   : > { %1962 = vadd.xlane.f32.xlu0 %v1847_v5  ;;  %3165 = vxpose.xlu1.b32.cont [14/16] (narrow) %v3164_v59, 8  ;;  %v3029_v55 = vpack.c.bf16 %v5007_v43, %v4998_v32  ;;  %v5955_v5 = vld [vmem:[#allocation61_spill] sm:$0xff]  ;;  %v2527_v12 = vsel %vm1194_vm1, 1.0, %v5710_v35  ;;  %v1875_v13 = vmul.f32 %v1270_v2, %v1270_v2  ;;  %vm5966_vm8 = vcmp.lt.s32.totalorder %v5965_v17, 600  ;;  %v5979_v2 = vld [vmem:[#allocation100_spill] sm:$0xff] }
 0x1d2   : > { %vm5956_vm15 = vcmp.lt.s32.totalorder %v5955_v5, 600  ;;  %v5971_v5 = vld [vmem:[#allocation72_spill] sm:$0xff]  ;;  %v2079_v32 = vsel %vm2036_vm3, 1.0, %v4962_v61 }
 0x1d3   : > { %v2005_v10 = vpop.xlane.xlu1 %2004  ;;  %v1244_v9 = vsel %vm5956_vm15, %v5954_v52, 0.0 }
 0x1d4   : > { %v5029_v20 = vsel %vm2036_vm3, 1.0, %v2005_v10  ;;  %v1849_v18 = vmul.f32 %v1244_v9, %v1244_v9  ;;  %v1874_v10 = vmul.f32 %v1269_v8, %v1269_v8 }
 0x1d5   : > { %2014 = vadd.xlane.f32.xlu0 %v1873_v51  ;;  %3167 = vxpose.xlu1.b32.cont [15/16] (narrow) %v3166_v62, 8  ;;  %v2526_v62 = vsel %vm1193_vm4, 1.0, %v5710_v35  ;;  %vm5972_vm4 = vcmp.lt.s32.totalorder %v5971_v5, 600 }
 0x1d7   : > { %v2007_v30 = vpop.xlane.xlu1 %2006 }
 0x1d8   : > { %v5033_v48 = vsel %vm2036_vm3, 1.0, %v2007_v30  ;;  %v5961_v30 = vld [vmem:[#allocation75_spill] sm:$0xff] }
 0x1d9   : > { %1996 = vadd.xlane.f32.xlu0 %v1864_v33  ;;  %3169 = vxpose.xlu1.b32.end [16/16] (narrow) %v3168_v56, 8  ;;  %v3014_v46 = vpack.c.bf16 %v5033_v48, %v5029_v20  ;;  %vm968_vm12 = vcmp.eq.s32.totalorder %v5961_v30, %v3664_v47 }
 0x1da   : > { %vm1196_vm11 = vmand %vm968_vm12, %vm5966_vm8  ;;  %vm971_vm12 = vcmp.eq.s32.totalorder %v5979_v2, %v3664_v47  ;;  %v5991_v2 = vld [vmem:[#allocation79_spill] sm:$0xff] }
 0x1db   : > { %v1973_v23 = vpop.xlane.xlu1 %1972  ;;  %v2529_v52 = vsel %vm1196_vm11, 1.0, %v5710_v35 }
 0x1dc   : > { %v5062_v39 = vsel %vm2036_vm3, 1.0, %v1973_v23  ;;  %v5967_v23 = vld [vmem:[#allocation98_spill] sm:$0xff] }
 0x1dd   : > { %1998 = vadd.xlane.f32.xlu0 %v1865_v44  ;;  %1560 = vxpose.xlu1.b32.start [1/12] (short) (narrow) %v2524_v42, 8  ;;  %v5963_v44 = vld [vmem:[#allocation63_spill] sm:$0xff]  ;;  %vm969_vm0 = vcmp.eq.s32.totalorder %v5967_v23, %v3664_v47  ;;  %v5987_v23 = vld [vmem:[#allocation68_spill] sm:$0xff] }
 0x1de   : > { %vm5964_vm9 = vcmp.lt.s32.totalorder %v5963_v44, 600  ;;  %v5968_v42 = vld [vmem:[#allocation91_spill] sm:$0xff]  ;;  %vm1197_vm5 = vmand %vm969_vm0, %vm5972_vm4  ;;  %v515_v44 = vadd.s32 600, %v3494_v37  ;;  %vm5988_vm4 = vcmp.lt.s32.totalorder %v5987_v23, 600 }
 0x1df   : > { %v1975_v59 = vpop.xlane.xlu1 %1974  ;;  %v1261_v16 = vsel %vm5964_vm9, %v5962_v14, 0.0  ;;  %v5983_v14 = vld [vmem:[#allocation77_spill] sm:$0xff] }
 0x1e0   : > { %v5070_v21 = vsel %vm2036_vm3, 1.0, %v1975_v59  ;;  %v1866_v40 = vmul.f32 %v1261_v16, %v1261_v16  ;;  %v5973_v59 = vld [vmem:[#allocation76_spill] sm:$0xff]  ;;  %vm5984_vm8 = vcmp.lt.s32.totalorder %v5983_v14, 600 }
 0x1e1   : > { %1964 = vadd.xlane.f32.xlu0 %v1848_v27  ;;  %1561 = vxpose.xlu1.b32.cont [2/12] (short) (narrow) %v2525_v3, 8  ;;  %v3016_v51 = vpack.c.bf16 %v5070_v21, %v5062_v39  ;;  %v5969_v27 = vld [vmem:[#allocation64_spill] sm:$0xff]  ;;  %vm970_vm1 = vcmp.eq.s32.totalorder %v5973_v59, %v3664_v47  ;;  %v513_v3 = vadd.s32 584, %v3494_v37  ;;  %vm1199_vm11 = vmand %vm971_vm12, %vm5984_vm8  ;;  %v5156_v37 = vadd.s32 %v3502_v41, %v515_v44 }
 0x1e2   : > { %vm5970_vm15 = vcmp.lt.s32.totalorder %v5969_v27, 600  ;;  %v5150_v27 = vld [vmem:[%s3475_s7 + $0x248] sm:$0xff]  ;;  %vm6000_vm8 = vcmp.lt.s32.totalorder %v5947_v54, 600 }
 0x1e3   : > { %v2025_v31 = vpop.xlane.xlu1 %2024  ;;  %v1262_v45 = vsel %vm5970_vm15, %v5968_v42, 0.0  ;;  %v5132_v24 = vadd.s32 %v3502_v41, %v513_v3  ;;  %v5169_v41 = vld [vmem:[%s3475_s7 + $0x258] sm:$0xff] }
 0x1e4   : > { %v5095_v33 = vsel %vm2036_vm3, 1.0, %v2025_v31  ;;  %v1867_v9 = vmul.f32 %v1262_v45, %v1262_v45  ;;  %v2530_v31 = vsel %vm1197_vm5, 1.0, %v5710_v35  ;;  %v2532_v45 = vsel %vm1199_vm11, 1.0, %v5710_v35  ;;  %vm2936_vm11 = vmpackc.low %vm658_vm13, %vm6000_vm8 }
 0x1e5   : > { %1966 = vadd.xlane.f32.xlu0 %v1849_v18  ;;  %1562 = vxpose.xlu1.b32.cont [3/12] (short) (narrow) %v2526_v62, 8  ;;  %v5974_v18 = vld [vmem:[#allocation87_spill] sm:$0xff]  ;;  %v5977_v62 = vld [vmem:[#allocation74_spill] sm:$0xff]  ;;  %vm666_vm0 = vcmp.lt.s32.totalorder %v5132_v24, 600  ;;  %vm2940_vm13 = vmpackc.low %vm660_vm14, %vm659_vm7  ;;  %vm6003_vm7 = vcmp.lt.s32.totalorder %v5959_v0, 600  ;;  %vm6004_vm14 = vcmp.lt.s32.totalorder %v5965_v17, 600 }
 0x1e6   : > { %v1246_v8 = vsel %vm5976_vm10, %v5974_v18, 0.0  ;;  %vm5978_vm6 = vcmp.lt.s32.totalorder %v5977_v62, 600  ;;  %v1276_v3 = vsel %vm666_vm0, %v5150_v27, 0.0  ;;  %v5990_v18 = vld [vmem:[#allocation84_spill] sm:$0xff]  ;;  %vm668_vm10 = vcmp.lt.s32.totalorder %v5156_v37, 600  ;;  %v6010_v17 = vld [vmem:[#allocation39_spill] sm:$0xff] }
 0x1e7   : > { %v2027_v60 = vpop.xlane.xlu1 %2026  ;;  %vm1198_vm2 = vmand %vm970_vm1, %vm5978_vm6  ;;  %v2054_v1 = vsel %vm2036_vm3, 1.0, %v5990_v18  ;;  %vm5992_vm6 = vcmp.lt.s32.totalorder %v5991_v2, 600 }
 0x1e8   : > { %v5100_v34 = vsel %vm2036_vm3, 1.0, %v2027_v60  ;;  %v5980_v60 = vld [vmem:[#allocation92_spill] sm:$0xff]  ;;  %v2531_v30 = vsel %vm1198_vm2, 1.0, %v5710_v35 }
 0x1e9   : > { %2016 = vadd.xlane.f32.xlu0 %v1874_v10  ;;  %1563 = vxpose.xlu1.b32.cont [4/12] (short) (narrow) %v2527_v12, 8  ;;  %v3032_v56 = vpack.c.bf16 %v5100_v34, %v5095_v33  ;;  %v1851_v10 = vmul.f32 %v1246_v8, %v1246_v8  ;;  %v5981_v12 = vld [vmem:[#allocation69_spill] sm:$0xff] }
 0x1ea   : > { %vm5982_vm9 = vcmp.lt.s32.totalorder %v5981_v12, 600  ;;  %v5993_v12 = vld [vmem:[#allocation80_spill] sm:$0xff] }
 0x1eb   : > { %vm974_vm12 = vcmp.eq.s32.totalorder %v5993_v12, %v3664_v47  ;;  %v5185_v23 = vpop.xlane.xlu1 %2008 }
 0x1ed   : > { %2018 = vadd.xlane.f32.xlu0 %v1875_v13  ;;  %1564 = vxpose.xlu1.b32.cont [5/12] (short) (narrow) %v2528_v25, 8  ;;  %v1266_v13 = vsel %vm5982_vm9, %v5980_v60, 0.0  ;;  %v5985_v25 = vld [vmem:[#allocation78_spill] sm:$0xff]  ;;  %v1881_v60 = vmul.f32 %v1276_v3, %v1276_v3  ;;  %vm1202_vm9 = vmand %vm974_vm12, %vm668_vm10 }
 0x1ee   : > { %v1871_v16 = vmul.f32 %v1266_v13, %v1266_v13  ;;  %vm972_vm15 = vcmp.eq.s32.totalorder %v5985_v25, %v3664_v47 }
 0x1ef   : > { %vm1200_vm5 = vmand %vm972_vm15, %vm666_vm0  ;;  %vm3273_vm15 = vmmov 0  }
 0x1f1   : > { %2000 = vadd.xlane.f32.xlu0 %v1866_v40  ;;  %1565 = vxpose.xlu1.b32.cont [6/12] (short) (narrow) %v2529_v52, 8  ;;  %v5986_v40 = vld [vmem:[#allocation95_spill] sm:$0xff] }
 0x1f2   : > { %v1250_v42 = vsel %vm5988_vm4, %v5986_v40, 0.0  ;;  %vm2944_vm4 = vmpackc.low %vm6004_vm14, %vm6003_vm7 }
 0x1f3   : > { %v1855_v52 = vmul.f32 %v1250_v42, %v1250_v42 }
 0x1f5   : > { %2002 = vadd.xlane.f32.xlu0 %v1867_v9  ;;  %1566 = vxpose.xlu1.b32.cont [7/12] (short) (narrow) %v2530_v31, 8  ;;  %v5989_v9 = vld [vmem:[#allocation34_spill] sm:$0xff]  ;;  %v2533_v31 = vsel %vm1200_vm5, 1.0, %v5710_v35  ;;  %vm6008_vm5 = vcmp.lt.s32.totalorder %v5971_v5, 600 }
 0x1f6   : > { %vm973_vm1 = vcmp.eq.s32.totalorder %v5989_v9, %v3664_v47 }
 0x1f7   : > { %vm1201_vm2 = vmand %vm973_vm1, %vm5992_vm6  ;;  %vm6009_vm1 = vcmp.lt.s32.totalorder %v5977_v62, 600  ;;  %v3189_v62 = vld [vmem:[%s3475_s7 + $0x250] sm:$0xff] }
 0x1f8   : > { %v2534_v44 = vsel %vm1201_vm2, 1.0, %v5710_v35  ;;  %vm2948_vm6 = vmpackc.low %vm6009_vm1, %vm6008_vm5  ;;  %vm6014_vm2 = vcmp.lt.s32.totalorder %v5983_v14, 600  ;;  %v6016_v14 = vld [vmem:[#allocation42_spill] sm:$0xff] }
 0x1f9   : > { %1970 = vadd.xlane.f32.xlu0 %v1851_v10  ;;  %1567 = vxpose.xlu1.b32.cont [8/12] (short) (narrow) %v2531_v30, 8  ;;  %v1278_v30 = vsel %vm668_vm10, %v5169_v41, 0.0  ;;  %vm2952_vm12 = vmpackc.low %vm666_vm0, %vm6014_vm2  ;;  %v2085_v24 = vsel %vm2036_vm3, 1.0, %v6016_v14  ;;  %vm1592_vm0 = vcmask 785408  }
 0x1fd   : > { %2010 = vadd.xlane.f32.xlu0 %v1871_v16  ;;  %1568 = vxpose.xlu1.b32.cont [9/12] (short) (narrow) %v2532_v45, 8  ;;  %v1883_v16 = vmul.f32 %v1278_v30, %v1278_v30  ;;  %v2535_v45 = vsel %vm1202_vm9, 1.0, %v5710_v35  ;;  %vm6015_vm9 = vcmp.lt.s32.totalorder %v5991_v2, 600 }
 0x1fe   : > { %v1917_v59 = vpop.xlane.xlu0 %1916  ;;  %vm2956_vm8 = vmpackc.low %vm668_vm10, %vm6015_vm9 }
 0x1ff   : > { %v2053_v8 = vsel %vm2036_vm3, 1.0, %v1917_v59  ;;  %v5994_v59 = vld [vmem:[#allocation88_spill] sm:$0xff] }
 0x200   : > { %v2958_v10 = vpack.c.bf16 %v2054_v1, %v2053_v8  ;;  %v2055_v3 = vsel %vm2036_vm3, 1.0, %v5994_v59  ;;  %v5195_v8 = vpop.xlane.xlu1 %1976 }
 0x201   : > { %1978 = vadd.xlane.f32.xlu0 %v1855_v52  ;;  %1569 = vxpose.xlu1.b32.cont [10/12] (short) (narrow) %v2533_v31, 8 }
 0x202   : > { %2959 = vmatprep.subr.bf16.mxu1 %v2958_v10  ;;  %v1885_v13 = vpop.xlane.xlu0 %1884  ;;  %v5995_v10 = vld [vmem:[#allocation93_spill] sm:$0xff] }
 0x203   : > { %v2037_v40 = vsel %vm2036_vm3, 1.0, %v1885_v13 }
 0x205   : > { %2030 = vadd.xlane.f32.xlu0 %v1881_v60  ;;  %1570 = vxpose.xlu1.b32.cont [11/12] (short) (narrow) %v2534_v44, 8  ;;  %v2039_v60 = vsel %vm2036_vm3, 1.0, %v5995_v10  ;;  %v5996_v44 = vld [vmem:[#allocation96_spill] sm:$0xff] }
 0x206   : > { %v1887_v25 = vpop.xlane.xlu0 %1886 }
 0x207   : > { %v2038_v42 = vsel %vm2036_vm3, 1.0, %v1887_v25  ;;  %v5205_v25 = vpop.xlane.xlu1 %2028 }
 0x208   : > { %v2960_v52 = vpack.c.bf16 %v2038_v42, %v2037_v40  ;;  %v2109_v48 = vsel %vm2036_vm3, 1.0, %v5205_v25 }
 0x209   : > { %2034 = vadd.xlane.f32.xlu0 %v1883_v16  ;;  %1571 = vxpose.xlu1.b32.end [12/12] (short) (narrow) %v2535_v45, 8  ;;  %v2057_v16 = vsel %vm2036_vm3, 1.0, %v5996_v44 }
 0x20a   : > { %v1923_v9 = vpop.xlane.xlu0 %1922  ;;  %2961 = vmatpush3.bf16.msra.mxu1 %v2960_v52  ;;  %v5997_v52 = vld [vmem:[#allocation97_spill] sm:$0xff] }
 0x20b   : > { %v2056_v18 = vsel %vm2036_vm3, 1.0, %v1923_v9  ;;  %v2041_v9 = vsel %vm2036_vm3, 1.0, %v5997_v52 }
 0x20c   : > { %v2962_v1 = vpack.c.bf16 %v2056_v18, %v2055_v3  ;;  %v5214_v18 = vpop.xlane.xlu1 %2032 }
 0x20e   : > { %v1891_v31 = vpop.xlane.xlu0 %1890  ;;  %2963 = vmatprep.subr.bf16.mxu1 %v2962_v1 }
 0x20f   : > { %v2040_v12 = vsel %vm2036_vm3, 1.0, %v1891_v31  ;;  %v5998_v31 = vld [vmem:[#allocation99_spill] sm:$0xff] }
 0x210   : > { %v2964_v13 = vpack.c.bf16 %v2040_v12, %v2039_v60  ;;  %v2059_v10 = vsel %vm2036_vm3, 1.0, %v5998_v31 }
 0x212   : > { %v1927_v30 = vpop.xlane.xlu0 %1926  ;;  %2965 = vmatpush3.bf16.msra.mxu1 %v2964_v13  ;;  %v3187_v13 = vld [vmem:[%s3475_s7 + $0x200] sm:$0xff] }
 0x213   : > { %v2058_v40 = vsel %vm2036_vm3, 1.0, %v1927_v30  ;;  %v2935_v30 = vpack.c.bf16 %v4981_v58, %v3187_v13 }
 0x214   : > { %v2966_v42 = vpack.c.bf16 %v2058_v40, %v2057_v16 }
 0x216   : > { %v1895_v45 = vpop.xlane.xlu0 %1894  ;;  %2967 = vmatprep.subr.bf16.mxu1 %v2966_v42 }
 0x217   : > { %v2042_v59 = vsel %vm2036_vm3, 1.0, %v1895_v45  ;;  %v5999_v45 = vld [vmem:[#allocation101_spill] sm:$0xff] }
 0x218   : > { %v2968_v3 = vpack.c.bf16 %v2042_v59, %v2041_v9  ;;  %v2043_v52 = vsel %vm2036_vm3, 1.0, %v5999_v45  ;;  %v2939_v59 = vpack.c.bf16 %v5083_v26, %v5065_v63  ;;  %v6002_v26 = vld [vmem:[#allocation37_spill] sm:$0xff] }
 0x21a   : > { %v1931_v1 = vpop.xlane.xlu0 %1930  ;;  %2969 = vmatpush3.bf16.msra.mxu1 %v2968_v3 }
 0x21b   : > { %v2060_v60 = vsel %vm2036_vm3, 1.0, %v1931_v1  ;;  %v6001_v1 = vld [vmem:[#allocation31_spill] sm:$0xff] }
 0x21c   : > { %v2970_v12 = vpack.c.bf16 %v2060_v60, %v2059_v10  ;;  %v2061_v31 = vsel %vm2036_vm3, 1.0, %v6001_v1  ;;  %v2045_v10 = vsel %vm2036_vm3, 1.0, %v6002_v26 }
 0x21d   : > { %v5223_v44 = vpop.trf.xlu1 }
 0x21e   : > { %v1899_v16 = vpop.xlane.xlu0 %1898  ;;  %2971 = vmatprep.subr.bf16.mxu1 %v2970_v12  ;;  %v3171_v40 = vunpack.i.l.bf16 %v5223_v44  ;;  %v3174_v42 = vunpack.i.h.bf16 %v5223_v44  ;;  %v6006_v12 = vld [vmem:[#allocation21_spill] sm:$0xff] }
 0x21f   : > { %v2044_v9 = vsel %vm2036_vm3, 1.0, %v1899_v16  ;;  %v6007_v13 = vpack.c.bf16 %v6005_v50, %v6006_v12  ;;  %v3188_v16 = vld [vmem:[%s3475_s7 + $0x240] sm:$0xff]  ;;  %s3194_s7 = sshll.u32 %s3274_s15, 4  ;;  %s3195_s7 = int_to_ptr.vmem [resolvable:$false] %s3194_s7 }
 0x220   : > { %v2972_v58 = vpack.c.bf16 %v2044_v9, %v2043_v52  ;;  %1660 = vmatprep.mubr.f32.mxu0 %v3171_v40  ;;  %2178 = vmatprep.mubr.f32.mxu1 %v3171_v40  ;;  %v2951_v0 = vpack.c.bf16 %v5150_v27, %v3188_v16  ;;  %v6011_v40 = vld [vmem:[#allocation38_spill] sm:$0xff]  ;;  %v6013_v9 = vld [vmem:[#allocation45_spill] sm:$0xff]  ;;  %v2955_v27 = vpack.c.bf16 %v5169_v41, %v3189_v62  ;;  %s3196_s8 = scalar_lea.vmem %s3195_s7, 128  ;;  %p3197_p3 = scmp.lt.s32.totalorder %s5463_s28, %s3195_s7 }
 0x221   : > { %1661 = vmatmul.mubr.f32.vlgmr.msra.gmra.mrb[0].mxu0 %v3174_v42  ;;  %v6012_v45 = vpack.c.bf16 %v6010_v17, %v6011_v40  ;;  %p3198_p5 = scmp.lt.s32.totalorder %s3196_s8, %s3190_s6 }
 0x222   : > { %2937 = vmatpush3.bf16.msk.msra.mxu0 %vm2936_vm11, %v2935_v30  ;;  %v1935_v3 = vpop.xlane.xlu0 %1934  ;;  %2973 = vmatpush3.bf16.msra.mxu1 %v2972_v58  ;;  %v2063_v58 = vsel %vm2036_vm3, 1.0, %v6013_v9 }
 0x223   : > { %v2062_v15 = vsel %vm2036_vm3, 1.0, %v1935_v3  ;;  %2938 = vmatprep.subr.bf16.mxu0 %v3272_v53  ;;  %2808 = vmatprep.mubr.msk.f32.mxu0 %vm3273_vm15, %v5710_v35  ;;  %p3199_p6 = por %p3198_p5, %p3197_p3 }
 0x224   : > { %v2974_v54 = vpack.c.bf16 %v2062_v15, %v2061_v31  ;;  %v6017_v15 = vld [vmem:[#allocation47_spill] sm:$0xff] }
 0x225   : > { %p3200_p7 = pnand %p3199_p6, %p3193_p2 }
 0x226   : > { %2941 = vmatpush3.bf16.msk.msra.mxu0 %vm2940_vm13, %v2939_v59  ;;  %v1903_v63 = vpop.xlane.xlu0 %1902  ;;  %2975 = vmatprep.subr.bf16.mxu1 %v2974_v54  ;;  %v2047_v54 = vsel %vm2036_vm3, 1.0, %v6017_v15  ;;  %v6019_v15 = vld [vmem:[#allocation102_spill] sm:$0xff] }
 0x227   : > { %v2046_v60 = vsel %vm2036_vm3, 1.0, %v1903_v63  ;;  %2942 = vmatprep.subr.bf16.mxu0 %v3272_v53  ;;  %v6021_v21 = vunpack.i.h.bf16 %v6019_v15 }
 0x228   : > { %v2976_v36 = vpack.c.bf16 %v2046_v60, %v2045_v10  ;;  %v2065_v10 = vsel %vm2036_vm3, 1.0, %v4808_v7  ;;  %v2067_v7 = vsel %vm2036_vm3, 1.0, %v4871_v49 }
 0x22a   : > { %2945 = vmatpush3.bf16.msk.msra.mxu0 %vm2944_vm4, %v6007_v13  ;;  %v1983_v30 = vpop.xlane.xlu0 %1982  ;;  %2977 = vmatpush3.bf16.msra.mxu1 %v2976_v36  ;;  %v2049_v13 = vsel %vm2036_vm3, 1.0, %v4841_v28  ;;  %v2051_v28 = vsel %vm2036_vm3, 1.0, %v4901_v38  ;;  %v2087_v38 = vsel %vm2036_vm3, 1.0, %v4780_v29 }
 0x22b   : > { %2946 = vmatprep.subr.bf16.mxu0 %v3272_v53  ;;  %v2086_v3 = vsel %vm2036_vm3, 1.0, %v1983_v30 }
 0x22c   : > { %v2990_v31 = vpack.c.bf16 %v2086_v3, %v2085_v24 }
 0x22e   : > { %2949 = vmatpush3.bf16.msk.msra.mxu0 %vm2948_vm6, %v6012_v45  ;;  %v1939_v52 = vpop.xlane.xlu0 %1938 }
 0x22f   : > { %v2064_v59 = vsel %vm2036_vm3, 1.0, %v1939_v52  ;;  %2950 = vmatprep.subr.bf16.mxu0 %v3272_v53 }
 0x230   : > { %v2978_v5 = vpack.c.bf16 %v2064_v59, %v2063_v58 }
 0x232   : > { %2953 = vmatpush3.bf16.msk.msra.mxu0 %vm2952_vm12, %v2951_v0  ;;  %v1951_v1 = vpop.xlane.xlu0 %1950  ;;  %2979 = vmatprep.subr.bf16.mxu1 %v2978_v5 }
 0x233   : > { %2954 = vmatprep.subr.bf16.mxu0 %v3272_v53  ;;  %v2070_v5 = vsel %vm2036_vm3, 1.0, %v1951_v1 }
 0x236   : > { %2957 = vmatpush3.bf16.msk.msra.mxu0 %vm2956_vm8, %v2955_v27  ;;  %v1907_v41 = vpop.xlane.xlu0 %1906  ;;  %v6018_v27 = vld [vmem:[#allocation46_spill] sm:$0xff] }
 0x237   : > { %v2048_v63 = vsel %vm2036_vm3, 1.0, %v1907_v41  ;;  %2991 = vmatprep.subr.bf16.mxu0 %v2990_v31  ;;  %v2069_v3 = vsel %vm2036_vm3, 1.0, %v6018_v27 }
 0x238   : > { %v2980_v26 = vpack.c.bf16 %v2048_v63, %v2047_v54  ;;  %v2992_v14 = vpack.c.bf16 %v2070_v5, %v2069_v3  ;;  %v6020_v54 = vunpack.i.l.bf16 %v6019_v15 }
 0x23a   : > { %v1987_v2 = vpop.xlane.xlu0 %1986  ;;  %2981 = vmatpush3.bf16.msra.mxu1 %v2980_v26  ;;  %v2089_v26 = vsel %vm2036_vm3, 1.0, %v4856_v6  ;;  %v2073_v6 = vsel %vm2036_vm3, 1.0, %v4886_v11  ;;  %v2075_v11 = vsel %vm2036_vm3, 1.0, %v4931_v22 }
 0x23b   : > { %v2088_v49 = vsel %vm2036_vm3, 1.0, %v1987_v2 }
 0x23c   : > { %v2994_v1 = vpack.c.bf16 %v2088_v49, %v2087_v38 }
 0x23e   : > { %v1943_v37 = vpop.xlane.xlu0 %1942 }
 0x23f   : > { %v2066_v60 = vsel %vm2036_vm3, 1.0, %v1943_v37 }
 0x240   : > { %v2982_v36 = vpack.c.bf16 %v2066_v60, %v2065_v10 }
 0x242   : > { %v1955_v50 = vpop.xlane.xlu0 %1954  ;;  %2983 = vmatprep.subr.bf16.mxu1 %v2982_v36 }
 0x243   : > { %v2072_v31 = vsel %vm2036_vm3, 1.0, %v1955_v50  ;;  %v2101_v50 = vsel %vm2036_vm3, 1.0, %v4946_v19 }
 0x246   : > { %v1911_v12 = vpop.xlane.xlu0 %1910 }
 0x247   : > { %v2050_v30 = vsel %vm2036_vm3, 1.0, %v1911_v12 }
 0x248   : > { %v2984_v16 = vpack.c.bf16 %v2050_v30, %v2049_v13  ;;  %v2091_v30 = vsel %vm2036_vm3, 1.0, %v4916_v4 }
 0x24a   : > { %v1991_v0 = vpop.xlane.xlu0 %1990  ;;  %2985 = vmatpush3.bf16.msra.mxu1 %v2984_v16 }
 0x24b   : > { %v2090_v29 = vsel %vm2036_vm3, 1.0, %v1991_v0 }
 0x24c   : > { %v2998_v10 = vpack.c.bf16 %v2090_v29, %v2089_v26  ;;  %v1279_v26 = vld [vmem:[%s5387_s11] sm:$0xf] }
 0x24e   : > { %v1947_v17 = vpop.xlane.xlu0 %1946 }
 0x24f   : > { %v2068_v40 = vsel %vm2036_vm3, 1.0, %v1947_v17 }
 0x250   : > { %v2986_v45 = vpack.c.bf16 %v2068_v40, %v2067_v7 }
 0x252   : > { %v1959_v52 = vpop.xlane.xlu0 %1958  ;;  %2987 = vmatprep.subr.bf16.mxu1 %v2986_v45 }
 0x253   : > { %v2074_v60 = vsel %vm2036_vm3, 1.0, %v1959_v52 }
 0x254   : > { %v3000_v16 = vpack.c.bf16 %v2074_v60, %v2073_v6 }
 0x256   : > { %v1915_v9 = vpop.xlane.xlu0 %1914 }
 0x257   : > { %v2052_v58 = vsel %vm2036_vm3, 1.0, %v1915_v9 }
 0x258   : > { %v2988_v59 = vpack.c.bf16 %v2052_v58, %v2051_v28 }
 0x25a   : > { %v1995_v62 = vpop.xlane.xlu0 %1994  ;;  %2989 = vmatpush3.bf16.msra.mxu1 %v2988_v59 }
 0x25b   : > { %3022 = vmatprep.subr.bf16.mxu1 %v3272_v53 }
 0x25d   : > { %v5333_v24 = vpop.trf.xlu1  ;;  %2179 = vmatmul.mubr.f32.vlgmr.msra.gmra.mrb[2].mxu1 %v3174_v42  ;;  %v2071_v42 = vsel %vm2036_vm3, 1.0, %v4826_v57  ;;  %v2092_v57 = vsel %vm2036_vm3, 1.0, %v1995_v62 }
 0x25e   : > { %v1963_v41 = vpop.xlane.xlu0 %1962  ;;  %2809 = vmatmul.mubr.msk.f32.vlgmr.msra.gmra.mrb[2].mxu0 %vm1592_vm0, %v5333_v24  ;;  %2835 = vmatprep.mubr.msk.f32.mxu1 %vm3273_vm15, %v5710_v35  ;;  %v2996_v2 = vpack.c.bf16 %v2072_v31, %v2071_v42  ;;  %v3002_v0 = vpack.c.bf16 %v2092_v57, %v2091_v30 }
 0x25f   : > { %2993 = vmatpush3.bf16.msra.mxu0 %v2992_v14  ;;  %2248 = vmatprep.mubr.f32.mxu0 %v6020_v54  ;;  %v2685_v44 = vpop.f32.mrb[0].mxu1  ;;  %v2076_v19 = vsel %vm2036_vm3, 1.0, %v1963_v41 }
 0x260   : > { %2995 = vmatprep.subr.bf16.mxu0 %v2994_v1  ;;  %v2686_v63 = vpop.f32.mrb[1].mxu1  ;;  %v3004_v7 = vpack.c.bf16 %v2076_v19, %v2075_v11 }
 0x261   : > { %v5353_v37 = vadd.f32 %v2686_v63, %v2685_v44  ;;  %v2099_v44 = vsel %vm2036_vm3, 1.0, %v5185_v23 }
 0x262   : > { %v2015_v36 = vpop.xlane.xlu0 %2014 }
 0x263   : > { %v2102_v12 = vsel %vm2036_vm3, 1.0, %v2015_v36  ;;  %2997 = vmatpush3.bf16.msra.mxu0 %v2996_v2 }
 0x264   : > { %v3023_v13 = vpack.c.bf16 %v2102_v12, %v2101_v50  ;;  %2999 = vmatprep.subr.bf16.mxu0 %v2998_v10 }
 0x266   : > { %v1997_v17 = vpop.xlane.xlu0 %1996  ;;  %3024 = vmatpush3.bf16.msra.mxu1 %v3023_v13 }
 0x267   : > { %3001 = vmatpush3.bf16.msra.mxu0 %v3000_v16  ;;  %3025 = vmatprep.subr.bf16.mxu1 %v3272_v53  ;;  %v2093_v4 = vsel %vm2036_vm3, 1.0, %v1997_v17 }
 0x268   : > { %3003 = vmatprep.subr.bf16.mxu0 %v3002_v0 }
 0x26a   : > { %v1999_v40 = vpop.xlane.xlu0 %1998 }
 0x26b   : > { %v2094_v45 = vsel %vm2036_vm3, 1.0, %v1999_v40  ;;  %3005 = vmatpush3.bf16.msra.mxu0 %v3004_v7 }
 0x26c   : > { %v3006_v52 = vpack.c.bf16 %v2094_v45, %v2093_v4 }
 0x26e   : > { %3007 = vmatprep.subr.bf16.mxu0 %v3006_v52  ;;  %v1965_v9 = vpop.xlane.xlu0 %1964 }
 0x26f   : > { %v2077_v58 = vsel %vm2036_vm3, 1.0, %v1965_v9 }
 0x272   : > { %v1967_v28 = vpop.xlane.xlu0 %1966 }
 0x273   : > { %v2078_v22 = vsel %vm2036_vm3, 1.0, %v1967_v28 }
 0x274   : > { %v3008_v59 = vpack.c.bf16 %v2078_v22, %v2077_v58 }
 0x276   : > { %3009 = vmatpush3.bf16.msra.mxu0 %v3008_v59  ;;  %v2017_v5 = vpop.xlane.xlu0 %2016 }
 0x277   : > { %v2103_v49 = vsel %vm2036_vm3, 1.0, %v2017_v5 }
 0x27a   : > { %v2019_v62 = vpop.xlane.xlu0 %2018 }
 0x27b   : > { %v2104_v27 = vsel %vm2036_vm3, 1.0, %v2019_v62 }
 0x27c   : > { %v3026_v3 = vpack.c.bf16 %v2104_v27, %v2103_v49 }
 0x27e   : > { %v2001_v38 = vpop.xlane.xlu0 %2000  ;;  %3027 = vmatpush3.bf16.msra.mxu1 %v3026_v3 }
 0x27f   : > { %3028 = vmatprep.subr.bf16.mxu1 %v3272_v53  ;;  %v2095_v1 = vsel %vm2036_vm3, 1.0, %v2001_v38 }
 0x282   : > { %v2003_v14 = vpop.xlane.xlu0 %2002  ;;  %3030 = vmatpush3.bf16.msra.mxu1 %v3029_v55 }
 0x283   : > { %v2096_v31 = vsel %vm2036_vm3, 1.0, %v2003_v14  ;;  %3031 = vmatprep.subr.bf16.mxu1 %v3272_v53 }
 0x284   : > { %v3010_v41 = vpack.c.bf16 %v2096_v31, %v2095_v1 }
 0x286   : > { %3011 = vmatprep.subr.bf16.mxu0 %v3010_v41  ;;  %v1971_v29 = vpop.xlane.xlu0 %1970  ;;  %3033 = vmatpush3.bf16.msra.mxu1 %v3032_v56  ;;  %v2083_v56 = vsel %vm2036_vm3, 1.0, %v5195_v8  ;;  %v2111_v8 = vsel %vm2036_vm3, 1.0, %v5214_v18 }
 0x287   : > { %v2080_v43 = vsel %vm2036_vm3, 1.0, %v1971_v29  ;;  %3034 = vmatprep.subr.bf16.mxu1 %v3272_v53 }
 0x288   : > { %v3012_v55 = vpack.c.bf16 %v2080_v43, %v2079_v32 }
 0x28a   : > { %3013 = vmatpush3.bf16.msra.mxu0 %v3012_v55  ;;  %v2011_v54 = vpop.xlane.xlu0 %2010 }
 0x28b   : > { %v2100_v33 = vsel %vm2036_vm3, 1.0, %v2011_v54  ;;  %3015 = vmatprep.subr.bf16.mxu0 %v3014_v46 }
 0x28c   : > { %v3018_v61 = vpack.c.bf16 %v2100_v33, %v2099_v44 }
 0x28e   : > { %3017 = vmatpush3.bf16.msra.mxu0 %v3016_v51  ;;  %v1979_v34 = vpop.xlane.xlu0 %1978 }
 0x28f   : > { %v2084_v23 = vsel %vm2036_vm3, 1.0, %v1979_v34  ;;  %3019 = vmatprep.subr.bf16.mxu0 %v3018_v61 }
 0x290   : > { %v3020_v42 = vpack.c.bf16 %v2084_v23, %v2083_v56 }
 0x292   : > { %3021 = vmatpush3.bf16.msra.mxu0 %v3020_v42  ;;  %v2031_v20 = vpop.xlane.xlu0 %2030 }
 0x293   : > { %v2110_v46 = vsel %vm2036_vm3, 1.0, %v2031_v20 }
 0x294   : > { %v3035_v39 = vpack.c.bf16 %v2110_v46, %v2109_v48 }
 0x295   : > { %2249 = vmatmul.mubr.f32.vlgmr.msra.gmra.mrb[4].mxu0 %v6021_v21 }
 0x296   : > { %v2035_v51 = vpop.xlane.xlu0 %2034  ;;  %3036 = vmatpush3.bf16.msra.mxu1 %v3035_v39 }
 0x297   : > { %v2112_v63 = vsel %vm2036_vm3, 1.0, %v2035_v51  ;;  %3037 = vmatprep.subr.bf16.mxu1 %v3272_v53  ;;  %vm283_vm3 = vcmask 11264  }
 0x298   : > { %v3038_v25 = vpack.c.bf16 %v2112_v63, %v2111_v8  ;;  %284 = vst.msk [vmem:[%s5449_s26] sm:$0xf] %vm283_vm3, %v5710_v35 }
 0x29a   : > { %3039 = vmatpush3.bf16.msra.mxu1 %v3038_v25 }
 0x29d   : > { %2836 = vmatmul.mubr.msk.f32.vlgmr.msra.gmra.mrb[4].mxu1 %vm1592_vm0, %v5333_v24 }
 0x2f4   : > { %v2650_v47 = vpop.f32.mrb[0].mxu0 }
 0x2f5   : > { %v2651_v53 = vpop.f32.mrb[1].mxu0 }
 0x2f6   : > { %v2652_v18 = vadd.f32 %v2651_v53, %v2650_v47 }
 0x2f8   : > { %v1733_v24 = vadd.f32 %v5353_v37, %v2652_v18 }
 0x330   : > { %v2733_v15 = vpop.f32.mrb[2].mxu1 }
 0x331   : > { %v1802_v2 = vpop.f32.mrb[2].mxu0  ;;  %v2734_v10 = vpop.f32.mrb[3].mxu1 }
 0x332   : > { %v1803_v60 = vadd.f32 %v1802_v2, %v1733_v24  ;;  %v2735_v36 = vadd.f32 %v2734_v10, %v2733_v15  ;;  %v2810_v50 = vpop.f32.mrb[3].mxu0 }
 0x334   : > { %v1806_v57 = vadd.f32 %v1803_v60, %v1279_v26 }
 0x336   : > { %1807 = vst [vmem:[%s5387_s11] sm:$0xf] %v1806_v57 }
 0x337   : > { %3203 = shalt.err (!%p3200_p7)
}
 0x338   : > { %s3204_s9 = scalar_lea.hbm %s5461_s4, 64  ;;  %s3208_s18 = scalar_lea.hbm %s5516_s2, 128 }
 0x339   : > { %p3205_p9 = scmp.ne.s32.totalorder %s5461_s4, %s3204_s9  ;;  %p3209_p12 = scmp.lt.u32.totalorder %s5461_s4, %s5516_s2 }
 0x33a   : > { %p3210_p13 = scmp.lt.u32.totalorder %s3208_s18, %s3204_s9  ;;  %p3212_p1 = scmp.lt.u32.totalorder %s3204_s9, %s5461_s4 }
 0x33b   : > { %p3206_p10 = pnand %p3205_p9, %p3335_p4 }
 0x33c   : > { %p3211_p0 = por %p3210_p13, %p3209_p12 }
 0x33d   : > { %p3207_p11 = pneg %p3206_p10 }
 0x33e   : > { %p3213_p2 = por %p3212_p1, %p3211_p0 }
 0x340   : > { %p3214_p3 = pnand %p3213_p2, %p3207_p11 }
 0x342   : > { %3217 = shalt.err (!%p3214_p3)
}
 0x343   : > { %3040 = dma.vmem_to_hbm [thread:$0]  (%p3335_p4), %s5463_s28, 64, %s5461_s4, %s2328_s5   ;;  %v2113_v13 = vld [vmem:[%s5449_s26] sm:$0xf] }
 0x368   : > { %v2768_v35 = vpop.f32.mrb[4].mxu0 }
 0x369   : > { %v2769_v37 = vpop.f32.mrb[5].mxu0 }
 0x36a   : > { %v2770_v12 = vadd.f32 %v2769_v37, %v2768_v35 }
 0x36c   : > { %v2251_v6 = vadd.f32 %v2770_v12, %v2735_v36 }
 0x370   : > { %v2320_v30 = vpop.f32.mrb[4].mxu1 }
 0x371   : > { %v2321_v16 = vadd.f32 %v2320_v30, %v2251_v6  ;;  %v2837_v0 = vpop.f32.mrb[5].mxu1 }
 0x373   : > { %v2324_v19 = vadd.f32 %v2321_v16, %v2113_v13 }
 0x375   : > { %2326 = vst.msk [vmem:[%s5449_s26] sm:$0xf] %vm283_vm3, %v2324_v19 }
 0x376 PF: > { %p3046_p5 = scmp.ge.s32.totalorder %s3268_s17, 2  ;;  %s2360_s22 = sand.u32 1, %s3248_s12  }
 0x377   : > { %s2361_s23 = scalar_lea.sflag [#allocation3], %s2360_s22 }
 0x378   : > { %p3043_p6 = pnand %p3046_p5, %p3342_p8 }
 0x37a   : > { %3243 = dma.done.wait (!%p3043_p6), %s2361_s23, 64  }
 0x37b   : > { %3245 = vsyncadd (!%p3043_p6), %s2361_s23, 4294967232  ;;  %s17_s17 = sadd.s32 1, %s3268_s17   ;;  %s6022_s12 = smov %s3252_s13 }
 0x37c   : > { %p14_p4 = scmp.ge.s32.totalorder %s17_s17, 4   ;;  %s6023_s13 = smov %s3256_s14 }
 0x37d   : > { %s6024_s14 = smov %s3348_s25  ;;  %s6025_s15 = smov %s3264_s16 }
 0x37e   : > { %s6026_s16 = smov %s6028_s20  ;;  %16 = sbr.rel (!%p14_p4) target bundleno = 4 (0x4), region = 82 }
 0x385   :  { %2373 = vsyncpa [#allocation3], 1 }
 0x386   :  { %2375 = vsyncpa [#allocation3 + $0x1], 1 }

</bundles_post_ra>
